<compile_context>
chip_gen: v7x
topology: tpu7x:2x2x1
jax: 0.10.0
libtpu: 0.0.40
codegen_flags: <defaults>
</compile_context>

<pallas_src>
import numpy as np
import jax
import jax.numpy as jnp
from jax.experimental import pallas as pl
from jax.experimental.pallas import tpu as pltpu


# ------------------------------ fused kernel ------------------------------- #

def _conv_encoder_kernel(x0_ref, x1_ref, x2_ref, x3_ref,
                         m1_ref, s1_ref, t1_ref,
                         m2_ref, s2_ref, t2_ref,
                         sel_ref, wl1_ref, s3_ref, t3_ref,
                         wl2_ref, bl2_ref,
                         enc_ref, idx1_ref, idx2_ref):
    """Whole ConvEncoder forward for one batch block, VMEM-resident.

    Row-stream layout: matmul rows are (sample, padded output row), matmul
    columns are (pool-window column b, pooled column q, channel c).  The 2x2
    pool stride along rows is absorbed by the mod-4 row-parity split of the
    input (x0..x3 refs), along columns by the banded weights M1/M2.
    """
    f32 = jnp.float32
    bf16 = jnp.bfloat16
    TB = x0_ref.shape[0]
    x_par = (x0_ref, x1_ref, x2_ref, x3_ref)

    # --------- first_conv: Conv2d(1,16,5) + BN + ReLU + MaxPool(2) --------- #
    row1 = jax.lax.broadcasted_iota(jnp.int32, (TB * 16, 192), 0)
    col1 = jax.lax.broadcasted_iota(jnp.int32, (TB * 16, 192), 1)
    u1 = row1 & 15            # padded pooled-row index within a sample
    q1 = col1 >> 4            # pooled column index
    pooled1 = []
    for rp in range(2):                       # parity of the pooled row
        best_v = None
        best_i = None
        for a1 in range(2):                   # row inside the 2x2 pool window
            acc = None                        # conv1 row h = 4*u + 2*rp + a1
            for i in range(5):                # conv kernel row tap
                t = 2 * rp + a1 + i
                xs = x_par[t % 4][:, (t // 4):(t // 4) + 16, :]   # (TB,16,28)
                d = jnp.dot(xs.reshape(TB * 16, 28), m1_ref[i],
                            preferred_element_type=f32)            # (TB*16,384)
                acc = d if acc is None else acc + d
            # folded BatchNorm2d(16) + ReLU (scale/shift pre-tiled per column)
            y = jnp.maximum(acc * s1_ref[...] + t1_ref[...], 0.0)
            for b1 in range(2):               # column inside the pool window
                v = y[:, b1 * 192:(b1 + 1) * 192]                   # (TB*16,192)
                idx = 96 * u1 + 48 * rp + 24 * a1 + 2 * q1 + b1     # h*24 + w
                if best_v is None:
                    best_v, best_i = v, idx
                else:
                    take = v > best_v
                    best_v = jnp.where(take, v, best_v)
                    best_i = jnp.where(take, idx, best_i)
        pooled1.append(best_v.astype(bf16).reshape(TB, 16, 192))
        idx1_ref[:, rp, :, :] = best_i.reshape(TB, 16, 192)

    # --------- second_conv: Conv2d(16,32,5) + BN + ReLU + MaxPool(2) ------- #
    row2 = jax.lax.broadcasted_iota(jnp.int32, (TB * 8, 128), 0)
    col2 = jax.lax.broadcasted_iota(jnp.int32, (TB * 8, 128), 1)
    p2 = row2 & 7             # padded pooled-row index within a sample
    q2 = col2 >> 5            # pooled column index
    ys = []
    for a2 in range(2):                       # row inside the 2x2 pool window
        acc = None                            # conv2 row h2 = 2*p2 + a2
        for i in range(5):
            t = a2 + i
            src = pooled1[t % 2][:, (t // 2):(t // 2) + 8, :]       # (TB,8,192)
            d = jnp.dot(src.reshape(TB * 8, 192), m2_ref[i],
                        preferred_element_type=f32)                  # (TB*8,256)
            acc = d if acc is None else acc + d
        ys.append(jnp.maximum(acc * s2_ref[...] + t2_ref[...], 0.0))
    best_v = None
    best_i = None
    for a2 in range(2):
        for b2 in range(2):
            v = ys[a2][:, b2 * 128:(b2 + 1) * 128]                   # (TB*8,128)
            idx = 16 * p2 + 8 * a2 + 2 * q2 + b2                     # h*8 + w
            if best_v is None:
                best_v, best_i = v, idx
            else:
                take = v > best_v
                best_v = jnp.where(take, v, best_v)
                best_i = jnp.where(take, idx, best_i)
    idx2_ref[...] = best_i.reshape(TB, 8, 128)
    pooled2 = best_v.astype(bf16)                                    # (TB*8,128)

    # --------- flatten + Linear(512,128) + BN1d + ReLU + Linear(128,E) ----- #
    h = jnp.zeros((TB, 128), f32)
    for p in range(4):        # the 4 valid pooled rows of each sample
        part = jnp.dot(sel_ref[p], pooled2, preferred_element_type=f32)
        h = h + jnp.dot(part.astype(bf16), wl1_ref[p],
                        preferred_element_type=f32)
    h = jnp.maximum(h * s3_ref[...] + t3_ref[...], 0.0)
    enc_ref[...] = jnp.dot(h.astype(bf16), wl2_ref[...],
                           preferred_element_type=f32) + bl2_ref[...]


# --------------------------- host-side preparation ------------------------- #

def _fold_bn(prev_bias, gamma, beta, mean, var, eps=1e-5):
    scale = gamma / np.sqrt(var + eps)
    shift = beta + (prev_bias - mean) * scale
    return scale.astype(np.float32), shift.astype(np.float32)


def build_operands(params, encoded_space_dim):
    """Fold eval-mode BN and re-band / re-permute weights into kernel layout."""
    p = {k: np.asarray(v, np.float32) for k, v in params.items()}
    E = encoded_space_dim
    assert E <= 128

    # conv1 banded weights: M1[i, w_in, b1*192 + q*16 + c] = W1[c,0,i,w_in-(2q+b1)]
    w1 = p['conv1_w']
    M1 = np.zeros((5, 28, 2 * 12 * 16), np.float32)
    for i in range(5):
        for b1 in range(2):
            for q in range(12):
                for j in range(5):
                    col = b1 * 192 + q * 16
                    M1[i, 2 * q + b1 + j, col:col + 16] = w1[:, 0, i, j]
    s1, t1 = _fold_bn(p['conv1_b'], p['bn1_g'], p['bn1_b'], p['bn1_m'], p['bn1_v'])
    sc1 = np.tile(s1, 24)[None, :]
    sh1 = np.tile(t1, 24)[None, :]

    # conv2 banded weights: M2[i, q*16+c1, b2*128 + Q*32 + c2] = W2[c2,c1,i,q-(2Q+b2)]
    w2 = p['conv2_w']
    M2 = np.zeros((5, 12 * 16, 2 * 4 * 32), np.float32)
    for i in range(5):
        for b2 in range(2):
            for Q in range(4):
                for j in range(5):
                    q = 2 * Q + b2 + j
                    col = b2 * 128 + Q * 32
                    M2[i, q * 16:(q + 1) * 16, col:col + 32] = w2[:, :, i, j].T
    s2, t2 = _fold_bn(p['conv2_b'], p['bn2_g'], p['bn2_b'], p['bn2_m'], p['bn2_v'])
    sc2 = np.tile(s2, 8)[None, :]
    sh2 = np.tile(t2, 8)[None, :]

    # encoder_lin: permute Linear(512,128) into one (128,128) block per pooled
    # row P2, accepting features in the kernel's (Q2*32 + c2) column order.
    wl1 = p['lin1_w'].reshape(128, 32, 4, 4).transpose(2, 3, 1, 0)   # (P,Q,c,out)
    Wl1b = np.ascontiguousarray(wl1.reshape(4, 128, 128))
    s3, t3 = _fold_bn(p['lin1_b'], p['bn3_g'], p['bn3_b'], p['bn3_m'], p['bn3_v'])
    Wl2p = np.zeros((128, 128), np.float32)
    Wl2p[:, :E] = p['lin2_w'].T
    bl2 = np.zeros((1, 128), np.float32)
    bl2[0, :E] = p['lin2_b']

    bf = jnp.bfloat16
    return dict(
        M1=jnp.asarray(M1, bf), sc1=jnp.asarray(sc1), sh1=jnp.asarray(sh1),
        M2=jnp.asarray(M2, bf), sc2=jnp.asarray(sc2), sh2=jnp.asarray(sh2),
        Wl1b=jnp.asarray(Wl1b, bf),
        sc3=jnp.asarray(s3[None, :]), sh3=jnp.asarray(t3[None, :]),
        Wl2p=jnp.asarray(Wl2p, bf), bl2=jnp.asarray(bl2), E=E)


def conv_encoder_forward(x, ops):
    """Mirrors ConvEncoder.forward (eval mode).  x: (N, 1, 28, 28)."""
    N = x.shape[0]
    TB = max(d for d in range(1, min(N, 8) + 1) if N % d == 0)   # batch tile
    nblk = N // TB

    # mod-4 row-parity split of the input, zero padded to 17 rows so every
    # in-kernel row-stream slice is static and in bounds.
    x2 = x[:, 0].astype(jnp.float32)                              # (N,28,28)
    x4 = []
    for r in range(4):
        xr = x2[:, r::4, :]                                       # (N,7,28)
        xr = jnp.pad(xr, ((0, 0), (0, 17 - xr.shape[1]), (0, 0)))
        x4.append(xr.astype(jnp.bfloat16))

    # row-selection matrices (one per pooled row) used to flatten in-kernel
    sel = np.zeros((4, TB, TB * 8), np.float32)
    for p2 in range(4):
        for n in range(TB):
            sel[p2, n, n * 8 + p2] = 1.0
    sel = jnp.asarray(sel, jnp.bfloat16)

    def full(shape):
        return pl.BlockSpec(shape, lambda i: (0,) * len(shape))

    xspec = pl.BlockSpec((TB, 17, 28), lambda i: (i, 0, 0))
    in_specs = [
        xspec, xspec, xspec, xspec,
        full((5, 28, 384)), full((1, 384)), full((1, 384)),
        full((5, 192, 256)), full((1, 256)), full((1, 256)),
        full((4, TB, TB * 8)), full((4, 128, 128)),
        full((1, 128)), full((1, 128)),
        full((128, 128)), full((1, 128)),
    ]
    out_shape = (
        jax.ShapeDtypeStruct((N, 128), jnp.float32),
        jax.ShapeDtypeStruct((N, 2, 16, 192), jnp.int32),
        jax.ShapeDtypeStruct((N, 8, 128), jnp.int32),
    )
    out_specs = (
        pl.BlockSpec((TB, 128), lambda i: (i, 0)),
        pl.BlockSpec((TB, 2, 16, 192), lambda i: (i, 0, 0, 0)),
        pl.BlockSpec((TB, 8, 128), lambda i: (i, 0, 0)),
    )

    enc_p, idx1_p, idx2_p = pl.pallas_call(
        _conv_encoder_kernel,
        out_shape=out_shape,
        grid=(nblk,),
        in_specs=in_specs,
        out_specs=out_specs,
        compiler_params=pltpu.CompilerParams(
            dimension_semantics=("parallel",)),
    )(x4[0], x4[1], x4[2], x4[3],
      ops['M1'], ops['sc1'], ops['sh1'],
      ops['M2'], ops['sc2'], ops['sh2'],
      sel, ops['Wl1b'], ops['sc3'], ops['sh3'],
      ops['Wl2p'], ops['bl2'])

    # back to the module's output conventions (tiny tensors, host/XLA side)
    E = ops['E']
    encoded = enc_p[:, :E]
    idx1 = idx1_p[:, :, :6, :].reshape(N, 2, 6, 12, 16)
    idx1 = idx1.transpose(0, 4, 2, 1, 3).reshape(N, 16, 12, 12)
    idx2 = idx2_p[:, :4, :].reshape(N, 4, 4, 32).transpose(0, 3, 1, 2)
    # TODO(synk): training-mode Dropout / batch-stat BatchNorm are stochastic /
    # batch-dependent; this kernel implements deterministic eval-mode semantics,
    # and pool indices are int32 (PyTorch returns int64).
    return encoded, idx1, idx2


# --------------------------------- params ---------------------------------- #

def init_params(key, encoded_space_dim=8):
    ks = jax.random.split(key, 8)

    def u(k, shape, fan_in):
        bound = 1.0 / jnp.sqrt(jnp.float32(fan_in))
        return jax.random.uniform(k, shape, jnp.float32, -bound, bound)

    p = {}
    p['conv1_w'] = u(ks[0], (16, 1, 5, 5), 1 * 5 * 5)
    p['conv1_b'] = u(ks[1], (16,), 1 * 5 * 5)
    p['bn1_g'], p['bn1_b'] = jnp.ones((16,)), jnp.zeros((16,))
    p['bn1_m'], p['bn1_v'] = jnp.zeros((16,)), jnp.ones((16,))
    p['conv2_w'] = u(ks[2], (32, 16, 5, 5), 16 * 5 * 5)
    p['conv2_b'] = u(ks[3], (32,), 16 * 5 * 5)
    p['bn2_g'], p['bn2_b'] = jnp.ones((32,)), jnp.zeros((32,))
    p['bn2_m'], p['bn2_v'] = jnp.zeros((32,)), jnp.ones((32,))
    p['lin1_w'] = u(ks[4], (128, 32 * 4 * 4), 32 * 4 * 4)
    p['lin1_b'] = u(ks[5], (128,), 32 * 4 * 4)
    p['bn3_g'], p['bn3_b'] = jnp.ones((128,)), jnp.zeros((128,))
    p['bn3_m'], p['bn3_v'] = jnp.zeros((128,)), jnp.ones((128,))
    p['lin2_w'] = u(ks[6], (encoded_space_dim, 128), 128)
    p['lin2_b'] = u(ks[7], (encoded_space_dim,), 128)
    return p


if __name__ == "__main__":
    key = jax.random.PRNGKey(0)
    kx, kp = jax.random.split(key)
    # 28x28 single-channel input is implied by the 32*4*4 flatten size.
    x = jax.random.normal(kx, (2, 1, 28, 28), jnp.float32)
    params = init_params(kp, encoded_space_dim=8)

    ops = build_operands(params, encoded_space_dim=8)
    encoded, idx1, idx2 = conv_encoder_forward(x, ops)
    jax.block_until_ready((encoded, idx1, idx2))

    assert encoded.shape == (2, 8)
    assert idx1.shape == (2, 16, 12, 12) and idx1.dtype == jnp.int32
    assert idx2.shape == (2, 32, 4, 4) and idx2.dtype == jnp.int32
    print("KERNEL_OK")
</pallas_src>

<mosaic_0001>
module attributes {stable_mosaic.version = 11 : i64} {
  func.func @_conv_encoder_kernel(%arg0: i32, %arg1: memref<2x17x28xbf16, #tpu.memory_space<vmem>>, %arg2: memref<2x17x28xbf16, #tpu.memory_space<vmem>>, %arg3: memref<2x17x28xbf16, #tpu.memory_space<vmem>>, %arg4: memref<2x17x28xbf16, #tpu.memory_space<vmem>>, %arg5: memref<5x28x384xbf16, #tpu.memory_space<vmem>>, %arg6: memref<1x384xf32, #tpu.memory_space<vmem>>, %arg7: memref<1x384xf32, #tpu.memory_space<vmem>>, %arg8: memref<5x192x256xbf16, #tpu.memory_space<vmem>>, %arg9: memref<1x256xf32, #tpu.memory_space<vmem>>, %arg10: memref<1x256xf32, #tpu.memory_space<vmem>>, %arg11: memref<4x2x16xbf16, #tpu.memory_space<vmem>>, %arg12: memref<4x128x128xbf16, #tpu.memory_space<vmem>>, %arg13: memref<1x128xf32, #tpu.memory_space<vmem>>, %arg14: memref<1x128xf32, #tpu.memory_space<vmem>>, %arg15: memref<128x128xbf16, #tpu.memory_space<vmem>>, %arg16: memref<1x128xf32, #tpu.memory_space<vmem>>, %arg17: memref<2x128xf32, #tpu.memory_space<vmem>>, %arg18: memref<2x2x16x192xi32, #tpu.memory_space<vmem>>, %arg19: memref<2x8x128xi32, #tpu.memory_space<vmem>>) attributes {dimension_semantics = [#tpu.dimension_semantics<parallel>], iteration_bounds = array<i64: 1>, scalar_prefetch = 0 : i64, scratch_operands = 0 : i64, tpu.core_type = #tpu.core_type<tc>, window_params = [{transform_indices = @transform_0, window_bounds = array<i64: 2, 17, 28>}, {transform_indices = @transform_1, window_bounds = array<i64: 2, 17, 28>}, {transform_indices = @transform_2, window_bounds = array<i64: 2, 17, 28>}, {transform_indices = @transform_3, window_bounds = array<i64: 2, 17, 28>}, {pipeline_mode = #tpu.pipeline_mode<synchronous>, transform_indices = @transform_4, window_bounds = array<i64: 5, 28, 384>}, {pipeline_mode = #tpu.pipeline_mode<synchronous>, transform_indices = @transform_5, window_bounds = array<i64: 1, 384>}, {pipeline_mode = #tpu.pipeline_mode<synchronous>, transform_indices = @transform_6, window_bounds = array<i64: 1, 384>}, {pipeline_mode = #tpu.pipeline_mode<synchronous>, transform_indices = @transform_7, window_bounds = array<i64: 5, 192, 256>}, {pipeline_mode = #tpu.pipeline_mode<synchronous>, transform_indices = @transform_8, window_bounds = array<i64: 1, 256>}, {pipeline_mode = #tpu.pipeline_mode<synchronous>, transform_indices = @transform_9, window_bounds = array<i64: 1, 256>}, {pipeline_mode = #tpu.pipeline_mode<synchronous>, transform_indices = @transform_10, window_bounds = array<i64: 4, 2, 16>}, {pipeline_mode = #tpu.pipeline_mode<synchronous>, transform_indices = @transform_11, window_bounds = array<i64: 4, 128, 128>}, {pipeline_mode = #tpu.pipeline_mode<synchronous>, transform_indices = @transform_12, window_bounds = array<i64: 1, 128>}, {pipeline_mode = #tpu.pipeline_mode<synchronous>, transform_indices = @transform_13, window_bounds = array<i64: 1, 128>}, {pipeline_mode = #tpu.pipeline_mode<synchronous>, transform_indices = @transform_14, window_bounds = array<i64: 128, 128>}, {pipeline_mode = #tpu.pipeline_mode<synchronous>, transform_indices = @transform_15, window_bounds = array<i64: 1, 128>}, {transform_indices = @transform_16, window_bounds = array<i64: 2, 128>}, {transform_indices = @transform_17, window_bounds = array<i64: 2, 2, 16, 192>}, {transform_indices = @transform_18, window_bounds = array<i64: 2, 8, 128>}]} {
    %0 = tpu.iota {dimensions = array<i32: 0>} : vector<32x192xi32>
    %1 = tpu.iota {dimensions = array<i32: 1>} : vector<32x192xi32>
    %c15_i32 = arith.constant 15 : i32
    %2 = vector.broadcast %c15_i32 : i32 to vector<32x192xi32>
    %3 = arith.andi %0, %2 : vector<32x192xi32>
    %c4_i32 = arith.constant 4 : i32
    %4 = vector.broadcast %c4_i32 : i32 to vector<32x192xi32>
    %5 = arith.shrsi %1, %4 : vector<32x192xi32>
    %c0 = arith.constant 0 : index
    %c0_0 = arith.constant 0 : index
    %c0_1 = arith.constant 0 : index
    %6 = vector.load %arg1[%c0, %c0_0, %c0_1] : memref<2x17x28xbf16, #tpu.memory_space<vmem>>, vector<2x16x28xbf16>
    %7 = vector.shape_cast %6 : vector<2x16x28xbf16> to vector<32x28xbf16>
    %c0_2 = arith.constant 0 : index
    %c0_3 = arith.constant 0 : index
    %c0_4 = arith.constant 0 : index
    %8 = vector.load %arg5[%c0_2, %c0_3, %c0_4] : memref<5x28x384xbf16, #tpu.memory_space<vmem>>, vector<1x28x384xbf16>
    %9 = vector.shape_cast %8 : vector<1x28x384xbf16> to vector<28x384xbf16>
    %cst = arith.constant dense<0.000000e+00> : vector<32x384xf32>
    %10 = tpu.matmul %7, %9, %cst {dimension_numbers = #tpu.dot_dimension_numbers<[1], [0], [0], [1], [0, 0, 1, 1], [], []>} : vector<32x28xbf16>, vector<28x384xbf16>, vector<32x384xf32> -> vector<32x384xf32>
    %c0_5 = arith.constant 0 : index
    %c0_6 = arith.constant 0 : index
    %c0_7 = arith.constant 0 : index
    %11 = vector.load %arg2[%c0_5, %c0_6, %c0_7] : memref<2x17x28xbf16, #tpu.memory_space<vmem>>, vector<2x16x28xbf16>
    %12 = vector.shape_cast %11 : vector<2x16x28xbf16> to vector<32x28xbf16>
    %c1 = arith.constant 1 : index
    %c0_8 = arith.constant 0 : index
    %c0_9 = arith.constant 0 : index
    %13 = vector.load %arg5[%c1, %c0_8, %c0_9] : memref<5x28x384xbf16, #tpu.memory_space<vmem>>, vector<1x28x384xbf16>
    %14 = vector.shape_cast %13 : vector<1x28x384xbf16> to vector<28x384xbf16>
    %cst_10 = arith.constant dense<0.000000e+00> : vector<32x384xf32>
    %15 = tpu.matmul %12, %14, %cst_10 {dimension_numbers = #tpu.dot_dimension_numbers<[1], [0], [0], [1], [0, 0, 1, 1], [], []>} : vector<32x28xbf16>, vector<28x384xbf16>, vector<32x384xf32> -> vector<32x384xf32>
    %16 = arith.addf %10, %15 : vector<32x384xf32>
    %c0_11 = arith.constant 0 : index
    %c0_12 = arith.constant 0 : index
    %c0_13 = arith.constant 0 : index
    %17 = vector.load %arg3[%c0_11, %c0_12, %c0_13] : memref<2x17x28xbf16, #tpu.memory_space<vmem>>, vector<2x16x28xbf16>
    %18 = vector.shape_cast %17 : vector<2x16x28xbf16> to vector<32x28xbf16>
    %c2 = arith.constant 2 : index
    %c0_14 = arith.constant 0 : index
    %c0_15 = arith.constant 0 : index
    %19 = vector.load %arg5[%c2, %c0_14, %c0_15] : memref<5x28x384xbf16, #tpu.memory_space<vmem>>, vector<1x28x384xbf16>
    %20 = vector.shape_cast %19 : vector<1x28x384xbf16> to vector<28x384xbf16>
    %cst_16 = arith.constant dense<0.000000e+00> : vector<32x384xf32>
    %21 = tpu.matmul %18, %20, %cst_16 {dimension_numbers = #tpu.dot_dimension_numbers<[1], [0], [0], [1], [0, 0, 1, 1], [], []>} : vector<32x28xbf16>, vector<28x384xbf16>, vector<32x384xf32> -> vector<32x384xf32>
    %22 = arith.addf %16, %21 : vector<32x384xf32>
    %c0_17 = arith.constant 0 : index
    %c0_18 = arith.constant 0 : index
    %c0_19 = arith.constant 0 : index
    %23 = vector.load %arg4[%c0_17, %c0_18, %c0_19] : memref<2x17x28xbf16, #tpu.memory_space<vmem>>, vector<2x16x28xbf16>
    %24 = vector.shape_cast %23 : vector<2x16x28xbf16> to vector<32x28xbf16>
    %c3 = arith.constant 3 : index
    %c0_20 = arith.constant 0 : index
    %c0_21 = arith.constant 0 : index
    %25 = vector.load %arg5[%c3, %c0_20, %c0_21] : memref<5x28x384xbf16, #tpu.memory_space<vmem>>, vector<1x28x384xbf16>
    %26 = vector.shape_cast %25 : vector<1x28x384xbf16> to vector<28x384xbf16>
    %cst_22 = arith.constant dense<0.000000e+00> : vector<32x384xf32>
    %27 = tpu.matmul %24, %26, %cst_22 {dimension_numbers = #tpu.dot_dimension_numbers<[1], [0], [0], [1], [0, 0, 1, 1], [], []>} : vector<32x28xbf16>, vector<28x384xbf16>, vector<32x384xf32> -> vector<32x384xf32>
    %28 = arith.addf %22, %27 : vector<32x384xf32>
    %c0_23 = arith.constant 0 : index
    %c1_24 = arith.constant 1 : index
    %c0_25 = arith.constant 0 : index
    %29 = vector.load %arg1[%c0_23, %c1_24, %c0_25] : memref<2x17x28xbf16, #tpu.memory_space<vmem>>, vector<2x16x28xbf16>
    %30 = vector.shape_cast %29 : vector<2x16x28xbf16> to vector<32x28xbf16>
    %c4 = arith.constant 4 : index
    %c0_26 = arith.constant 0 : index
    %c0_27 = arith.constant 0 : index
    %31 = vector.load %arg5[%c4, %c0_26, %c0_27] : memref<5x28x384xbf16, #tpu.memory_space<vmem>>, vector<1x28x384xbf16>
    %32 = vector.shape_cast %31 : vector<1x28x384xbf16> to vector<28x384xbf16>
    %cst_28 = arith.constant dense<0.000000e+00> : vector<32x384xf32>
    %33 = tpu.matmul %30, %32, %cst_28 {dimension_numbers = #tpu.dot_dimension_numbers<[1], [0], [0], [1], [0, 0, 1, 1], [], []>} : vector<32x28xbf16>, vector<28x384xbf16>, vector<32x384xf32> -> vector<32x384xf32>
    %34 = arith.addf %28, %33 : vector<32x384xf32>
    %c0_29 = arith.constant 0 : index
    %c0_30 = arith.constant 0 : index
    %35 = vector.load %arg6[%c0_29, %c0_30] : memref<1x384xf32, #tpu.memory_space<vmem>>, vector<1x384xf32>
    %36 = vector.broadcast %35 : vector<1x384xf32> to vector<32x384xf32>
    %37 = arith.mulf %34, %36 : vector<32x384xf32>
    %c0_31 = arith.constant 0 : index
    %c0_32 = arith.constant 0 : index
    %38 = vector.load %arg7[%c0_31, %c0_32] : memref<1x384xf32, #tpu.memory_space<vmem>>, vector<1x384xf32>
    %39 = vector.broadcast %38 : vector<1x384xf32> to vector<32x384xf32>
    %40 = arith.addf %37, %39 : vector<32x384xf32>
    %cst_33 = arith.constant 0.000000e+00 : f32
    %41 = vector.broadcast %cst_33 : f32 to vector<32x384xf32>
    %42 = arith.maximumf %40, %41 : vector<32x384xf32>
    %43 = vector.extract_strided_slice %42 {offsets = [0, 0], sizes = [32, 192], strides = [1, 1]} : vector<32x384xf32> to vector<32x192xf32>
    %c96_i32 = arith.constant 96 : i32
    %44 = vector.broadcast %c96_i32 : i32 to vector<32x192xi32>
    %45 = arith.muli %44, %3 : vector<32x192xi32>
    %c0_i32 = arith.constant 0 : i32
    %46 = vector.broadcast %c0_i32 : i32 to vector<32x192xi32>
    %47 = arith.addi %45, %46 : vector<32x192xi32>
    %c0_i32_34 = arith.constant 0 : i32
    %48 = vector.broadcast %c0_i32_34 : i32 to vector<32x192xi32>
    %49 = arith.addi %47, %48 : vector<32x192xi32>
    %c2_i32 = arith.constant 2 : i32
    %50 = vector.broadcast %c2_i32 : i32 to vector<32x192xi32>
    %51 = arith.muli %50, %5 : vector<32x192xi32>
    %52 = arith.addi %49, %51 : vector<32x192xi32>
    %c0_i32_35 = arith.constant 0 : i32
    %53 = vector.broadcast %c0_i32_35 : i32 to vector<32x192xi32>
    %54 = arith.addi %52, %53 : vector<32x192xi32>
    %55 = vector.extract_strided_slice %42 {offsets = [0, 192], sizes = [32, 192], strides = [1, 1]} : vector<32x384xf32> to vector<32x192xf32>
    %c96_i32_36 = arith.constant 96 : i32
    %56 = vector.broadcast %c96_i32_36 : i32 to vector<32x192xi32>
    %57 = arith.muli %56, %3 : vector<32x192xi32>
    %c0_i32_37 = arith.constant 0 : i32
    %58 = vector.broadcast %c0_i32_37 : i32 to vector<32x192xi32>
    %59 = arith.addi %57, %58 : vector<32x192xi32>
    %c0_i32_38 = arith.constant 0 : i32
    %60 = vector.broadcast %c0_i32_38 : i32 to vector<32x192xi32>
    %61 = arith.addi %59, %60 : vector<32x192xi32>
    %c2_i32_39 = arith.constant 2 : i32
    %62 = vector.broadcast %c2_i32_39 : i32 to vector<32x192xi32>
    %63 = arith.muli %62, %5 : vector<32x192xi32>
    %64 = arith.addi %61, %63 : vector<32x192xi32>
    %c1_i32 = arith.constant 1 : i32
    %65 = vector.broadcast %c1_i32 : i32 to vector<32x192xi32>
    %66 = arith.addi %64, %65 : vector<32x192xi32>
    %67 = arith.cmpf ogt, %55, %43 : vector<32x192xf32>
    %68 = arith.select %67, %55, %43 : vector<32x192xi1>, vector<32x192xf32>
    %69 = arith.select %67, %66, %54 : vector<32x192xi1>, vector<32x192xi32>
    %c0_40 = arith.constant 0 : index
    %c0_41 = arith.constant 0 : index
    %c0_42 = arith.constant 0 : index
    %70 = vector.load %arg2[%c0_40, %c0_41, %c0_42] : memref<2x17x28xbf16, #tpu.memory_space<vmem>>, vector<2x16x28xbf16>
    %71 = vector.shape_cast %70 : vector<2x16x28xbf16> to vector<32x28xbf16>
    %c0_43 = arith.constant 0 : index
    %c0_44 = arith.constant 0 : index
    %c0_45 = arith.constant 0 : index
    %72 = vector.load %arg5[%c0_43, %c0_44, %c0_45] : memref<5x28x384xbf16, #tpu.memory_space<vmem>>, vector<1x28x384xbf16>
    %73 = vector.shape_cast %72 : vector<1x28x384xbf16> to vector<28x384xbf16>
    %cst_46 = arith.constant dense<0.000000e+00> : vector<32x384xf32>
    %74 = tpu.matmul %71, %73, %cst_46 {dimension_numbers = #tpu.dot_dimension_numbers<[1], [0], [0], [1], [0, 0, 1, 1], [], []>} : vector<32x28xbf16>, vector<28x384xbf16>, vector<32x384xf32> -> vector<32x384xf32>
    %c0_47 = arith.constant 0 : index
    %c0_48 = arith.constant 0 : index
    %c0_49 = arith.constant 0 : index
    %75 = vector.load %arg3[%c0_47, %c0_48, %c0_49] : memref<2x17x28xbf16, #tpu.memory_space<vmem>>, vector<2x16x28xbf16>
    %76 = vector.shape_cast %75 : vector<2x16x28xbf16> to vector<32x28xbf16>
    %c1_50 = arith.constant 1 : index
    %c0_51 = arith.constant 0 : index
    %c0_52 = arith.constant 0 : index
    %77 = vector.load %arg5[%c1_50, %c0_51, %c0_52] : memref<5x28x384xbf16, #tpu.memory_space<vmem>>, vector<1x28x384xbf16>
    %78 = vector.shape_cast %77 : vector<1x28x384xbf16> to vector<28x384xbf16>
    %cst_53 = arith.constant dense<0.000000e+00> : vector<32x384xf32>
    %79 = tpu.matmul %76, %78, %cst_53 {dimension_numbers = #tpu.dot_dimension_numbers<[1], [0], [0], [1], [0, 0, 1, 1], [], []>} : vector<32x28xbf16>, vector<28x384xbf16>, vector<32x384xf32> -> vector<32x384xf32>
    %80 = arith.addf %74, %79 : vector<32x384xf32>
    %c0_54 = arith.constant 0 : index
    %c0_55 = arith.constant 0 : index
    %c0_56 = arith.constant 0 : index
    %81 = vector.load %arg4[%c0_54, %c0_55, %c0_56] : memref<2x17x28xbf16, #tpu.memory_space<vmem>>, vector<2x16x28xbf16>
    %82 = vector.shape_cast %81 : vector<2x16x28xbf16> to vector<32x28xbf16>
    %c2_57 = arith.constant 2 : index
    %c0_58 = arith.constant 0 : index
    %c0_59 = arith.constant 0 : index
    %83 = vector.load %arg5[%c2_57, %c0_58, %c0_59] : memref<5x28x384xbf16, #tpu.memory_space<vmem>>, vector<1x28x384xbf16>
    %84 = vector.shape_cast %83 : vector<1x28x384xbf16> to vector<28x384xbf16>
    %cst_60 = arith.constant dense<0.000000e+00> : vector<32x384xf32>
    %85 = tpu.matmul %82, %84, %cst_60 {dimension_numbers = #tpu.dot_dimension_numbers<[1], [0], [0], [1], [0, 0, 1, 1], [], []>} : vector<32x28xbf16>, vector<28x384xbf16>, vector<32x384xf32> -> vector<32x384xf32>
    %86 = arith.addf %80, %85 : vector<32x384xf32>
    %c0_61 = arith.constant 0 : index
    %c1_62 = arith.constant 1 : index
    %c0_63 = arith.constant 0 : index
    %87 = vector.load %arg1[%c0_61, %c1_62, %c0_63] : memref<2x17x28xbf16, #tpu.memory_space<vmem>>, vector<2x16x28xbf16>
    %88 = vector.shape_cast %87 : vector<2x16x28xbf16> to vector<32x28xbf16>
    %c3_64 = arith.constant 3 : index
    %c0_65 = arith.constant 0 : index
    %c0_66 = arith.constant 0 : index
    %89 = vector.load %arg5[%c3_64, %c0_65, %c0_66] : memref<5x28x384xbf16, #tpu.memory_space<vmem>>, vector<1x28x384xbf16>
    %90 = vector.shape_cast %89 : vector<1x28x384xbf16> to vector<28x384xbf16>
    %cst_67 = arith.constant dense<0.000000e+00> : vector<32x384xf32>
    %91 = tpu.matmul %88, %90, %cst_67 {dimension_numbers = #tpu.dot_dimension_numbers<[1], [0], [0], [1], [0, 0, 1, 1], [], []>} : vector<32x28xbf16>, vector<28x384xbf16>, vector<32x384xf32> -> vector<32x384xf32>
    %92 = arith.addf %86, %91 : vector<32x384xf32>
    %c0_68 = arith.constant 0 : index
    %c1_69 = arith.constant 1 : index
    %c0_70 = arith.constant 0 : index
    %93 = vector.load %arg2[%c0_68, %c1_69, %c0_70] : memref<2x17x28xbf16, #tpu.memory_space<vmem>>, vector<2x16x28xbf16>
    %94 = vector.shape_cast %93 : vector<2x16x28xbf16> to vector<32x28xbf16>
    %c4_71 = arith.constant 4 : index
    %c0_72 = arith.constant 0 : index
    %c0_73 = arith.constant 0 : index
    %95 = vector.load %arg5[%c4_71, %c0_72, %c0_73] : memref<5x28x384xbf16, #tpu.memory_space<vmem>>, vector<1x28x384xbf16>
    %96 = vector.shape_cast %95 : vector<1x28x384xbf16> to vector<28x384xbf16>
    %cst_74 = arith.constant dense<0.000000e+00> : vector<32x384xf32>
    %97 = tpu.matmul %94, %96, %cst_74 {dimension_numbers = #tpu.dot_dimension_numbers<[1], [0], [0], [1], [0, 0, 1, 1], [], []>} : vector<32x28xbf16>, vector<28x384xbf16>, vector<32x384xf32> -> vector<32x384xf32>
    %98 = arith.addf %92, %97 : vector<32x384xf32>
    %c0_75 = arith.constant 0 : index
    %c0_76 = arith.constant 0 : index
    %99 = vector.load %arg6[%c0_75, %c0_76] : memref<1x384xf32, #tpu.memory_space<vmem>>, vector<1x384xf32>
    %100 = vector.broadcast %99 : vector<1x384xf32> to vector<32x384xf32>
    %101 = arith.mulf %98, %100 : vector<32x384xf32>
    %c0_77 = arith.constant 0 : index
    %c0_78 = arith.constant 0 : index
    %102 = vector.load %arg7[%c0_77, %c0_78] : memref<1x384xf32, #tpu.memory_space<vmem>>, vector<1x384xf32>
    %103 = vector.broadcast %102 : vector<1x384xf32> to vector<32x384xf32>
    %104 = arith.addf %101, %103 : vector<32x384xf32>
    %cst_79 = arith.constant 0.000000e+00 : f32
    %105 = vector.broadcast %cst_79 : f32 to vector<32x384xf32>
    %106 = arith.maximumf %104, %105 : vector<32x384xf32>
    %107 = vector.extract_strided_slice %106 {offsets = [0, 0], sizes = [32, 192], strides = [1, 1]} : vector<32x384xf32> to vector<32x192xf32>
    %c96_i32_80 = arith.constant 96 : i32
    %108 = vector.broadcast %c96_i32_80 : i32 to vector<32x192xi32>
    %109 = arith.muli %108, %3 : vector<32x192xi32>
    %c0_i32_81 = arith.constant 0 : i32
    %110 = vector.broadcast %c0_i32_81 : i32 to vector<32x192xi32>
    %111 = arith.addi %109, %110 : vector<32x192xi32>
    %c24_i32 = arith.constant 24 : i32
    %112 = vector.broadcast %c24_i32 : i32 to vector<32x192xi32>
    %113 = arith.addi %111, %112 : vector<32x192xi32>
    %c2_i32_82 = arith.constant 2 : i32
    %114 = vector.broadcast %c2_i32_82 : i32 to vector<32x192xi32>
    %115 = arith.muli %114, %5 : vector<32x192xi32>
    %116 = arith.addi %113, %115 : vector<32x192xi32>
    %c0_i32_83 = arith.constant 0 : i32
    %117 = vector.broadcast %c0_i32_83 : i32 to vector<32x192xi32>
    %118 = arith.addi %116, %117 : vector<32x192xi32>
    %119 = arith.cmpf ogt, %107, %68 : vector<32x192xf32>
    %120 = arith.select %119, %107, %68 : vector<32x192xi1>, vector<32x192xf32>
    %121 = arith.select %119, %118, %69 : vector<32x192xi1>, vector<32x192xi32>
    %122 = vector.extract_strided_slice %106 {offsets = [0, 192], sizes = [32, 192], strides = [1, 1]} : vector<32x384xf32> to vector<32x192xf32>
    %c96_i32_84 = arith.constant 96 : i32
    %123 = vector.broadcast %c96_i32_84 : i32 to vector<32x192xi32>
    %124 = arith.muli %123, %3 : vector<32x192xi32>
    %c0_i32_85 = arith.constant 0 : i32
    %125 = vector.broadcast %c0_i32_85 : i32 to vector<32x192xi32>
    %126 = arith.addi %124, %125 : vector<32x192xi32>
    %c24_i32_86 = arith.constant 24 : i32
    %127 = vector.broadcast %c24_i32_86 : i32 to vector<32x192xi32>
    %128 = arith.addi %126, %127 : vector<32x192xi32>
    %c2_i32_87 = arith.constant 2 : i32
    %129 = vector.broadcast %c2_i32_87 : i32 to vector<32x192xi32>
    %130 = arith.muli %129, %5 : vector<32x192xi32>
    %131 = arith.addi %128, %130 : vector<32x192xi32>
    %c1_i32_88 = arith.constant 1 : i32
    %132 = vector.broadcast %c1_i32_88 : i32 to vector<32x192xi32>
    %133 = arith.addi %131, %132 : vector<32x192xi32>
    %134 = arith.cmpf ogt, %122, %120 : vector<32x192xf32>
    %135 = arith.select %134, %122, %120 : vector<32x192xi1>, vector<32x192xf32>
    %136 = arith.select %134, %133, %121 : vector<32x192xi1>, vector<32x192xi32>
    %137 = arith.truncf %135 : vector<32x192xf32> to vector<32x192xbf16>
    %138 = vector.shape_cast %137 : vector<32x192xbf16> to vector<2x16x192xbf16>
    %139 = vector.shape_cast %136 : vector<32x192xi32> to vector<2x16x192xi32>
    %c0_89 = arith.constant 0 : index
    %c0_90 = arith.constant 0 : index
    %c0_91 = arith.constant 0 : index
    %c0_92 = arith.constant 0 : index
    %140 = vector.load %arg18[%c0_89, %c0_90, %c0_91, %c0_92] : memref<2x2x16x192xi32, #tpu.memory_space<vmem>>, vector<2x1x16x192xi32>
    %141 = vector.shape_cast %140 : vector<2x1x16x192xi32> to vector<2x16x192xi32>
    %142 = vector.shape_cast %139 : vector<2x16x192xi32> to vector<2x1x16x192xi32>
    tpu.vector_store %arg18[%c0_89, %c0_90, %c0_91, %c0_92], %142 {strides = array<i32>} : memref<2x2x16x192xi32, #tpu.memory_space<vmem>>, vector<2x1x16x192xi32>,
    %c0_93 = arith.constant 0 : index
    %c0_94 = arith.constant 0 : index
    %c0_95 = arith.constant 0 : index
    %143 = vector.load %arg3[%c0_93, %c0_94, %c0_95] : memref<2x17x28xbf16, #tpu.memory_space<vmem>>, vector<2x16x28xbf16>
    %144 = vector.shape_cast %143 : vector<2x16x28xbf16> to vector<32x28xbf16>
    %c0_96 = arith.constant 0 : index
    %c0_97 = arith.constant 0 : index
    %c0_98 = arith.constant 0 : index
    %145 = vector.load %arg5[%c0_96, %c0_97, %c0_98] : memref<5x28x384xbf16, #tpu.memory_space<vmem>>, vector<1x28x384xbf16>
    %146 = vector.shape_cast %145 : vector<1x28x384xbf16> to vector<28x384xbf16>
    %cst_99 = arith.constant dense<0.000000e+00> : vector<32x384xf32>
    %147 = tpu.matmul %144, %146, %cst_99 {dimension_numbers = #tpu.dot_dimension_numbers<[1], [0], [0], [1], [0, 0, 1, 1], [], []>} : vector<32x28xbf16>, vector<28x384xbf16>, vector<32x384xf32> -> vector<32x384xf32>
    %c0_100 = arith.constant 0 : index
    %c0_101 = arith.constant 0 : index
    %c0_102 = arith.constant 0 : index
    %148 = vector.load %arg4[%c0_100, %c0_101, %c0_102] : memref<2x17x28xbf16, #tpu.memory_space<vmem>>, vector<2x16x28xbf16>
    %149 = vector.shape_cast %148 : vector<2x16x28xbf16> to vector<32x28xbf16>
    %c1_103 = arith.constant 1 : index
    %c0_104 = arith.constant 0 : index
    %c0_105 = arith.constant 0 : index
    %150 = vector.load %arg5[%c1_103, %c0_104, %c0_105] : memref<5x28x384xbf16, #tpu.memory_space<vmem>>, vector<1x28x384xbf16>
    %151 = vector.shape_cast %150 : vector<1x28x384xbf16> to vector<28x384xbf16>
    %cst_106 = arith.constant dense<0.000000e+00> : vector<32x384xf32>
    %152 = tpu.matmul %149, %151, %cst_106 {dimension_numbers = #tpu.dot_dimension_numbers<[1], [0], [0], [1], [0, 0, 1, 1], [], []>} : vector<32x28xbf16>, vector<28x384xbf16>, vector<32x384xf32> -> vector<32x384xf32>
    %153 = arith.addf %147, %152 : vector<32x384xf32>
    %c0_107 = arith.constant 0 : index
    %c1_108 = arith.constant 1 : index
    %c0_109 = arith.constant 0 : index
    %154 = vector.load %arg1[%c0_107, %c1_108, %c0_109] : memref<2x17x28xbf16, #tpu.memory_space<vmem>>, vector<2x16x28xbf16>
    %155 = vector.shape_cast %154 : vector<2x16x28xbf16> to vector<32x28xbf16>
    %c2_110 = arith.constant 2 : index
    %c0_111 = arith.constant 0 : index
    %c0_112 = arith.constant 0 : index
    %156 = vector.load %arg5[%c2_110, %c0_111, %c0_112] : memref<5x28x384xbf16, #tpu.memory_space<vmem>>, vector<1x28x384xbf16>
    %157 = vector.shape_cast %156 : vector<1x28x384xbf16> to vector<28x384xbf16>
    %cst_113 = arith.constant dense<0.000000e+00> : vector<32x384xf32>
    %158 = tpu.matmul %155, %157, %cst_113 {dimension_numbers = #tpu.dot_dimension_numbers<[1], [0], [0], [1], [0, 0, 1, 1], [], []>} : vector<32x28xbf16>, vector<28x384xbf16>, vector<32x384xf32> -> vector<32x384xf32>
    %159 = arith.addf %153, %158 : vector<32x384xf32>
    %c0_114 = arith.constant 0 : index
    %c1_115 = arith.constant 1 : index
    %c0_116 = arith.constant 0 : index
    %160 = vector.load %arg2[%c0_114, %c1_115, %c0_116] : memref<2x17x28xbf16, #tpu.memory_space<vmem>>, vector<2x16x28xbf16>
    %161 = vector.shape_cast %160 : vector<2x16x28xbf16> to vector<32x28xbf16>
    %c3_117 = arith.constant 3 : index
    %c0_118 = arith.constant 0 : index
    %c0_119 = arith.constant 0 : index
    %162 = vector.load %arg5[%c3_117, %c0_118, %c0_119] : memref<5x28x384xbf16, #tpu.memory_space<vmem>>, vector<1x28x384xbf16>
    %163 = vector.shape_cast %162 : vector<1x28x384xbf16> to vector<28x384xbf16>
    %cst_120 = arith.constant dense<0.000000e+00> : vector<32x384xf32>
    %164 = tpu.matmul %161, %163, %cst_120 {dimension_numbers = #tpu.dot_dimension_numbers<[1], [0], [0], [1], [0, 0, 1, 1], [], []>} : vector<32x28xbf16>, vector<28x384xbf16>, vector<32x384xf32> -> vector<32x384xf32>
    %165 = arith.addf %159, %164 : vector<32x384xf32>
    %c0_121 = arith.constant 0 : index
    %c1_122 = arith.constant 1 : index
    %c0_123 = arith.constant 0 : index
    %166 = vector.load %arg3[%c0_121, %c1_122, %c0_123] : memref<2x17x28xbf16, #tpu.memory_space<vmem>>, vector<2x16x28xbf16>
    %167 = vector.shape_cast %166 : vector<2x16x28xbf16> to vector<32x28xbf16>
    %c4_124 = arith.constant 4 : index
    %c0_125 = arith.constant 0 : index
    %c0_126 = arith.constant 0 : index
    %168 = vector.load %arg5[%c4_124, %c0_125, %c0_126] : memref<5x28x384xbf16, #tpu.memory_space<vmem>>, vector<1x28x384xbf16>
    %169 = vector.shape_cast %168 : vector<1x28x384xbf16> to vector<28x384xbf16>
    %cst_127 = arith.constant dense<0.000000e+00> : vector<32x384xf32>
    %170 = tpu.matmul %167, %169, %cst_127 {dimension_numbers = #tpu.dot_dimension_numbers<[1], [0], [0], [1], [0, 0, 1, 1], [], []>} : vector<32x28xbf16>, vector<28x384xbf16>, vector<32x384xf32> -> vector<32x384xf32>
    %171 = arith.addf %165, %170 : vector<32x384xf32>
    %c0_128 = arith.constant 0 : index
    %c0_129 = arith.constant 0 : index
    %172 = vector.load %arg6[%c0_128, %c0_129] : memref<1x384xf32, #tpu.memory_space<vmem>>, vector<1x384xf32>
    %173 = vector.broadcast %172 : vector<1x384xf32> to vector<32x384xf32>
    %174 = arith.mulf %171, %173 : vector<32x384xf32>
    %c0_130 = arith.constant 0 : index
    %c0_131 = arith.constant 0 : index
    %175 = vector.load %arg7[%c0_130, %c0_131] : memref<1x384xf32, #tpu.memory_space<vmem>>, vector<1x384xf32>
    %176 = vector.broadcast %175 : vector<1x384xf32> to vector<32x384xf32>
    %177 = arith.addf %174, %176 : vector<32x384xf32>
    %cst_132 = arith.constant 0.000000e+00 : f32
    %178 = vector.broadcast %cst_132 : f32 to vector<32x384xf32>
    %179 = arith.maximumf %177, %178 : vector<32x384xf32>
    %180 = vector.extract_strided_slice %179 {offsets = [0, 0], sizes = [32, 192], strides = [1, 1]} : vector<32x384xf32> to vector<32x192xf32>
    %c96_i32_133 = arith.constant 96 : i32
    %181 = vector.broadcast %c96_i32_133 : i32 to vector<32x192xi32>
    %182 = arith.muli %181, %3 : vector<32x192xi32>
    %c48_i32 = arith.constant 48 : i32
    %183 = vector.broadcast %c48_i32 : i32 to vector<32x192xi32>
    %184 = arith.addi %182, %183 : vector<32x192xi32>
    %c0_i32_134 = arith.constant 0 : i32
    %185 = vector.broadcast %c0_i32_134 : i32 to vector<32x192xi32>
    %186 = arith.addi %184, %185 : vector<32x192xi32>
    %c2_i32_135 = arith.constant 2 : i32
    %187 = vector.broadcast %c2_i32_135 : i32 to vector<32x192xi32>
    %188 = arith.muli %187, %5 : vector<32x192xi32>
    %189 = arith.addi %186, %188 : vector<32x192xi32>
    %c0_i32_136 = arith.constant 0 : i32
    %190 = vector.broadcast %c0_i32_136 : i32 to vector<32x192xi32>
    %191 = arith.addi %189, %190 : vector<32x192xi32>
    %192 = vector.extract_strided_slice %179 {offsets = [0, 192], sizes = [32, 192], strides = [1, 1]} : vector<32x384xf32> to vector<32x192xf32>
    %c96_i32_137 = arith.constant 96 : i32
    %193 = vector.broadcast %c96_i32_137 : i32 to vector<32x192xi32>
    %194 = arith.muli %193, %3 : vector<32x192xi32>
    %c48_i32_138 = arith.constant 48 : i32
    %195 = vector.broadcast %c48_i32_138 : i32 to vector<32x192xi32>
    %196 = arith.addi %194, %195 : vector<32x192xi32>
    %c0_i32_139 = arith.constant 0 : i32
    %197 = vector.broadcast %c0_i32_139 : i32 to vector<32x192xi32>
    %198 = arith.addi %196, %197 : vector<32x192xi32>
    %c2_i32_140 = arith.constant 2 : i32
    %199 = vector.broadcast %c2_i32_140 : i32 to vector<32x192xi32>
    %200 = arith.muli %199, %5 : vector<32x192xi32>
    %201 = arith.addi %198, %200 : vector<32x192xi32>
    %c1_i32_141 = arith.constant 1 : i32
    %202 = vector.broadcast %c1_i32_141 : i32 to vector<32x192xi32>
    %203 = arith.addi %201, %202 : vector<32x192xi32>
    %204 = arith.cmpf ogt, %192, %180 : vector<32x192xf32>
    %205 = arith.select %204, %192, %180 : vector<32x192xi1>, vector<32x192xf32>
    %206 = arith.select %204, %203, %191 : vector<32x192xi1>, vector<32x192xi32>
    %c0_142 = arith.constant 0 : index
    %c0_143 = arith.constant 0 : index
    %c0_144 = arith.constant 0 : index
    %207 = vector.load %arg4[%c0_142, %c0_143, %c0_144] : memref<2x17x28xbf16, #tpu.memory_space<vmem>>, vector<2x16x28xbf16>
    %208 = vector.shape_cast %207 : vector<2x16x28xbf16> to vector<32x28xbf16>
    %c0_145 = arith.constant 0 : index
    %c0_146 = arith.constant 0 : index
    %c0_147 = arith.constant 0 : index
    %209 = vector.load %arg5[%c0_145, %c0_146, %c0_147] : memref<5x28x384xbf16, #tpu.memory_space<vmem>>, vector<1x28x384xbf16>
    %210 = vector.shape_cast %209 : vector<1x28x384xbf16> to vector<28x384xbf16>
    %cst_148 = arith.constant dense<0.000000e+00> : vector<32x384xf32>
    %211 = tpu.matmul %208, %210, %cst_148 {dimension_numbers = #tpu.dot_dimension_numbers<[1], [0], [0], [1], [0, 0, 1, 1], [], []>} : vector<32x28xbf16>, vector<28x384xbf16>, vector<32x384xf32> -> vector<32x384xf32>
    %c0_149 = arith.constant 0 : index
    %c1_150 = arith.constant 1 : index
    %c0_151 = arith.constant 0 : index
    %212 = vector.load %arg1[%c0_149, %c1_150, %c0_151] : memref<2x17x28xbf16, #tpu.memory_space<vmem>>, vector<2x16x28xbf16>
    %213 = vector.shape_cast %212 : vector<2x16x28xbf16> to vector<32x28xbf16>
    %c1_152 = arith.constant 1 : index
    %c0_153 = arith.constant 0 : index
    %c0_154 = arith.constant 0 : index
    %214 = vector.load %arg5[%c1_152, %c0_153, %c0_154] : memref<5x28x384xbf16, #tpu.memory_space<vmem>>, vector<1x28x384xbf16>
    %215 = vector.shape_cast %214 : vector<1x28x384xbf16> to vector<28x384xbf16>
    %cst_155 = arith.constant dense<0.000000e+00> : vector<32x384xf32>
    %216 = tpu.matmul %213, %215, %cst_155 {dimension_numbers = #tpu.dot_dimension_numbers<[1], [0], [0], [1], [0, 0, 1, 1], [], []>} : vector<32x28xbf16>, vector<28x384xbf16>, vector<32x384xf32> -> vector<32x384xf32>
    %217 = arith.addf %211, %216 : vector<32x384xf32>
    %c0_156 = arith.constant 0 : index
    %c1_157 = arith.constant 1 : index
    %c0_158 = arith.constant 0 : index
    %218 = vector.load %arg2[%c0_156, %c1_157, %c0_158] : memref<2x17x28xbf16, #tpu.memory_space<vmem>>, vector<2x16x28xbf16>
    %219 = vector.shape_cast %218 : vector<2x16x28xbf16> to vector<32x28xbf16>
    %c2_159 = arith.constant 2 : index
    %c0_160 = arith.constant 0 : index
    %c0_161 = arith.constant 0 : index
    %220 = vector.load %arg5[%c2_159, %c0_160, %c0_161] : memref<5x28x384xbf16, #tpu.memory_space<vmem>>, vector<1x28x384xbf16>
    %221 = vector.shape_cast %220 : vector<1x28x384xbf16> to vector<28x384xbf16>
    %cst_162 = arith.constant dense<0.000000e+00> : vector<32x384xf32>
    %222 = tpu.matmul %219, %221, %cst_162 {dimension_numbers = #tpu.dot_dimension_numbers<[1], [0], [0], [1], [0, 0, 1, 1], [], []>} : vector<32x28xbf16>, vector<28x384xbf16>, vector<32x384xf32> -> vector<32x384xf32>
    %223 = arith.addf %217, %222 : vector<32x384xf32>
    %c0_163 = arith.constant 0 : index
    %c1_164 = arith.constant 1 : index
    %c0_165 = arith.constant 0 : index
    %224 = vector.load %arg3[%c0_163, %c1_164, %c0_165] : memref<2x17x28xbf16, #tpu.memory_space<vmem>>, vector<2x16x28xbf16>
    %225 = vector.shape_cast %224 : vector<2x16x28xbf16> to vector<32x28xbf16>
    %c3_166 = arith.constant 3 : index
    %c0_167 = arith.constant 0 : index
    %c0_168 = arith.constant 0 : index
    %226 = vector.load %arg5[%c3_166, %c0_167, %c0_168] : memref<5x28x384xbf16, #tpu.memory_space<vmem>>, vector<1x28x384xbf16>
    %227 = vector.shape_cast %226 : vector<1x28x384xbf16> to vector<28x384xbf16>
    %cst_169 = arith.constant dense<0.000000e+00> : vector<32x384xf32>
    %228 = tpu.matmul %225, %227, %cst_169 {dimension_numbers = #tpu.dot_dimension_numbers<[1], [0], [0], [1], [0, 0, 1, 1], [], []>} : vector<32x28xbf16>, vector<28x384xbf16>, vector<32x384xf32> -> vector<32x384xf32>
    %229 = arith.addf %223, %228 : vector<32x384xf32>
    %c0_170 = arith.constant 0 : index
    %c1_171 = arith.constant 1 : index
    %c0_172 = arith.constant 0 : index
    %230 = vector.load %arg4[%c0_170, %c1_171, %c0_172] : memref<2x17x28xbf16, #tpu.memory_space<vmem>>, vector<2x16x28xbf16>
    %231 = vector.shape_cast %230 : vector<2x16x28xbf16> to vector<32x28xbf16>
    %c4_173 = arith.constant 4 : index
    %c0_174 = arith.constant 0 : index
    %c0_175 = arith.constant 0 : index
    %232 = vector.load %arg5[%c4_173, %c0_174, %c0_175] : memref<5x28x384xbf16, #tpu.memory_space<vmem>>, vector<1x28x384xbf16>
    %233 = vector.shape_cast %232 : vector<1x28x384xbf16> to vector<28x384xbf16>
    %cst_176 = arith.constant dense<0.000000e+00> : vector<32x384xf32>
    %234 = tpu.matmul %231, %233, %cst_176 {dimension_numbers = #tpu.dot_dimension_numbers<[1], [0], [0], [1], [0, 0, 1, 1], [], []>} : vector<32x28xbf16>, vector<28x384xbf16>, vector<32x384xf32> -> vector<32x384xf32>
    %235 = arith.addf %229, %234 : vector<32x384xf32>
    %c0_177 = arith.constant 0 : index
    %c0_178 = arith.constant 0 : index
    %236 = vector.load %arg6[%c0_177, %c0_178] : memref<1x384xf32, #tpu.memory_space<vmem>>, vector<1x384xf32>
    %237 = vector.broadcast %236 : vector<1x384xf32> to vector<32x384xf32>
    %238 = arith.mulf %235, %237 : vector<32x384xf32>
    %c0_179 = arith.constant 0 : index
    %c0_180 = arith.constant 0 : index
    %239 = vector.load %arg7[%c0_179, %c0_180] : memref<1x384xf32, #tpu.memory_space<vmem>>, vector<1x384xf32>
    %240 = vector.broadcast %239 : vector<1x384xf32> to vector<32x384xf32>
    %241 = arith.addf %238, %240 : vector<32x384xf32>
    %cst_181 = arith.constant 0.000000e+00 : f32
    %242 = vector.broadcast %cst_181 : f32 to vector<32x384xf32>
    %243 = arith.maximumf %241, %242 : vector<32x384xf32>
    %244 = vector.extract_strided_slice %243 {offsets = [0, 0], sizes = [32, 192], strides = [1, 1]} : vector<32x384xf32> to vector<32x192xf32>
    %c96_i32_182 = arith.constant 96 : i32
    %245 = vector.broadcast %c96_i32_182 : i32 to vector<32x192xi32>
    %246 = arith.muli %245, %3 : vector<32x192xi32>
    %c48_i32_183 = arith.constant 48 : i32
    %247 = vector.broadcast %c48_i32_183 : i32 to vector<32x192xi32>
    %248 = arith.addi %246, %247 : vector<32x192xi32>
    %c24_i32_184 = arith.constant 24 : i32
    %249 = vector.broadcast %c24_i32_184 : i32 to vector<32x192xi32>
    %250 = arith.addi %248, %249 : vector<32x192xi32>
    %c2_i32_185 = arith.constant 2 : i32
    %251 = vector.broadcast %c2_i32_185 : i32 to vector<32x192xi32>
    %252 = arith.muli %251, %5 : vector<32x192xi32>
    %253 = arith.addi %250, %252 : vector<32x192xi32>
    %c0_i32_186 = arith.constant 0 : i32
    %254 = vector.broadcast %c0_i32_186 : i32 to vector<32x192xi32>
    %255 = arith.addi %253, %254 : vector<32x192xi32>
    %256 = arith.cmpf ogt, %244, %205 : vector<32x192xf32>
    %257 = arith.select %256, %244, %205 : vector<32x192xi1>, vector<32x192xf32>
    %258 = arith.select %256, %255, %206 : vector<32x192xi1>, vector<32x192xi32>
    %259 = vector.extract_strided_slice %243 {offsets = [0, 192], sizes = [32, 192], strides = [1, 1]} : vector<32x384xf32> to vector<32x192xf32>
    %c96_i32_187 = arith.constant 96 : i32
    %260 = vector.broadcast %c96_i32_187 : i32 to vector<32x192xi32>
    %261 = arith.muli %260, %3 : vector<32x192xi32>
    %c48_i32_188 = arith.constant 48 : i32
    %262 = vector.broadcast %c48_i32_188 : i32 to vector<32x192xi32>
    %263 = arith.addi %261, %262 : vector<32x192xi32>
    %c24_i32_189 = arith.constant 24 : i32
    %264 = vector.broadcast %c24_i32_189 : i32 to vector<32x192xi32>
    %265 = arith.addi %263, %264 : vector<32x192xi32>
    %c2_i32_190 = arith.constant 2 : i32
    %266 = vector.broadcast %c2_i32_190 : i32 to vector<32x192xi32>
    %267 = arith.muli %266, %5 : vector<32x192xi32>
    %268 = arith.addi %265, %267 : vector<32x192xi32>
    %c1_i32_191 = arith.constant 1 : i32
    %269 = vector.broadcast %c1_i32_191 : i32 to vector<32x192xi32>
    %270 = arith.addi %268, %269 : vector<32x192xi32>
    %271 = arith.cmpf ogt, %259, %257 : vector<32x192xf32>
    %272 = arith.select %271, %259, %257 : vector<32x192xi1>, vector<32x192xf32>
    %273 = arith.select %271, %270, %258 : vector<32x192xi1>, vector<32x192xi32>
    %274 = arith.truncf %272 : vector<32x192xf32> to vector<32x192xbf16>
    %275 = vector.shape_cast %274 : vector<32x192xbf16> to vector<2x16x192xbf16>
    %276 = vector.shape_cast %273 : vector<32x192xi32> to vector<2x16x192xi32>
    %c0_192 = arith.constant 0 : index
    %c1_193 = arith.constant 1 : index
    %c0_194 = arith.constant 0 : index
    %c0_195 = arith.constant 0 : index
    %277 = vector.load %arg18[%c0_192, %c1_193, %c0_194, %c0_195] : memref<2x2x16x192xi32, #tpu.memory_space<vmem>>, vector<2x1x16x192xi32>
    %278 = vector.shape_cast %277 : vector<2x1x16x192xi32> to vector<2x16x192xi32>
    %279 = vector.shape_cast %276 : vector<2x16x192xi32> to vector<2x1x16x192xi32>
    tpu.vector_store %arg18[%c0_192, %c1_193, %c0_194, %c0_195], %279 {strides = array<i32>} : memref<2x2x16x192xi32, #tpu.memory_space<vmem>>, vector<2x1x16x192xi32>,
    %280 = tpu.iota {dimensions = array<i32: 0>} : vector<16x128xi32>
    %281 = tpu.iota {dimensions = array<i32: 1>} : vector<16x128xi32>
    %c7_i32 = arith.constant 7 : i32
    %282 = vector.broadcast %c7_i32 : i32 to vector<16x128xi32>
    %283 = arith.andi %280, %282 : vector<16x128xi32>
    %c5_i32 = arith.constant 5 : i32
    %284 = vector.broadcast %c5_i32 : i32 to vector<16x128xi32>
    %285 = arith.shrsi %281, %284 : vector<16x128xi32>
    %286 = vector.extract_strided_slice %138 {offsets = [0, 0, 0], sizes = [2, 8, 192], strides = [1, 1, 1]} : vector<2x16x192xbf16> to vector<2x8x192xbf16>
    %287 = vector.shape_cast %286 : vector<2x8x192xbf16> to vector<16x192xbf16>
    %c0_196 = arith.constant 0 : index
    %c0_197 = arith.constant 0 : index
    %c0_198 = arith.constant 0 : index
    %288 = vector.load %arg8[%c0_196, %c0_197, %c0_198] : memref<5x192x256xbf16, #tpu.memory_space<vmem>>, vector<1x192x256xbf16>
    %289 = vector.shape_cast %288 : vector<1x192x256xbf16> to vector<192x256xbf16>
    %cst_199 = arith.constant dense<0.000000e+00> : vector<16x256xf32>
    %290 = tpu.matmul %287, %289, %cst_199 {dimension_numbers = #tpu.dot_dimension_numbers<[1], [0], [0], [1], [0, 0, 1, 1], [], []>} : vector<16x192xbf16>, vector<192x256xbf16>, vector<16x256xf32> -> vector<16x256xf32>
    %291 = vector.extract_strided_slice %275 {offsets = [0, 0, 0], sizes = [2, 8, 192], strides = [1, 1, 1]} : vector<2x16x192xbf16> to vector<2x8x192xbf16>
    %292 = vector.shape_cast %291 : vector<2x8x192xbf16> to vector<16x192xbf16>
    %c1_200 = arith.constant 1 : index
    %c0_201 = arith.constant 0 : index
    %c0_202 = arith.constant 0 : index
    %293 = vector.load %arg8[%c1_200, %c0_201, %c0_202] : memref<5x192x256xbf16, #tpu.memory_space<vmem>>, vector<1x192x256xbf16>
    %294 = vector.shape_cast %293 : vector<1x192x256xbf16> to vector<192x256xbf16>
    %cst_203 = arith.constant dense<0.000000e+00> : vector<16x256xf32>
    %295 = tpu.matmul %292, %294, %cst_203 {dimension_numbers = #tpu.dot_dimension_numbers<[1], [0], [0], [1], [0, 0, 1, 1], [], []>} : vector<16x192xbf16>, vector<192x256xbf16>, vector<16x256xf32> -> vector<16x256xf32>
    %296 = arith.addf %290, %295 : vector<16x256xf32>
    %297 = vector.extract_strided_slice %138 {offsets = [0, 1, 0], sizes = [2, 8, 192], strides = [1, 1, 1]} : vector<2x16x192xbf16> to vector<2x8x192xbf16>
    %298 = vector.shape_cast %297 : vector<2x8x192xbf16> to vector<16x192xbf16>
    %c2_204 = arith.constant 2 : index
    %c0_205 = arith.constant 0 : index
    %c0_206 = arith.constant 0 : index
    %299 = vector.load %arg8[%c2_204, %c0_205, %c0_206] : memref<5x192x256xbf16, #tpu.memory_space<vmem>>, vector<1x192x256xbf16>
    %300 = vector.shape_cast %299 : vector<1x192x256xbf16> to vector<192x256xbf16>
    %cst_207 = arith.constant dense<0.000000e+00> : vector<16x256xf32>
    %301 = tpu.matmul %298, %300, %cst_207 {dimension_numbers = #tpu.dot_dimension_numbers<[1], [0], [0], [1], [0, 0, 1, 1], [], []>} : vector<16x192xbf16>, vector<192x256xbf16>, vector<16x256xf32> -> vector<16x256xf32>
    %302 = arith.addf %296, %301 : vector<16x256xf32>
    %303 = vector.extract_strided_slice %275 {offsets = [0, 1, 0], sizes = [2, 8, 192], strides = [1, 1, 1]} : vector<2x16x192xbf16> to vector<2x8x192xbf16>
    %304 = vector.shape_cast %303 : vector<2x8x192xbf16> to vector<16x192xbf16>
    %c3_208 = arith.constant 3 : index
    %c0_209 = arith.constant 0 : index
    %c0_210 = arith.constant 0 : index
    %305 = vector.load %arg8[%c3_208, %c0_209, %c0_210] : memref<5x192x256xbf16, #tpu.memory_space<vmem>>, vector<1x192x256xbf16>
    %306 = vector.shape_cast %305 : vector<1x192x256xbf16> to vector<192x256xbf16>
    %cst_211 = arith.constant dense<0.000000e+00> : vector<16x256xf32>
    %307 = tpu.matmul %304, %306, %cst_211 {dimension_numbers = #tpu.dot_dimension_numbers<[1], [0], [0], [1], [0, 0, 1, 1], [], []>} : vector<16x192xbf16>, vector<192x256xbf16>, vector<16x256xf32> -> vector<16x256xf32>
    %308 = arith.addf %302, %307 : vector<16x256xf32>
    %309 = vector.extract_strided_slice %138 {offsets = [0, 2, 0], sizes = [2, 8, 192], strides = [1, 1, 1]} : vector<2x16x192xbf16> to vector<2x8x192xbf16>
    %310 = vector.shape_cast %309 : vector<2x8x192xbf16> to vector<16x192xbf16>
    %c4_212 = arith.constant 4 : index
    %c0_213 = arith.constant 0 : index
    %c0_214 = arith.constant 0 : index
    %311 = vector.load %arg8[%c4_212, %c0_213, %c0_214] : memref<5x192x256xbf16, #tpu.memory_space<vmem>>, vector<1x192x256xbf16>
    %312 = vector.shape_cast %311 : vector<1x192x256xbf16> to vector<192x256xbf16>
    %cst_215 = arith.constant dense<0.000000e+00> : vector<16x256xf32>
    %313 = tpu.matmul %310, %312, %cst_215 {dimension_numbers = #tpu.dot_dimension_numbers<[1], [0], [0], [1], [0, 0, 1, 1], [], []>} : vector<16x192xbf16>, vector<192x256xbf16>, vector<16x256xf32> -> vector<16x256xf32>
    %314 = arith.addf %308, %313 : vector<16x256xf32>
    %c0_216 = arith.constant 0 : index
    %c0_217 = arith.constant 0 : index
    %315 = vector.load %arg9[%c0_216, %c0_217] : memref<1x256xf32, #tpu.memory_space<vmem>>, vector<1x256xf32>
    %316 = vector.broadcast %315 : vector<1x256xf32> to vector<16x256xf32>
    %317 = arith.mulf %314, %316 : vector<16x256xf32>
    %c0_218 = arith.constant 0 : index
    %c0_219 = arith.constant 0 : index
    %318 = vector.load %arg10[%c0_218, %c0_219] : memref<1x256xf32, #tpu.memory_space<vmem>>, vector<1x256xf32>
    %319 = vector.broadcast %318 : vector<1x256xf32> to vector<16x256xf32>
    %320 = arith.addf %317, %319 : vector<16x256xf32>
    %cst_220 = arith.constant 0.000000e+00 : f32
    %321 = vector.broadcast %cst_220 : f32 to vector<16x256xf32>
    %322 = arith.maximumf %320, %321 : vector<16x256xf32>
    %323 = vector.extract_strided_slice %275 {offsets = [0, 0, 0], sizes = [2, 8, 192], strides = [1, 1, 1]} : vector<2x16x192xbf16> to vector<2x8x192xbf16>
    %324 = vector.shape_cast %323 : vector<2x8x192xbf16> to vector<16x192xbf16>
    %c0_221 = arith.constant 0 : index
    %c0_222 = arith.constant 0 : index
    %c0_223 = arith.constant 0 : index
    %325 = vector.load %arg8[%c0_221, %c0_222, %c0_223] : memref<5x192x256xbf16, #tpu.memory_space<vmem>>, vector<1x192x256xbf16>
    %326 = vector.shape_cast %325 : vector<1x192x256xbf16> to vector<192x256xbf16>
    %cst_224 = arith.constant dense<0.000000e+00> : vector<16x256xf32>
    %327 = tpu.matmul %324, %326, %cst_224 {dimension_numbers = #tpu.dot_dimension_numbers<[1], [0], [0], [1], [0, 0, 1, 1], [], []>} : vector<16x192xbf16>, vector<192x256xbf16>, vector<16x256xf32> -> vector<16x256xf32>
    %328 = vector.extract_strided_slice %138 {offsets = [0, 1, 0], sizes = [2, 8, 192], strides = [1, 1, 1]} : vector<2x16x192xbf16> to vector<2x8x192xbf16>
    %329 = vector.shape_cast %328 : vector<2x8x192xbf16> to vector<16x192xbf16>
    %c1_225 = arith.constant 1 : index
    %c0_226 = arith.constant 0 : index
    %c0_227 = arith.constant 0 : index
    %330 = vector.load %arg8[%c1_225, %c0_226, %c0_227] : memref<5x192x256xbf16, #tpu.memory_space<vmem>>, vector<1x192x256xbf16>
    %331 = vector.shape_cast %330 : vector<1x192x256xbf16> to vector<192x256xbf16>
    %cst_228 = arith.constant dense<0.000000e+00> : vector<16x256xf32>
    %332 = tpu.matmul %329, %331, %cst_228 {dimension_numbers = #tpu.dot_dimension_numbers<[1], [0], [0], [1], [0, 0, 1, 1], [], []>} : vector<16x192xbf16>, vector<192x256xbf16>, vector<16x256xf32> -> vector<16x256xf32>
    %333 = arith.addf %327, %332 : vector<16x256xf32>
    %334 = vector.extract_strided_slice %275 {offsets = [0, 1, 0], sizes = [2, 8, 192], strides = [1, 1, 1]} : vector<2x16x192xbf16> to vector<2x8x192xbf16>
    %335 = vector.shape_cast %334 : vector<2x8x192xbf16> to vector<16x192xbf16>
    %c2_229 = arith.constant 2 : index
    %c0_230 = arith.constant 0 : index
    %c0_231 = arith.constant 0 : index
    %336 = vector.load %arg8[%c2_229, %c0_230, %c0_231] : memref<5x192x256xbf16, #tpu.memory_space<vmem>>, vector<1x192x256xbf16>
    %337 = vector.shape_cast %336 : vector<1x192x256xbf16> to vector<192x256xbf16>
    %cst_232 = arith.constant dense<0.000000e+00> : vector<16x256xf32>
    %338 = tpu.matmul %335, %337, %cst_232 {dimension_numbers = #tpu.dot_dimension_numbers<[1], [0], [0], [1], [0, 0, 1, 1], [], []>} : vector<16x192xbf16>, vector<192x256xbf16>, vector<16x256xf32> -> vector<16x256xf32>
    %339 = arith.addf %333, %338 : vector<16x256xf32>
    %340 = vector.extract_strided_slice %138 {offsets = [0, 2, 0], sizes = [2, 8, 192], strides = [1, 1, 1]} : vector<2x16x192xbf16> to vector<2x8x192xbf16>
    %341 = vector.shape_cast %340 : vector<2x8x192xbf16> to vector<16x192xbf16>
    %c3_233 = arith.constant 3 : index
    %c0_234 = arith.constant 0 : index
    %c0_235 = arith.constant 0 : index
    %342 = vector.load %arg8[%c3_233, %c0_234, %c0_235] : memref<5x192x256xbf16, #tpu.memory_space<vmem>>, vector<1x192x256xbf16>
    %343 = vector.shape_cast %342 : vector<1x192x256xbf16> to vector<192x256xbf16>
    %cst_236 = arith.constant dense<0.000000e+00> : vector<16x256xf32>
    %344 = tpu.matmul %341, %343, %cst_236 {dimension_numbers = #tpu.dot_dimension_numbers<[1], [0], [0], [1], [0, 0, 1, 1], [], []>} : vector<16x192xbf16>, vector<192x256xbf16>, vector<16x256xf32> -> vector<16x256xf32>
    %345 = arith.addf %339, %344 : vector<16x256xf32>
    %346 = vector.extract_strided_slice %275 {offsets = [0, 2, 0], sizes = [2, 8, 192], strides = [1, 1, 1]} : vector<2x16x192xbf16> to vector<2x8x192xbf16>
    %347 = vector.shape_cast %346 : vector<2x8x192xbf16> to vector<16x192xbf16>
    %c4_237 = arith.constant 4 : index
    %c0_238 = arith.constant 0 : index
    %c0_239 = arith.constant 0 : index
    %348 = vector.load %arg8[%c4_237, %c0_238, %c0_239] : memref<5x192x256xbf16, #tpu.memory_space<vmem>>, vector<1x192x256xbf16>
    %349 = vector.shape_cast %348 : vector<1x192x256xbf16> to vector<192x256xbf16>
    %cst_240 = arith.constant dense<0.000000e+00> : vector<16x256xf32>
    %350 = tpu.matmul %347, %349, %cst_240 {dimension_numbers = #tpu.dot_dimension_numbers<[1], [0], [0], [1], [0, 0, 1, 1], [], []>} : vector<16x192xbf16>, vector<192x256xbf16>, vector<16x256xf32> -> vector<16x256xf32>
    %351 = arith.addf %345, %350 : vector<16x256xf32>
    %c0_241 = arith.constant 0 : index
    %c0_242 = arith.constant 0 : index
    %352 = vector.load %arg9[%c0_241, %c0_242] : memref<1x256xf32, #tpu.memory_space<vmem>>, vector<1x256xf32>
    %353 = vector.broadcast %352 : vector<1x256xf32> to vector<16x256xf32>
    %354 = arith.mulf %351, %353 : vector<16x256xf32>
    %c0_243 = arith.constant 0 : index
    %c0_244 = arith.constant 0 : index
    %355 = vector.load %arg10[%c0_243, %c0_244] : memref<1x256xf32, #tpu.memory_space<vmem>>, vector<1x256xf32>
    %356 = vector.broadcast %355 : vector<1x256xf32> to vector<16x256xf32>
    %357 = arith.addf %354, %356 : vector<16x256xf32>
    %cst_245 = arith.constant 0.000000e+00 : f32
    %358 = vector.broadcast %cst_245 : f32 to vector<16x256xf32>
    %359 = arith.maximumf %357, %358 : vector<16x256xf32>
    %360 = vector.extract_strided_slice %322 {offsets = [0, 0], sizes = [16, 128], strides = [1, 1]} : vector<16x256xf32> to vector<16x128xf32>
    %c16_i32 = arith.constant 16 : i32
    %361 = vector.broadcast %c16_i32 : i32 to vector<16x128xi32>
    %362 = arith.muli %361, %283 : vector<16x128xi32>
    %c0_i32_246 = arith.constant 0 : i32
    %363 = vector.broadcast %c0_i32_246 : i32 to vector<16x128xi32>
    %364 = arith.addi %362, %363 : vector<16x128xi32>
    %c2_i32_247 = arith.constant 2 : i32
    %365 = vector.broadcast %c2_i32_247 : i32 to vector<16x128xi32>
    %366 = arith.muli %365, %285 : vector<16x128xi32>
    %367 = arith.addi %364, %366 : vector<16x128xi32>
    %c0_i32_248 = arith.constant 0 : i32
    %368 = vector.broadcast %c0_i32_248 : i32 to vector<16x128xi32>
    %369 = arith.addi %367, %368 : vector<16x128xi32>
    %370 = vector.extract_strided_slice %322 {offsets = [0, 128], sizes = [16, 128], strides = [1, 1]} : vector<16x256xf32> to vector<16x128xf32>
    %c16_i32_249 = arith.constant 16 : i32
    %371 = vector.broadcast %c16_i32_249 : i32 to vector<16x128xi32>
    %372 = arith.muli %371, %283 : vector<16x128xi32>
    %c0_i32_250 = arith.constant 0 : i32
    %373 = vector.broadcast %c0_i32_250 : i32 to vector<16x128xi32>
    %374 = arith.addi %372, %373 : vector<16x128xi32>
    %c2_i32_251 = arith.constant 2 : i32
    %375 = vector.broadcast %c2_i32_251 : i32 to vector<16x128xi32>
    %376 = arith.muli %375, %285 : vector<16x128xi32>
    %377 = arith.addi %374, %376 : vector<16x128xi32>
    %c1_i32_252 = arith.constant 1 : i32
    %378 = vector.broadcast %c1_i32_252 : i32 to vector<16x128xi32>
    %379 = arith.addi %377, %378 : vector<16x128xi32>
    %380 = arith.cmpf ogt, %370, %360 : vector<16x128xf32>
    %381 = arith.select %380, %370, %360 : vector<16x128xi1>, vector<16x128xf32>
    %382 = arith.select %380, %379, %369 : vector<16x128xi1>, vector<16x128xi32>
    %383 = vector.extract_strided_slice %359 {offsets = [0, 0], sizes = [16, 128], strides = [1, 1]} : vector<16x256xf32> to vector<16x128xf32>
    %c16_i32_253 = arith.constant 16 : i32
    %384 = vector.broadcast %c16_i32_253 : i32 to vector<16x128xi32>
    %385 = arith.muli %384, %283 : vector<16x128xi32>
    %c8_i32 = arith.constant 8 : i32
    %386 = vector.broadcast %c8_i32 : i32 to vector<16x128xi32>
    %387 = arith.addi %385, %386 : vector<16x128xi32>
    %c2_i32_254 = arith.constant 2 : i32
    %388 = vector.broadcast %c2_i32_254 : i32 to vector<16x128xi32>
    %389 = arith.muli %388, %285 : vector<16x128xi32>
    %390 = arith.addi %387, %389 : vector<16x128xi32>
    %c0_i32_255 = arith.constant 0 : i32
    %391 = vector.broadcast %c0_i32_255 : i32 to vector<16x128xi32>
    %392 = arith.addi %390, %391 : vector<16x128xi32>
    %393 = arith.cmpf ogt, %383, %381 : vector<16x128xf32>
    %394 = arith.select %393, %383, %381 : vector<16x128xi1>, vector<16x128xf32>
    %395 = arith.select %393, %392, %382 : vector<16x128xi1>, vector<16x128xi32>
    %396 = vector.extract_strided_slice %359 {offsets = [0, 128], sizes = [16, 128], strides = [1, 1]} : vector<16x256xf32> to vector<16x128xf32>
    %c16_i32_256 = arith.constant 16 : i32
    %397 = vector.broadcast %c16_i32_256 : i32 to vector<16x128xi32>
    %398 = arith.muli %397, %283 : vector<16x128xi32>
    %c8_i32_257 = arith.constant 8 : i32
    %399 = vector.broadcast %c8_i32_257 : i32 to vector<16x128xi32>
    %400 = arith.addi %398, %399 : vector<16x128xi32>
    %c2_i32_258 = arith.constant 2 : i32
    %401 = vector.broadcast %c2_i32_258 : i32 to vector<16x128xi32>
    %402 = arith.muli %401, %285 : vector<16x128xi32>
    %403 = arith.addi %400, %402 : vector<16x128xi32>
    %c1_i32_259 = arith.constant 1 : i32
    %404 = vector.broadcast %c1_i32_259 : i32 to vector<16x128xi32>
    %405 = arith.addi %403, %404 : vector<16x128xi32>
    %406 = arith.cmpf ogt, %396, %394 : vector<16x128xf32>
    %407 = arith.select %406, %396, %394 : vector<16x128xi1>, vector<16x128xf32>
    %408 = arith.select %406, %405, %395 : vector<16x128xi1>, vector<16x128xi32>
    %409 = vector.shape_cast %408 : vector<16x128xi32> to vector<2x8x128xi32>
    %c0_260 = arith.constant 0 : index
    %c0_261 = arith.constant 0 : index
    %c0_262 = arith.constant 0 : index
    %410 = vector.load %arg19[%c0_260, %c0_261, %c0_262] : memref<2x8x128xi32, #tpu.memory_space<vmem>>, vector<2x8x128xi32>
    tpu.vector_store %arg19[%c0_260, %c0_261, %c0_262], %409 {strides = array<i32>} : memref<2x8x128xi32, #tpu.memory_space<vmem>>, vector<2x8x128xi32>,
    %411 = arith.truncf %407 : vector<16x128xf32> to vector<16x128xbf16>
    %cst_263 = arith.constant 0.000000e+00 : f32
    %412 = vector.broadcast %cst_263 : f32 to vector<2x128xf32>
    %c0_264 = arith.constant 0 : index
    %c0_265 = arith.constant 0 : index
    %c0_266 = arith.constant 0 : index
    %413 = vector.load %arg11[%c0_264, %c0_265, %c0_266] : memref<4x2x16xbf16, #tpu.memory_space<vmem>>, vector<1x2x16xbf16>
    %414 = vector.shape_cast %413 : vector<1x2x16xbf16> to vector<2x16xbf16>
    %cst_267 = arith.constant dense<0.000000e+00> : vector<2x128xf32>
    %415 = tpu.matmul %414, %411, %cst_267 {dimension_numbers = #tpu.dot_dimension_numbers<[1], [0], [0], [1], [0, 0, 1, 1], [], []>} : vector<2x16xbf16>, vector<16x128xbf16>, vector<2x128xf32> -> vector<2x128xf32>
    %416 = arith.truncf %415 : vector<2x128xf32> to vector<2x128xbf16>
    %c0_268 = arith.constant 0 : index
    %c0_269 = arith.constant 0 : index
    %c0_270 = arith.constant 0 : index
    %417 = vector.load %arg12[%c0_268, %c0_269, %c0_270] : memref<4x128x128xbf16, #tpu.memory_space<vmem>>, vector<1x128x128xbf16>
    %418 = vector.shape_cast %417 : vector<1x128x128xbf16> to vector<128x128xbf16>
    %cst_271 = arith.constant dense<0.000000e+00> : vector<2x128xf32>
    %419 = tpu.matmul %416, %418, %cst_271 {dimension_numbers = #tpu.dot_dimension_numbers<[1], [0], [0], [1], [0, 0, 1, 1], [], []>} : vector<2x128xbf16>, vector<128x128xbf16>, vector<2x128xf32> -> vector<2x128xf32>
    %420 = arith.addf %412, %419 : vector<2x128xf32>
    %c1_272 = arith.constant 1 : index
    %c0_273 = arith.constant 0 : index
    %c0_274 = arith.constant 0 : index
    %421 = vector.load %arg11[%c1_272, %c0_273, %c0_274] : memref<4x2x16xbf16, #tpu.memory_space<vmem>>, vector<1x2x16xbf16>
    %422 = vector.shape_cast %421 : vector<1x2x16xbf16> to vector<2x16xbf16>
    %cst_275 = arith.constant dense<0.000000e+00> : vector<2x128xf32>
    %423 = tpu.matmul %422, %411, %cst_275 {dimension_numbers = #tpu.dot_dimension_numbers<[1], [0], [0], [1], [0, 0, 1, 1], [], []>} : vector<2x16xbf16>, vector<16x128xbf16>, vector<2x128xf32> -> vector<2x128xf32>
    %424 = arith.truncf %423 : vector<2x128xf32> to vector<2x128xbf16>
    %c1_276 = arith.constant 1 : index
    %c0_277 = arith.constant 0 : index
    %c0_278 = arith.constant 0 : index
    %425 = vector.load %arg12[%c1_276, %c0_277, %c0_278] : memref<4x128x128xbf16, #tpu.memory_space<vmem>>, vector<1x128x128xbf16>
    %426 = vector.shape_cast %425 : vector<1x128x128xbf16> to vector<128x128xbf16>
    %cst_279 = arith.constant dense<0.000000e+00> : vector<2x128xf32>
    %427 = tpu.matmul %424, %426, %cst_279 {dimension_numbers = #tpu.dot_dimension_numbers<[1], [0], [0], [1], [0, 0, 1, 1], [], []>} : vector<2x128xbf16>, vector<128x128xbf16>, vector<2x128xf32> -> vector<2x128xf32>
    %428 = arith.addf %420, %427 : vector<2x128xf32>
    %c2_280 = arith.constant 2 : index
    %c0_281 = arith.constant 0 : index
    %c0_282 = arith.constant 0 : index
    %429 = vector.load %arg11[%c2_280, %c0_281, %c0_282] : memref<4x2x16xbf16, #tpu.memory_space<vmem>>, vector<1x2x16xbf16>
    %430 = vector.shape_cast %429 : vector<1x2x16xbf16> to vector<2x16xbf16>
    %cst_283 = arith.constant dense<0.000000e+00> : vector<2x128xf32>
    %431 = tpu.matmul %430, %411, %cst_283 {dimension_numbers = #tpu.dot_dimension_numbers<[1], [0], [0], [1], [0, 0, 1, 1], [], []>} : vector<2x16xbf16>, vector<16x128xbf16>, vector<2x128xf32> -> vector<2x128xf32>
    %432 = arith.truncf %431 : vector<2x128xf32> to vector<2x128xbf16>
    %c2_284 = arith.constant 2 : index
    %c0_285 = arith.constant 0 : index
    %c0_286 = arith.constant 0 : index
    %433 = vector.load %arg12[%c2_284, %c0_285, %c0_286] : memref<4x128x128xbf16, #tpu.memory_space<vmem>>, vector<1x128x128xbf16>
    %434 = vector.shape_cast %433 : vector<1x128x128xbf16> to vector<128x128xbf16>
    %cst_287 = arith.constant dense<0.000000e+00> : vector<2x128xf32>
    %435 = tpu.matmul %432, %434, %cst_287 {dimension_numbers = #tpu.dot_dimension_numbers<[1], [0], [0], [1], [0, 0, 1, 1], [], []>} : vector<2x128xbf16>, vector<128x128xbf16>, vector<2x128xf32> -> vector<2x128xf32>
    %436 = arith.addf %428, %435 : vector<2x128xf32>
    %c3_288 = arith.constant 3 : index
    %c0_289 = arith.constant 0 : index
    %c0_290 = arith.constant 0 : index
    %437 = vector.load %arg11[%c3_288, %c0_289, %c0_290] : memref<4x2x16xbf16, #tpu.memory_space<vmem>>, vector<1x2x16xbf16>
    %438 = vector.shape_cast %437 : vector<1x2x16xbf16> to vector<2x16xbf16>
    %cst_291 = arith.constant dense<0.000000e+00> : vector<2x128xf32>
    %439 = tpu.matmul %438, %411, %cst_291 {dimension_numbers = #tpu.dot_dimension_numbers<[1], [0], [0], [1], [0, 0, 1, 1], [], []>} : vector<2x16xbf16>, vector<16x128xbf16>, vector<2x128xf32> -> vector<2x128xf32>
    %440 = arith.truncf %439 : vector<2x128xf32> to vector<2x128xbf16>
    %c3_292 = arith.constant 3 : index
    %c0_293 = arith.constant 0 : index
    %c0_294 = arith.constant 0 : index
    %441 = vector.load %arg12[%c3_292, %c0_293, %c0_294] : memref<4x128x128xbf16, #tpu.memory_space<vmem>>, vector<1x128x128xbf16>
    %442 = vector.shape_cast %441 : vector<1x128x128xbf16> to vector<128x128xbf16>
    %cst_295 = arith.constant dense<0.000000e+00> : vector<2x128xf32>
    %443 = tpu.matmul %440, %442, %cst_295 {dimension_numbers = #tpu.dot_dimension_numbers<[1], [0], [0], [1], [0, 0, 1, 1], [], []>} : vector<2x128xbf16>, vector<128x128xbf16>, vector<2x128xf32> -> vector<2x128xf32>
    %444 = arith.addf %436, %443 : vector<2x128xf32>
    %c0_296 = arith.constant 0 : index
    %c0_297 = arith.constant 0 : index
    %445 = vector.load %arg13[%c0_296, %c0_297] : memref<1x128xf32, #tpu.memory_space<vmem>>, vector<1x128xf32>
    %446 = vector.broadcast %445 : vector<1x128xf32> to vector<2x128xf32>
    %447 = arith.mulf %444, %446 : vector<2x128xf32>
    %c0_298 = arith.constant 0 : index
    %c0_299 = arith.constant 0 : index
    %448 = vector.load %arg14[%c0_298, %c0_299] : memref<1x128xf32, #tpu.memory_space<vmem>>, vector<1x128xf32>
    %449 = vector.broadcast %448 : vector<1x128xf32> to vector<2x128xf32>
    %450 = arith.addf %447, %449 : vector<2x128xf32>
    %cst_300 = arith.constant 0.000000e+00 : f32
    %451 = vector.broadcast %cst_300 : f32 to vector<2x128xf32>
    %452 = arith.maximumf %450, %451 : vector<2x128xf32>
    %453 = arith.truncf %452 : vector<2x128xf32> to vector<2x128xbf16>
    %c0_301 = arith.constant 0 : index
    %c0_302 = arith.constant 0 : index
    %454 = vector.load %arg15[%c0_301, %c0_302] : memref<128x128xbf16, #tpu.memory_space<vmem>>, vector<128x128xbf16>
    %cst_303 = arith.constant dense<0.000000e+00> : vector<2x128xf32>
    %455 = tpu.matmul %453, %454, %cst_303 {dimension_numbers = #tpu.dot_dimension_numbers<[1], [0], [0], [1], [0, 0, 1, 1], [], []>} : vector<2x128xbf16>, vector<128x128xbf16>, vector<2x128xf32> -> vector<2x128xf32>
    %c0_304 = arith.constant 0 : index
    %c0_305 = arith.constant 0 : index
    %456 = vector.load %arg16[%c0_304, %c0_305] : memref<1x128xf32, #tpu.memory_space<vmem>>, vector<1x128xf32>
    %457 = vector.broadcast %456 : vector<1x128xf32> to vector<2x128xf32>
    %458 = arith.addf %455, %457 : vector<2x128xf32>
    %c0_306 = arith.constant 0 : index
    %c0_307 = arith.constant 0 : index
    %459 = vector.load %arg17[%c0_306, %c0_307] : memref<2x128xf32, #tpu.memory_space<vmem>>, vector<2x128xf32>
    tpu.vector_store %arg17[%c0_306, %c0_307], %458 {strides = array<i32>} : memref<2x128xf32, #tpu.memory_space<vmem>>, vector<2x128xf32>,
    return
  }
  func.func @transform_0(%arg0: i32) -> (i32, i32, i32) {
    %c0_i32 = arith.constant 0 : i32
    %c0_i32_0 = arith.constant 0 : i32
    %c0_i32_1 = arith.constant 0 : i32
    return %arg0, %c0_i32, %c0_i32_0 : i32, i32, i32
  }
  func.func @transform_1(%arg0: i32) -> (i32, i32, i32) {
    %c0_i32 = arith.constant 0 : i32
    %c0_i32_0 = arith.constant 0 : i32
    %c0_i32_1 = arith.constant 0 : i32
    return %arg0, %c0_i32, %c0_i32_0 : i32, i32, i32
  }
  func.func @transform_2(%arg0: i32) -> (i32, i32, i32) {
    %c0_i32 = arith.constant 0 : i32
    %c0_i32_0 = arith.constant 0 : i32
    %c0_i32_1 = arith.constant 0 : i32
    return %arg0, %c0_i32, %c0_i32_0 : i32, i32, i32
  }
  func.func @transform_3(%arg0: i32) -> (i32, i32, i32) {
    %c0_i32 = arith.constant 0 : i32
    %c0_i32_0 = arith.constant 0 : i32
    %c0_i32_1 = arith.constant 0 : i32
    return %arg0, %c0_i32, %c0_i32_0 : i32, i32, i32
  }
  func.func @transform_4(%arg0: i32) -> (i32, i32, i32) {
    %c0_i32 = arith.constant 0 : i32
    %c0_i32_0 = arith.constant 0 : i32
    %c0_i32_1 = arith.constant 0 : i32
    %c0_i32_2 = arith.constant 0 : i32
    return %c0_i32, %c0_i32_0, %c0_i32_1 : i32, i32, i32
  }
  func.func @transform_5(%arg0: i32) -> (i32, i32) {
    %c0_i32 = arith.constant 0 : i32
    %c0_i32_0 = arith.constant 0 : i32
    %c0_i32_1 = arith.constant 0 : i32
    return %c0_i32, %c0_i32_0 : i32, i32
  }
  func.func @transform_6(%arg0: i32) -> (i32, i32) {
    %c0_i32 = arith.constant 0 : i32
    %c0_i32_0 = arith.constant 0 : i32
    %c0_i32_1 = arith.constant 0 : i32
    return %c0_i32, %c0_i32_0 : i32, i32
  }
  func.func @transform_7(%arg0: i32) -> (i32, i32, i32) {
    %c0_i32 = arith.constant 0 : i32
    %c0_i32_0 = arith.constant 0 : i32
    %c0_i32_1 = arith.constant 0 : i32
    %c0_i32_2 = arith.constant 0 : i32
    return %c0_i32, %c0_i32_0, %c0_i32_1 : i32, i32, i32
  }
  func.func @transform_8(%arg0: i32) -> (i32, i32) {
    %c0_i32 = arith.constant 0 : i32
    %c0_i32_0 = arith.constant 0 : i32
    %c0_i32_1 = arith.constant 0 : i32
    return %c0_i32, %c0_i32_0 : i32, i32
  }
  func.func @transform_9(%arg0: i32) -> (i32, i32) {
    %c0_i32 = arith.constant 0 : i32
    %c0_i32_0 = arith.constant 0 : i32
    %c0_i32_1 = arith.constant 0 : i32
    return %c0_i32, %c0_i32_0 : i32, i32
  }
  func.func @transform_10(%arg0: i32) -> (i32, i32, i32) {
    %c0_i32 = arith.constant 0 : i32
    %c0_i32_0 = arith.constant 0 : i32
    %c0_i32_1 = arith.constant 0 : i32
    %c0_i32_2 = arith.constant 0 : i32
    return %c0_i32, %c0_i32_0, %c0_i32_1 : i32, i32, i32
  }
  func.func @transform_11(%arg0: i32) -> (i32, i32, i32) {
    %c0_i32 = arith.constant 0 : i32
    %c0_i32_0 = arith.constant 0 : i32
    %c0_i32_1 = arith.constant 0 : i32
    %c0_i32_2 = arith.constant 0 : i32
    return %c0_i32, %c0_i32_0, %c0_i32_1 : i32, i32, i32
  }
  func.func @transform_12(%arg0: i32) -> (i32, i32) {
    %c0_i32 = arith.constant 0 : i32
    %c0_i32_0 = arith.constant 0 : i32
    %c0_i32_1 = arith.constant 0 : i32
    return %c0_i32, %c0_i32_0 : i32, i32
  }
  func.func @transform_13(%arg0: i32) -> (i32, i32) {
    %c0_i32 = arith.constant 0 : i32
    %c0_i32_0 = arith.constant 0 : i32
    %c0_i32_1 = arith.constant 0 : i32
    return %c0_i32, %c0_i32_0 : i32, i32
  }
  func.func @transform_14(%arg0: i32) -> (i32, i32) {
    %c0_i32 = arith.constant 0 : i32
    %c0_i32_0 = arith.constant 0 : i32
    %c0_i32_1 = arith.constant 0 : i32
    return %c0_i32, %c0_i32_0 : i32, i32
  }
  func.func @transform_15(%arg0: i32) -> (i32, i32) {
    %c0_i32 = arith.constant 0 : i32
    %c0_i32_0 = arith.constant 0 : i32
    %c0_i32_1 = arith.constant 0 : i32
    return %c0_i32, %c0_i32_0 : i32, i32
  }
  func.func @transform_16(%arg0: i32) -> (i32, i32) {
    %c0_i32 = arith.constant 0 : i32
    %c0_i32_0 = arith.constant 0 : i32
    return %arg0, %c0_i32 : i32, i32
  }
  func.func @transform_17(%arg0: i32) -> (i32, i32, i32, i32) {
    %c0_i32 = arith.constant 0 : i32
    %c0_i32_0 = arith.constant 0 : i32
    %c0_i32_1 = arith.constant 0 : i32
    %c0_i32_2 = arith.constant 0 : i32
    return %arg0, %c0_i32, %c0_i32_0, %c0_i32_1 : i32, i32, i32, i32
  }
  func.func @transform_18(%arg0: i32) -> (i32, i32, i32) {
    %c0_i32 = arith.constant 0 : i32
    %c0_i32_0 = arith.constant 0 : i32
    %c0_i32_1 = arith.constant 0 : i32
    return %arg0, %c0_i32, %c0_i32_0 : i32, i32, i32
  }
}

</mosaic_0001>

<bundles_post_ra>
// kernel: tpu_custom_call.1
= control target key start
LH: loop header
LB: loop body
LE: loop exit
PB: predicated region body
PF: predicated region fallthrough
CT: control target
= control target key end

     0   :  { %s10629_s0 = inlined_call_operand.vmem [shape: bf16[2,17,28], index: 0, kind: input, shape index: {}]   ;;  %s10630_s1 = inlined_call_operand.vmem [shape: bf16[2,17,28], index: 1, kind: input, shape index: {}]   ;;  %s10631_s2 = inlined_call_operand.vmem [shape: bf16[2,17,28], index: 2, kind: input, shape index: {}]   ;;  %s10632_s3 = inlined_call_operand.vmem [shape: bf16[2,17,28], index: 3, kind: input, shape index: {}]   ;;  %s10633_s4 = inlined_call_operand.hbm [shape: bf16[5,28,384], index: 4, kind: input, shape index: {}]   ;;  %s10634_s5 = inlined_call_operand.vmem [shape: f32[1,384], index: 5, kind: input, shape index: {}]   ;;  %s10635_s6 = inlined_call_operand.vmem [shape: f32[1,384], index: 6, kind: input, shape index: {}]   ;;  %s10636_s7 = inlined_call_operand.hbm [shape: bf16[5,192,256], index: 7, kind: input, shape index: {}]   ;;  %s10637_s8 = inlined_call_operand.vmem [shape: f32[1,256], index: 8, kind: input, shape index: {}]   ;;  %s10638_s9 = inlined_call_operand.vmem [shape: f32[1,256], index: 9, kind: input, shape index: {}]   ;;  %s10639_s10 = inlined_call_operand.vmem [shape: bf16[4,2,16], index: 10, kind: input, shape index: {}]   ;;  %s10640_s11 = inlined_call_operand.hbm [shape: bf16[4,128,128], index: 11, kind: input, shape index: {}]   ;;  %s10641_s12 = inlined_call_operand.vmem [shape: f32[1,128], index: 12, kind: input, shape index: {}]   ;;  %s10642_s13 = inlined_call_operand.vmem [shape: f32[1,128], index: 13, kind: input, shape index: {}]   ;;  %s10643_s14 = inlined_call_operand.vmem [shape: bf16[128,128], index: 14, kind: input, shape index: {}]   ;;  %s10644_s15 = inlined_call_operand.vmem [shape: f32[1,128], index: 15, kind: input, shape index: {}]   ;;  %s10645_s16 = inlined_call_operand.hbm [shape: f32[2,128], index: 16, kind: output, shape index: {0}]   ;;  %s10646_s17 = inlined_call_operand.hbm [shape: s32[2,2,16,192], index: 17, kind: output, shape index: {1}]   ;;  %s10647_s18 = inlined_call_operand.hbm [shape: s32[2,8,128], index: 18, kind: output, shape index: {2}]  }
   0x1   :  { %10762 = sst [smem:[#allocation74_spill]] %s10629_s0 }
   0x2   :  { %10763 = sst [smem:[#allocation75_spill]] %s10630_s1 }
   0x3   :  { %10764 = sst [smem:[#allocation76_spill]] %s10631_s2 }
   0x4   :  { %24 = vsyncpa [#allocation3], 0 }
   0x5   :  { %25 = vsyncpa [#allocation6], 0 }
   0x6   :  { %26 = vsyncpa [#allocation4], 0 }
   0x7   :  { %27 = vsyncpa [#allocation10], 0  ;;  %s7974_s27 = smov [#allocation5]   ;;  %s7834_s0 = scalar_lea.hbm %s10636_s7, 15360 }
   0x8   :  { %s57_s28 = sshll.u32 %s7974_s27, 4  ;;  %p7835_p0 = scmp.ne.s32.totalorder %s10636_s7, %s7834_s0  ;;  %s58_s28 = int_to_ptr.vmem [resolvable:$true] %s57_s28 }
   0x9   :  { %p7838_p1 = scmp.lt.u32.totalorder %s7834_s0, %s10636_s7 }
   0xb   :  { %p7840_p2 = pnand %p7838_p1, %p7835_p0 }
   0xd   :  { %7843 = shalt.err (!%p7840_p2)
}
   0xe   :  { %s7844_s22 = scalar_lea.vmem %s58_s28, 15360  ;;  %p7849_p4 = scmp.lt.s32.totalorder %s58_s28, %s58_s28 }
   0xf   :  { %p7845_p3 = scmp.ne.s32.totalorder %s58_s28, %s7844_s22  ;;  %p7850_p5 = scmp.lt.s32.totalorder %s7844_s22, %s7844_s22 }
  0x11   :  { %p7851_p6 = por %p7850_p5, %p7849_p4 }
  0x13   :  { %p7852_p7 = pnand %p7851_p6, %p7845_p3 }
  0x15   :  { %7855 = shalt.err (!%p7852_p7)
}
  0x16   :  { %s10651_s2 = smov 128   ;;  %s7976_s23 = smov 8  }
  0x17   :  { %63 = dma.hbm_to_vmem [thread:$0]  %s10636_s7, 15360, %s58_s28, [#allocation6], %s10651_s2, %s10651_s2, %s7976_s23  }
  0x18   :  { %s7977_s26 = smov [#allocation2]   ;;  %s7856_s0 = scalar_lea.hbm %s10633_s4, 3840 }
  0x19   :  { %s41_s27 = sshll.u32 %s7977_s26, 4  ;;  %p7857_p8 = scmp.ne.s32.totalorder %s10633_s4, %s7856_s0  ;;  %s42_s27 = int_to_ptr.vmem [resolvable:$true] %s41_s27 }
  0x1a   :  { %p7860_p9 = scmp.lt.u32.totalorder %s7856_s0, %s10633_s4 }
  0x1c   :  { %p7862_p10 = pnand %p7860_p9, %p7857_p8 }
  0x1e   :  { %7865 = shalt.err (!%p7862_p10)
}
  0x1f   :  { %s7866_s22 = scalar_lea.vmem %s42_s27, 3840  ;;  %p7871_p12 = scmp.lt.s32.totalorder %s42_s27, %s42_s27 }
  0x20   :  { %p7867_p11 = scmp.ne.s32.totalorder %s42_s27, %s7866_s22  ;;  %p7872_p13 = scmp.lt.s32.totalorder %s7866_s22, %s7866_s22 }
  0x22   :  { %p7873_p0 = por %p7872_p13, %p7871_p12 }
  0x24   :  { %p7874_p1 = pnand %p7873_p0, %p7867_p11 }
  0x26   :  { %7877 = shalt.err (!%p7874_p1)
}
  0x27   :  { %s7978_s7 = smov 192   ;;  %s7979_s28 = smov 12  }
  0x28   :  { %47 = dma.hbm_to_vmem [thread:$0]  %s10633_s4, 3840, %s42_s27, [#allocation3], %s7978_s7, %s7978_s7, %s7979_s28  }
  0x29   :  { %s7980_s26 = smov [#allocation7]   ;;  %s7878_s19 = scalar_lea.hbm %s10640_s11, 4096 }
  0x2a   :  { %s75_s29 = sshll.u32 %s7980_s26, 4  ;;  %p7879_p2 = scmp.ne.s32.totalorder %s10640_s11, %s7878_s19  ;;  %s76_s29 = int_to_ptr.vmem [resolvable:$true] %s75_s29 }
  0x2b   :  { %p7882_p3 = scmp.lt.u32.totalorder %s7878_s19, %s10640_s11 }
  0x2d   :  { %p7884_p4 = pnand %p7882_p3, %p7879_p2 }
  0x2f   :  { %7887 = shalt.err (!%p7884_p4)
}
  0x30   :  { %s7888_s2 = scalar_lea.vmem %s76_s29, 4096  ;;  %p7893_p6 = scmp.lt.s32.totalorder %s76_s29, %s76_s29 }
  0x31   :  { %p7889_p5 = scmp.ne.s32.totalorder %s76_s29, %s7888_s2  ;;  %p7894_p7 = scmp.lt.s32.totalorder %s7888_s2, %s7888_s2 }
  0x33   :  { %p7895_p8 = por %p7894_p7, %p7893_p6 }
  0x35   :  { %p7896_p9 = pnand %p7895_p8, %p7889_p5 }
  0x37   :  { %7899 = shalt.err (!%p7896_p9)
}
  0x38   :  { %s7981_s4 = smov 64   ;;  %s7982_s27 = smov 4  }
  0x39   :  { %81 = dma.hbm_to_vmem [thread:$0]  %s10640_s11, 4096, %s76_s29, [#allocation6], %s7981_s4, %s7981_s4, %s7982_s27  }
  0x3a   :  { %7966 = dma.done.wait [#allocation3], 3840  }
  0x3b   :  { %7967 = vsyncadd [#allocation3], 4294963456 }
  0x3c   :  { %7968 = dma.done.wait [#allocation6], 19456  }
  0x3d   :  { %7969 = vsyncadd [#allocation6], 4294947840  ;;  %v10655_v0 = vmov 0   ;;  %v8129_v1 = vld [vmem:[#allocation2 + $0x4] ss:$12 sps:$4 sm:$0xff]   ;;  %v8133_v3 = vld [vmem:[#allocation2 + $0x18] sm:$0xff] }
  0x3e   :  { %383 = vmatprep.mubr.bf16.mxu0 %v10655_v0  ;;  %227 = vmatprep.mubr.bf16.mxu1 %v10655_v0  ;;  %v8131_v2 = vld [vmem:[#allocation2] ss:$12 sps:$4 sm:$0xff]   ;;  %v124_v4 = vld [vmem:[#allocation2 + $0x24] sm:$0x33]  ;;  %vm185_vm0 = vcmask 1045504   ;;  %s10765_s24 = sld [smem:[#allocation74_spill]] }
  0x3f   :  { %351 = vmatprep.subr.bf16.mxu0 %v8129_v1  ;;  %v8137_v5 = vcombine.high %v8133_v3, %v124_v4  ;;  %v6456_v6 = vcombine.low %v8133_v3, %v124_v4  ;;  %v8140_v7 = vld [vmem:[#allocation2 + $0x34] ss:$12 sps:$4 sm:$0xff]   ;;  %v8143_v8 = vld [vmem:[#allocation2 + $0x30] ss:$12 sps:$4 sm:$0xff]   ;;  %v8154_v11 = vld [vmem:[#allocation2 + $0x48] sm:$0xff]  ;;  %vm178_vm1 = vcmask 228352  }
  0x40   :  { %352 = vmatpush1.bf16.msra.mxu0 %v8131_v2  ;;  %195 = vmatprep.subr.bf16.mxu1 %v8140_v7  ;;  %v137_v12 = vld [vmem:[#allocation2 + $0x54] sm:$0x33]  ;;  %v8161_v15 = vld [vmem:[#allocation2 + $0x60] ss:$12 sps:$4 sm:$0xff]   ;;  %v8163_v16 = vld [vmem:[#allocation2 + $0x64] ss:$12 sps:$4 sm:$0xff]  }
  0x41   :  { %6459 = vmatprep.subr.msk.bf16.mxu0 %vm185_vm0, %v8137_v5  ;;  %v8148_v9 = vsel %vm185_vm0, %v6456_v6, 0  ;;  %196 = vmatpush1.bf16.msra.mxu1 %v8143_v8  ;;  %v8158_v13 = vcombine.high %v8154_v11, %v137_v12  ;;  %v6443_v14 = vcombine.low %v8154_v11, %v137_v12  ;;  %s10766_s29 = sld [smem:[#allocation75_spill]]  ;;  %v8177_v19 = vld [vmem:[#allocation2 + $0x78] sm:$0xff]  ;;  %v464_v20 = vld [vmem:[#allocation2 + $0x84] sm:$0x33]  ;;  %s10767_s22 = sld [smem:[#allocation76_spill]] }
  0x42   :  { %v8181_v21 = vcombine.high %v8177_v19, %v464_v20  ;;  %v6469_v22 = vcombine.low %v8177_v19, %v464_v20  ;;  %v8185_v23 = vld [vmem:[#allocation2 + $0x38] ss:$12 sps:$4 sm:$0xff]   ;;  %v8203_v26 = vld [vmem:[#allocation2 + $0x50] ss:$12 sps:$4 sm:$0x3f]   ;;  %v643_v31 = vld [vmem:[#allocation2 + $0xa8] sm:$0xff] }
  0x43   :  { %6446 = vmatprep.subr.msk.bf16.mxu1 %vm185_vm0, %v8158_v13  ;;  %v8169_v17 = vsel %vm185_vm0, %v6443_v14, 0  ;;  %v7552_v27 = vld [vmem:[#allocation2 + $0x94] ss:$12 sps:$4 sm:$0xff]   ;;  %v8211_v28 = vsel %vm185_vm0, %v8203_v26, 0  ;;  %v7550_v34 = vld [vmem:[#allocation2 + $0x90] ss:$12 sps:$4 sm:$0xff]  }
  0x44   :  { %v7536_v10 = vld [vmem:[%s10765_s24] sm:$0xff]   ;;  %354 = vmatpush1.bf16.msra.mxu0 %v8148_v9  ;;  %v8194_v24 = vsel %vm185_vm0, %v6469_v22, 0  ;;  %v8199_v25 = vld [vmem:[%s10765_s24 + $0xc] sm:$0xff]   ;;  %v8218_v30 = vld [vmem:[#allocation2 + $0x8] ss:$12 sps:$4 sm:$0xff]   ;;  %vm10684_vm5 = vcmask 523264  }
  0x45   :  { %520 = vmatprep.subr.bf16.mxu0 %v8163_v16  ;;  %198 = vmatpush1.bf16.msra.mxu1 %v8169_v17  ;;  %v645_v32 = vld [vmem:[#allocation2 + $0xb4] sm:$0x33]  ;;  %v8238_v37 = vld [vmem:[#allocation2 + $0x20] ss:$12 sps:$4 sm:$0x3f]   ;;  %s7986_s7 = smov [#allocation9]  }
  0x46   :  { %6971 = vmatprep.subr.bf16.mxu1 %v8185_v23  ;;  %v6482_v35 = vcombine.low %v643_v31, %v645_v32  ;;  %v8234_v36 = vcombine.high %v643_v31, %v645_v32  ;;  %v7561_v39 = vld [vmem:[#allocation2 + $0xc4] ss:$12 sps:$4 sm:$0xff]   ;;  %v815_v40 = vld [vmem:[%s10765_s24] sm:$0xf]  ;;  %v8265_v43 = vsel %vm185_vm0, %v8238_v37, 0  ;;  %v877_v50 = vld [vmem:[#allocation2 + $0xd8] sm:$0xff] }
  0x47   :  { %v8175_v18 = vld [vmem:[%s10766_s29] sm:$0xff]   ;;  %6460 = vmatmul.mubr.msk.bf16.vlgmr.msra.gmra.mrb[0].mxu0 %vm178_vm1, %v7536_v10  ;;  %v8216_v29 = vld [vmem:[%s10766_s29 + $0xc] sm:$0xff]   ;;  %v8267_v44 = vld [vmem:[#allocation2 + $0x68] ss:$12 sps:$4 sm:$0xff]   ;;  %v825_v45 = vshrl.u32 %v815_v40, 16  ;;  %v828_v46 = vshll.u32 %v815_v40, 16 }
  0x48   :  { %521 = vmatpush1.bf16.msra.mxu0 %v8161_v15  ;;  %393 = vmatprep.mubr.bf16.mxu0 %v10655_v0  ;;  %v8230_v33 = vld [vmem:[%s10767_s22] sm:$0xff]   ;;  %v8242_v38 = vsel %vm185_vm0, %v6482_v35, 0  ;;  %v8259_v42 = vld [vmem:[%s10767_s22 + $0xc] sm:$0xff]   ;;  %v817_v53 = vld [vmem:[%s10765_s24 + $0x8] sm:$0x1] }
  0x49   :  { %6447 = vmatmul.mubr.msk.bf16.vlgmr.msra.gmra.mrb[0].mxu1 %vm178_vm1, %v8175_v18  ;;  %6472 = vmatprep.subr.msk.bf16.mxu0 %vm185_vm0, %v8181_v21  ;;  %v816_v41 = vld [vmem:[%s10765_s24 + $0x4] sm:$0xf]  ;;  %v8271_v48 = vld [vmem:[#allocation2 + $0x80] ss:$12 sps:$4 sm:$0x3f]   ;;  %v827_v54 = vrot.slane %v825_v45, 4 }
  0x4a   :  { %237 = vmatprep.mubr.bf16.mxu1 %v10655_v0  ;;  %6972 = vmatpush3.bf16.msra.mxu1 %v8185_v23  ;;  %v834_v47 = vshll.u32 %v816_v41, 16  ;;  %v838_v49 = vshrl.u32 %v816_v41, 16  ;;  %v879_v51 = vld [vmem:[#allocation2 + $0xe4] sm:$0x33]  ;;  %v830_v55 = vrot.slane %v828_v46, 5  ;;  %v8290_v60 = vsel %vm185_vm0, %v8271_v48, 0 }
  0x4b   :  { %7491 = vmatprep.subr.msk.bf16.mxu1 %vm185_vm0, %v8203_v26  ;;  %v8280_v52 = vld [vmem:[%s10632_s3] sm:$0xff]   ;;  %v818_v59 = vld [vmem:[%s10765_s24 + $0xc] sm:$0xf]  ;;  %v819_v61 = vld [vmem:[%s10765_s24 + $0x10] sm:$0xf]  ;;  %v8297_v62 = vcombine.high %v877_v50, %v879_v51  ;;  %v6495_v63 = vcombine.low %v877_v50, %v879_v51  ;;  %v844_v4 = vshll.u32 %v817_v53, 16 }
  0x4c   :  { %523 = vmatpush1.bf16.msra.mxu0 %v8194_v24  ;;  %v836_v56 = vrot.slane %v834_v47, 5  ;;  %v7559_v57 = vld [vmem:[#allocation2 + $0xc0] ss:$12 sps:$4 sm:$0xff]   ;;  %v840_v58 = vrot.slane %v838_v49, 4  ;;  %v8299_v6 = vld [vmem:[#allocation2 + $0x98] ss:$12 sps:$4 sm:$0xff]  }
  0x4d   :  { %701 = vmatprep.subr.bf16.mxu0 %v7552_v27  ;;  %v849_v14 = vshrl.u32 %v818_v59, 16  ;;  %v852_v20 = vshll.u32 %v818_v59, 16  ;;  %v858_v22 = vshll.u32 %v819_v61, 16  ;;  %v8312_v27 = vsel %vm185_vm0, %v6495_v63, 0  ;;  %v8317_v31 = vld [vmem:[%s10632_s3 + $0xc] sm:$0xff]  }
  0x4e   :  { %6974 = vmatpush3.bf16.msra.mxu1 %v8211_v28  ;;  %v841_v12 = vor.u32 %v840_v58, %v836_v56  ;;  %vm821_vm2 = vsmask.f32 3328  ;;  %vm822_vm3 = vsmask.f32 7440  ;;  %v820_v32 = vld [vmem:[%s10765_s24 + $0x14] sm:$0x1] }
  0x4f   :  { %6461 = vmatmul.mubr.msk.bf16.gmra.mrb[4].mxu0 %vm178_vm1, %v8199_v25  ;;  %6979 = vmatprep.subr.bf16.mxu1 %v8218_v30  ;;  %v851_v40 = vrot.slane %v849_v14, 4  ;;  %v854_v41 = vrot.slane %v852_v20, 5  ;;  %v860_v45 = vrot.slane %v858_v22, 5  ;;  %vm8325_vm4 = vmor %vm821_vm2, %vm822_vm3  ;;  %v8332_v49 = vld [vmem:[#allocation2 + $0xb0] ss:$12 sps:$4 sm:$0x3f]  }
  0x50   :  { %552 = vmatprep.mubr.bf16.mxu0 %v10655_v0  ;;  %v842_v35 = vrot.slane %v841_v12, 4  ;;  %v868_v50 = vshll.u32 %v820_v32, 16  ;;  %v7574_v22 = vld [vmem:[#allocation2 + $0x38] ss:$12 sps:$4 sm:$0xff]  }
  0x51   :  { %6448 = vmatmul.mubr.msk.bf16.gmra.mrb[4].mxu1 %vm178_vm1, %v8216_v29  ;;  %v7573_v32 = vld [vmem:[#allocation2 + $0xe0] ss:$12 sps:$4 sm:$0x3f]  }
  0x52   :  { %6975 = vmatprep.mubr.msk.bf16.mxu1 %vm178_vm1, %v8175_v18  ;;  %v870_v59 = vrot.slane %v868_v50, 5 }
  0x57   :  { %6473 = vmatmul.mubr.msk.bf16.vlgmr.msra.gmra.mrb[0].mxu0 %vm178_vm1, %v8230_v33 }
  0x58   :  { %702 = vmatpush1.bf16.msra.mxu0 %v7550_v34  ;;  %562 = vmatprep.mubr.bf16.mxu0 %v10655_v0 }
  0x59   :  { %6976 = vmatmul.mubr.msk.bf16.vlgmr.msra.gmra.mrb[8].mxu1 %vm178_vm1, %v8216_v29  ;;  %6485 = vmatprep.subr.msk.bf16.mxu0 %vm185_vm0, %v8234_v36 }
  0x5a   :  { %6980 = vmatpush3.bf16.msra.mxu1 %v8218_v30  ;;  %6983 = vmatprep.mubr.msk.bf16.mxu1 %vm178_vm1, %v7536_v10  ;;  %v831_v10 = vor.u32 %v830_v55, %v827_v54  ;;  %v855_v54 = vor.u32 %v854_v41, %v851_v40  ;;  %v7575_v40 = vld [vmem:[%s10632_s3 + $0xc] sm:$0xff]  }
  0x5b   :  { %7492 = vmatprep.subr.msk.bf16.mxu1 %vm185_vm0, %v8238_v37 }
  0x5c   :  { %704 = vmatpush1.bf16.msra.mxu0 %v8242_v38  ;;  %v832_v34 = vrot.slane %v831_v10, 4  ;;  %v856_v63 = vrot.slane %v855_v54, 4 }
  0x5d   :  { %931 = vmatprep.subr.bf16.mxu0 %v7561_v39  ;;  %v846_v39 = vrot.slane %v844_v4, 5 }
  0x5e   :  { %6982 = vmatpush3.bf16.msra.mxu1 %v8265_v43  ;;  %v837_v51 = vsel %vm8325_vm4, %v832_v34, %v836_v56  ;;  %v8350_v56 = vsel %vm185_vm0, %v8332_v49, 0  ;;  %v861_v14 = vsel %vm8325_vm4, %v856_v63, %v860_v45  ;;  %v8381_v34 = vsel %vm185_vm0, %v7573_v32, 0 }
  0x5f   :  { %6474 = vmatmul.mubr.msk.bf16.gmra.mrb[4].mxu0 %vm178_vm1, %v8259_v42  ;;  %6987 = vmatprep.subr.bf16.mxu1 %v8267_v44  ;;  %v847_v53 = vsel %vm8325_vm4, %v842_v35, %v846_v39  ;;  %v7572_v35 = vld [vmem:[%s10632_s3] sm:$0xff]   ;;  %v7576_v39 = vld [vmem:[#allocation2 + $0x50] ss:$12 sps:$4 sm:$0x3f]  }
  0x60   :  { %733 = vmatprep.mubr.bf16.mxu0 %v10655_v0  ;;  %v8344_v58 = vcombine.low %v837_v51, %v847_v53  ;;  %v8398_v41 = vsel %vm185_vm0, %v7576_v39, 0  ;;  %v2681_v53 = vld [vmem:[%s10766_s29 + $0x4] sm:$0xf] }
  0x65   :  { %6984 = vmatmul.mubr.msk.bf16.vlgmr.msra.gmra.mrb[8].mxu1 %vm178_vm1, %v8199_v25  ;;  %v862_v25 = vshrl.u32 %v819_v61, 16  ;;  %v7571_v61 = vld [vmem:[#allocation2 + $0xc8] ss:$12 sps:$4 sm:$0xff]  }
  0x66   :  { %6988 = vmatpush3.bf16.msra.mxu1 %v8267_v44  ;;  %6991 = vmatprep.mubr.msk.bf16.mxu1 %vm178_vm1, %v8230_v33 }
  0x67   :  { %6486 = vmatmul.mubr.msk.bf16.vlgmr.msra.gmra.mrb[0].mxu0 %vm178_vm1, %v8280_v52  ;;  %7493 = vmatprep.subr.msk.bf16.mxu1 %vm185_vm0, %v8271_v48  ;;  %v864_v46 = vrot.slane %v862_v25, 4 }
  0x68   :  { %932 = vmatpush1.bf16.msra.mxu0 %v7559_v57  ;;  %743 = vmatprep.mubr.bf16.mxu0 %v10655_v0  ;;  %v2140_v57 = vld [vmem:[#allocation2 + $0x54] sm:$0x33] }
  0x69   :  { %6498 = vmatprep.subr.msk.bf16.mxu0 %vm185_vm0, %v8297_v62  ;;  %v865_v55 = vor.u32 %v864_v46, %v860_v45  ;;  %v8353_v10 = vcombine.high %v8154_v11, %v2140_v57  ;;  %v6535_v12 = vcombine.low %v8154_v11, %v2140_v57  ;;  %v8433_v46 = vld [vmem:[#allocation2 + $0x8] ss:$12 sps:$4 sm:$0xff]  }
  0x6a   :  { %6990 = vmatpush3.bf16.msra.mxu1 %v8290_v60  ;;  %10771 = vst [vmem:[#allocation17_spill] sm:$0xff] %v8433_v46  ;;  %v8465_v57 = vld [vmem:[#allocation2 + $0x84] sm:$0x33] }
  0x6b   :  { %6995 = vmatprep.subr.bf16.mxu1 %v8299_v6  ;;  %v866_v4 = vrot.slane %v865_v55, 4  ;;  %v8368_v11 = vsel %vm185_vm0, %v6535_v12, 0 }
  0x6c   :  { %934 = vmatpush1.bf16.msra.mxu0 %v8312_v27 }
  0x6d   :  { %2196 = vmatprep.subr.bf16.mxu0 %v8140_v7  ;;  %v871_v20 = vsel %vm8325_vm4, %v866_v4, %v870_v59  ;;  %v2456_v4 = vld [vmem:[%s10765_s24 + $0x8] sm:$0x1] }
  0x6e   :  { %v8370_v25 = vcombine.low %v861_v14, %v871_v20 }
  0x6f   :  { %6487 = vmatmul.mubr.msk.bf16.gmra.mrb[4].mxu0 %vm178_vm1, %v8317_v31 }
  0x70   :  { %963 = vmatprep.mubr.bf16.mxu0 %v10655_v0 }
  0x71   :  { %6992 = vmatmul.mubr.msk.bf16.vlgmr.msra.gmra.mrb[8].mxu1 %vm178_vm1, %v8259_v42 }
  0x72   :  { %6996 = vmatpush3.bf16.msra.mxu1 %v8299_v6  ;;  %6999 = vmatprep.mubr.msk.bf16.mxu1 %vm178_vm1, %v8280_v52 }
  0x73   :  { %7494 = vmatprep.subr.msk.bf16.mxu1 %vm185_vm0, %v8332_v49 }
  0x76   :  { %6998 = vmatpush3.bf16.msra.mxu1 %v8350_v56 }
  0x77   :  { %6499 = vmatmul.mubr.msk.bf16.vlgmr.msra.gmra.mrb[0].mxu0 %vm178_vm1, %v8344_v58  ;;  %7003 = vmatprep.subr.bf16.mxu1 %v7571_v61 }
  0x78   :  { %2197 = vmatpush1.bf16.msra.mxu0 %v8143_v8  ;;  %973 = vmatprep.mubr.bf16.mxu0 %v10655_v0 }
  0x79   :  { %6538 = vmatprep.subr.msk.bf16.mxu0 %vm185_vm0, %v8353_v10 }
  0x7c   :  { %2199 = vmatpush1.bf16.msra.mxu0 %v8368_v11 }
  0x7d   :  { %7000 = vmatmul.mubr.msk.bf16.vlgmr.msra.gmra.mrb[8].mxu1 %vm178_vm1, %v8317_v31  ;;  %7051 = vmatprep.subr.bf16.mxu0 %v7574_v22 }
  0x7e   :  { %7004 = vmatpush3.bf16.msra.mxu1 %v7571_v61  ;;  %7007 = vmatprep.mubr.msk.bf16.mxu1 %vm178_vm1, %v8344_v58 }
  0x7f   :  { %6500 = vmatmul.mubr.msk.bf16.gmra.mrb[4].mxu0 %vm178_vm1, %v8370_v25  ;;  %7495 = vmatprep.subr.msk.bf16.mxu1 %vm185_vm0, %v7573_v32 }
  0x80   :  { %2228 = vmatprep.mubr.bf16.mxu0 %v10655_v0 }
  0x82   :  { %7006 = vmatpush3.bf16.msra.mxu1 %v8381_v34 }
  0x83   :  { %1238 = vmatprep.subr.bf16.mxu1 %v8140_v7  ;;  %v2128_v7 = vld [vmem:[#allocation2 + $0x24] sm:$0x33] }
  0x84   :  { %v6548_v45 = vcombine.low %v8133_v3, %v2128_v7 }
  0x86   :  { %v8447_v50 = vsel %vm185_vm0, %v6548_v45, 0 }
  0x87   :  { %6539 = vmatmul.mubr.msk.bf16.vlgmr.msra.gmra.mrb[8].mxu0 %vm178_vm1, %v7572_v35  ;;  %10772 = vst [vmem:[#allocation18_spill] sm:$0xff] %v8447_v50 }
  0x88   :  { %7052 = vmatpush3.bf16.msra.mxu0 %v7574_v22  ;;  %2238 = vmatprep.mubr.bf16.mxu0 %v10655_v0 }
  0x89   :  { %7008 = vmatmul.mubr.msk.bf16.vlgmr.msra.gmra.mrb[8].mxu1 %vm178_vm1, %v8370_v25  ;;  %7501 = vmatprep.subr.msk.bf16.mxu0 %vm185_vm0, %v7576_v39  ;;  %v2459_v39 = vld [vmem:[%s10765_s24 + $0x14] sm:$0x1] }
  0x8a   :  { %1239 = vmatpush1.bf16.msra.mxu1 %v8143_v8  ;;  %1270 = vmatprep.mubr.bf16.mxu1 %v10655_v0  ;;  %v8416_v8 = vld [vmem:[#allocation2 + $0x20] ss:$12 sps:$4 sm:$0x3f]  }
  0x8b   :  { %6503 = vmatprep.subr.msk.bf16.mxu1 %vm185_vm0, %v8158_v13  ;;  %10770 = vst [vmem:[#allocation16_spill] sm:$0xff] %v8416_v8  ;;  %v2454_v13 = vld [vmem:[%s10765_s24] sm:$0xf]  ;;  %v8463_v54 = vsel %vm185_vm0, %v8416_v8, 0 }
  0x8c   :  { %7054 = vmatpush3.bf16.msra.mxu0 %v8398_v41  ;;  %v2461_v51 = vshrl.u32 %v2454_v13, 16  ;;  %v2464_v55 = vshll.u32 %v2454_v13, 16 }
  0x8d   :  { %2352 = vmatprep.subr.bf16.mxu0 %v8129_v1 }
  0x8e   :  { %1241 = vmatpush1.bf16.msra.mxu1 %v8169_v17  ;;  %v8422_v17 = vcombine.high %v8133_v3, %v2128_v7  ;;  %v2458_v3 = vld [vmem:[%s10765_s24 + $0x10] sm:$0xf]  ;;  %v2700_v7 = vshrl.u32 %v2681_v53, 16 }
  0x8f   :  { %6540 = vmatmul.mubr.msk.bf16.gmra.mrb[12].mxu0 %vm178_vm1, %v7575_v40  ;;  %7011 = vmatprep.subr.bf16.mxu1 %v8185_v23  ;;  %v2494_v14 = vshll.u32 %v2458_v3, 16  ;;  %v2498_v20 = vshrl.u32 %v2458_v3, 16 }
  0x90   :  { %7055 = vmatprep.mubr.msk.bf16.mxu0 %vm178_vm1, %v7572_v35  ;;  %v2466_v35 = vrot.slane %v2464_v55, 5  ;;  %v2683_v55 = vld [vmem:[%s10766_s29 + $0xc] sm:$0xf] }
  0x91   :  { %6504 = vmatmul.mubr.msk.bf16.vlgmr.msra.gmra.mrb[12].mxu1 %vm178_vm1, %v8230_v33 }
  0x92   :  { %1280 = vmatprep.mubr.bf16.mxu1 %v10655_v0  ;;  %7012 = vmatpush3.bf16.msra.mxu1 %v8185_v23  ;;  %v2455_v23 = vld [vmem:[%s10765_s24 + $0x4] sm:$0xf] }
  0x93   :  { %7496 = vmatprep.subr.msk.bf16.mxu1 %vm185_vm0, %v8203_v26  ;;  %v2457_v26 = vld [vmem:[%s10765_s24 + $0xc] sm:$0xf]  ;;  %v2470_v59 = vshll.u32 %v2455_v23, 16  ;;  %v2474_v61 = vshrl.u32 %v2455_v23, 16 }
  0x94   :  { %v2485_v63 = vshrl.u32 %v2457_v26, 16  ;;  %v2488_v12 = vshll.u32 %v2457_v26, 16  ;;  %v6561_v26 = vcombine.low %v8177_v19, %v8465_v57 }
  0x95   :  { %v8477_v13 = vrot.slane %v2470_v59, 5  ;;  %v2476_v45 = vrot.slane %v2474_v61, 4  ;;  %v7581_v59 = vld [vmem:[%s10767_s22 + $0xc] sm:$0xff]   ;;  %v2480_v61 = vshll.u32 %v2456_v4, 16 }
  0x96   :  { %7014 = vmatpush3.bf16.msra.mxu1 %v8211_v28  ;;  %v2680_v28 = vld [vmem:[%s10766_s29] sm:$0xf]  ;;  %v2487_v23 = vrot.slane %v2485_v63, 4  ;;  %v2490_v3 = vrot.slane %v2488_v12, 5 }
  0x97   :  { %7056 = vmatmul.mubr.msk.bf16.vlgmr.msra.gmra.mrb[16].mxu0 %vm178_vm1, %v7575_v40  ;;  %1340 = vmatprep.subr.bf16.mxu1 %v8129_v1  ;;  %v8454_v1 = vld [vmem:[%s10767_s22] sm:$0xff]   ;;  %v2687_v22 = vshrl.u32 %v2680_v28, 16  ;;  %v2690_v32 = vshll.u32 %v2680_v28, 16  ;;  %v2696_v40 = vshll.u32 %v2681_v53, 16  ;;  %v8483_v28 = vrot.slane %v2494_v14, 5 }
  0x98   :  { %2353 = vmatpush1.bf16.msra.mxu0 %v8131_v2  ;;  %2384 = vmatprep.mubr.bf16.mxu0 %v10655_v0  ;;  %v2682_v53 = vld [vmem:[%s10766_s29 + $0x8] sm:$0x1]  ;;  %v2684_v14 = vld [vmem:[%s10766_s29 + $0x10] sm:$0xf]  ;;  %v2477_v4 = vor.u32 %v2476_v45, %v8477_v13 }
  0x99   :  { %6551 = vmatprep.subr.msk.bf16.mxu0 %vm185_vm0, %v8422_v17  ;;  %6505 = vmatmul.mubr.msk.bf16.gmra.mrb[16].mxu1 %vm178_vm1, %v8259_v42  ;;  %v2689_v63 = vrot.slane %v2687_v22, 4  ;;  %v2692_v12 = vrot.slane %v2690_v32, 5  ;;  %v2504_v22 = vshll.u32 %v2459_v39, 16  ;;  %v8512_v32 = vsel %vm185_vm0, %v6561_v26, 0 }
  0x9a   :  { %7015 = vmatprep.mubr.msk.bf16.mxu1 %vm178_vm1, %v8230_v33  ;;  %v2463_v33 = vrot.slane %v2461_v51, 4  ;;  %v2500_v51 = vrot.slane %v2498_v20, 4  ;;  %v2714_v39 = vshll.u32 %v2683_v55, 16 }
  0x9b   :  { %v2506_v26 = vrot.slane %v2504_v22, 5 }
  0x9c   :  { %2355 = vmatpush1.bf16.msra.mxu0 %v8447_v50  ;;  %v2467_v20 = vor.u32 %v2466_v35, %v2463_v33  ;;  %v2702_v50 = vrot.slane %v2700_v7, 4  ;;  %v2482_v33 = vrot.slane %v2480_v61, 5  ;;  %v2693_v35 = vor.u32 %v2692_v12, %v2689_v63 }
  0x9d   :  { %7059 = vmatprep.subr.bf16.mxu0 %v8433_v46  ;;  %v2711_v7 = vshrl.u32 %v2683_v55, 16  ;;  %v10773_v63 = vmov 0  }
  0x9f   :  { %6552 = vmatmul.mubr.msk.bf16.vlgmr.msra.gmra.mrb[8].mxu0 %vm178_vm1, %v8454_v1  ;;  %v8532_v61 = vrot.slane %v2711_v7, 4 }
  0xa0   :  { %7060 = vmatpush3.bf16.msra.mxu0 %v8433_v46  ;;  %2394 = vmatprep.mubr.bf16.mxu0 %v10655_v0  ;;  %v8505_v46 = vrot.slane %v2696_v40, 5  ;;  %v2706_v40 = vshll.u32 %v2682_v53, 16 }
  0xa1   :  { %7016 = vmatmul.mubr.msk.bf16.vlgmr.msra.gmra.mrb[20].mxu1 %vm178_vm1, %v8259_v42  ;;  %7502 = vmatprep.subr.msk.bf16.mxu0 %vm185_vm0, %v8416_v8  ;;  %v8503_v42 = vld [vmem:[#allocation2 + $0x80] ss:$12 sps:$4 sm:$0x3f]   ;;  %v2720_v8 = vshll.u32 %v2684_v14, 16 }
  0xa2   :  { %1341 = vmatpush1.bf16.msra.mxu1 %v8131_v2  ;;  %1372 = vmatprep.mubr.bf16.mxu1 %v10655_v0  ;;  %v2491_v2 = vor.u32 %v2490_v3, %v2487_v23  ;;  %v2501_v0 = vor.u32 %v2500_v51, %v8483_v28  ;;  %v2703_v45 = vor.u32 %v2702_v50, %v8505_v46  ;;  %v2478_v23 = vrot.slane %v2477_v4, 4 }
  0xa3   :  { %6508 = vmatprep.subr.msk.bf16.mxu1 %vm185_vm0, %v8137_v5  ;;  %v2468_v5 = vrot.slane %v2467_v20, 4  ;;  %v2724_v3 = vshrl.u32 %v2684_v14, 16  ;;  %v8528_v50 = vrot.slane %v2693_v35, 4  ;;  %v8530_v55 = vrot.slane %v2706_v40, 5 }
  0xa4   :  { %7062 = vmatpush3.bf16.msra.mxu0 %v8463_v54  ;;  %v2492_v51 = vrot.slane %v2491_v2, 4  ;;  %v2502_v53 = vrot.slane %v2501_v0, 4  ;;  %v8538_v0 = vrot.slane %v2714_v39, 5  ;;  %v8540_v12 = vrot.slane %v2720_v8, 5  ;;  %v8641_v2 = vld [vmem:[#allocation2 + $0x98] ss:$12 sps:$4 sm:$0xff]  }
  0xa5   :  { %2566 = vmatprep.subr.bf16.mxu0 %v8163_v16  ;;  %v8544_v14 = vrot.slane %v2724_v3, 4  ;;  %v8548_v20 = vcombine.high %v8177_v19, %v8465_v57  ;;  %v2483_v19 = vsel %vm8325_vm4, %v2478_v23, %v2482_v33  ;;  %v8594_v57 = vld [vmem:[#allocation2 + $0x94] ss:$12 sps:$4 sm:$0xff]   ;;  %v2907_v39 = vld [vmem:[%s10767_s22 + $0x4] sm:$0xf] }
  0xa6   :  { %1343 = vmatpush1.bf16.msra.mxu1 %v8148_v9  ;;  %v8524_v9 = vsel %vm185_vm0, %v8503_v42, 0 }
  0xa7   :  { %6553 = vmatmul.mubr.msk.bf16.gmra.mrb[12].mxu0 %vm178_vm1, %v7581_v59  ;;  %7019 = vmatprep.subr.bf16.mxu1 %v8218_v30  ;;  %v2727_v4 = vor.u32 %v8544_v14, %v8540_v12  ;;  %v2909_v14 = vld [vmem:[%s10767_s22 + $0xc] sm:$0xf] }
  0xa8   :  { %7063 = vmatprep.mubr.msk.bf16.mxu0 %vm178_vm1, %v8454_v1  ;;  %v8536_v1 = vrot.slane %v2703_v45, 4  ;;  %v8652_v45 = vld [vmem:[#allocation2 + $0xb0] ss:$12 sps:$4 sm:$0x3f]  }
  0xa9   :  { %6509 = vmatmul.mubr.msk.bf16.vlgmr.msra.gmra.mrb[12].mxu1 %vm178_vm1, %v8175_v18  ;;  %v2728_v40 = vrot.slane %v2727_v4, 4  ;;  %v7820_v4 = vld [vmem:[#allocation2 + $0x98] ss:$12 sps:$4 sm:$0xff]  }
  0xaa   :  { %1382 = vmatprep.mubr.bf16.mxu1 %v10773_v63  ;;  %7020 = vmatpush3.bf16.msra.mxu1 %v8218_v30  ;;  %v8552_v30 = vld [vmem:[#allocation2 + $0x68] ss:$12 sps:$4 sm:$0xff]  }
  0xab   :  { %7497 = vmatprep.subr.msk.bf16.mxu1 %vm185_vm0, %v8238_v37  ;;  %v2473_v37 = vsel %vm8325_vm4, %v2468_v5, %v8477_v13  ;;  %v2906_v5 = vld [vmem:[%s10767_s22] sm:$0xf] }
  0xac   :  { %v2916_v23 = vshll.u32 %v2906_v5, 16 }
  0xae   :  { %7022 = vmatpush3.bf16.msra.mxu1 %v8265_v43  ;;  %v8585_v43 = vld [vmem:[#allocation2 + $0x60] ss:$12 sps:$4 sm:$0xff]  }
  0xaf   :  { %7064 = vmatmul.mubr.msk.bf16.vlgmr.msra.gmra.mrb[16].mxu0 %vm178_vm1, %v7581_v59  ;;  %1442 = vmatprep.subr.bf16.mxu1 %v8163_v16  ;;  %v8568_v16 = vcombine.low %v2473_v37, %v2483_v19  ;;  %v2717_v59 = vor.u32 %v8538_v0, %v8532_v61  ;;  %v8689_v37 = vld [vmem:[#allocation2 + $0xc4] ss:$12 sps:$4 sm:$0xff]   ;;  %v1670_v19 = vld [vmem:[%s10766_s29] sm:$0xf] }
  0xb0   :  { %2567 = vmatpush1.bf16.msra.mxu0 %v8161_v15  ;;  %2598 = vmatprep.mubr.bf16.mxu0 %v10773_v63  ;;  %v2497_v15 = vsel %vm8325_vm4, %v2492_v51, %v8483_v28  ;;  %v2922_v51 = vshll.u32 %v2907_v39, 16 }
  0xb1   :  { %6564 = vmatprep.subr.msk.bf16.mxu0 %vm185_vm0, %v8548_v20  ;;  %6510 = vmatmul.mubr.msk.bf16.gmra.mrb[16].mxu1 %vm178_vm1, %v8216_v29  ;;  %v2718_v35 = vrot.slane %v2717_v59, 4  ;;  %v2966_v59 = vld [vmem:[#allocation2 + $0xe4] sm:$0x33] }
  0xb2   :  { %7023 = vmatprep.mubr.msk.bf16.mxu1 %vm178_vm1, %v8175_v18  ;;  %v2507_v18 = vsel %vm8325_vm4, %v2502_v53, %v2506_v26  ;;  %v2926_v53 = vshrl.u32 %v2907_v39, 16  ;;  %v8684_v0 = vrot.slane %v2922_v51, 5 }
  0xb3   :  { %v8589_v8 = vcombine.low %v2497_v15, %v2507_v18  ;;  %v2723_v26 = vsel %vm8325_vm4, %v2718_v35, %v8540_v12 }
  0xb4   :  { %2569 = vmatpush1.bf16.msra.mxu0 %v8512_v32  ;;  %v2928_v12 = vrot.slane %v2926_v53, 4 }
  0xb5   :  { %7067 = vmatprep.subr.bf16.mxu0 %v8552_v30 }
  0xb7   :  { %6565 = vmatmul.mubr.msk.bf16.vlgmr.msra.gmra.mrb[8].mxu0 %vm178_vm1, %v8568_v16 }
  0xb8   :  { %7068 = vmatpush3.bf16.msra.mxu0 %v8552_v30  ;;  %2608 = vmatprep.mubr.bf16.mxu0 %v10773_v63 }
  0xb9   :  { %7024 = vmatmul.mubr.msk.bf16.vlgmr.msra.gmra.mrb[20].mxu1 %vm178_vm1, %v8216_v29  ;;  %7503 = vmatprep.subr.msk.bf16.mxu0 %vm185_vm0, %v8503_v42  ;;  %v2740_v29 = vld [vmem:[#allocation2 + $0xb4] sm:$0x33] }
  0xba   :  { %1443 = vmatpush1.bf16.msra.mxu1 %v8585_v43  ;;  %1474 = vmatprep.mubr.bf16.mxu1 %v10773_v63 }
  0xbb   :  { %6513 = vmatprep.subr.msk.bf16.mxu1 %vm185_vm0, %v8181_v21  ;;  %v2685_v21 = vld [vmem:[%s10766_s29 + $0x14] sm:$0x1] }
  0xbc   :  { %7070 = vmatpush3.bf16.msra.mxu0 %v8524_v9 }
  0xbd   :  { %2792 = vmatprep.subr.bf16.mxu0 %v8594_v57 }
  0xbe   :  { %1445 = vmatpush1.bf16.msra.mxu1 %v8194_v24  ;;  %v7817_v24 = vld [vmem:[#allocation2 + $0xa8] sm:$0xff] }
  0xbf   :  { %6566 = vmatmul.mubr.msk.bf16.gmra.mrb[12].mxu0 %vm178_vm1, %v8589_v8  ;;  %7027 = vmatprep.subr.bf16.mxu1 %v8267_v44  ;;  %v8612_v13 = vcombine.high %v7817_v24, %v2740_v29  ;;  %v6574_v28 = vcombine.low %v7817_v24, %v2740_v29  ;;  %v2937_v29 = vshrl.u32 %v2909_v14, 16  ;;  %v2940_v24 = vshll.u32 %v2909_v14, 16 }
  0xc0   :  { %7071 = vmatprep.mubr.msk.bf16.mxu0 %vm178_vm1, %v8568_v16 }
  0xc1   :  { %6514 = vmatmul.mubr.msk.bf16.vlgmr.msra.gmra.mrb[12].mxu1 %vm178_vm1, %v8280_v52  ;;  %v8637_v22 = vsel %vm185_vm0, %v6574_v28, 0 }
  0xc2   :  { %1484 = vmatprep.mubr.bf16.mxu1 %v10773_v63  ;;  %7028 = vmatpush3.bf16.msra.mxu1 %v8267_v44  ;;  %v2699_v44 = vsel %vm8325_vm4, %v8528_v50, %v8505_v46  ;;  %v2730_v46 = vshll.u32 %v2685_v21, 16  ;;  %v8672_v50 = vsel %vm185_vm0, %v8652_v45, 0  ;;  %v1671_v21 = vld [vmem:[%s10766_s29 + $0x4] sm:$0xf] }
  0xc3   :  { %7498 = vmatprep.subr.msk.bf16.mxu1 %vm185_vm0, %v8271_v48  ;;  %v8622_v48 = vld [vmem:[#allocation2 + $0x90] ss:$12 sps:$4 sm:$0xff]   ;;  %v1690_v35 = vshrl.u32 %v1671_v21, 16 }
  0xc4   :  { %v2732_v7 = vrot.slane %v2730_v46, 5  ;;  %v1686_v46 = vshll.u32 %v1671_v21, 16 }
  0xc5   :  { %v1692_v14 = vrot.slane %v1690_v35, 4 }
  0xc6   :  { %7030 = vmatpush3.bf16.msra.mxu1 %v8290_v60  ;;  %v2709_v60 = vsel %vm8325_vm4, %v8536_v1, %v8530_v55  ;;  %v2733_v3 = vsel %vm8325_vm4, %v2728_v40, %v2732_v7  ;;  %v2918_v1 = vrot.slane %v2916_v23, 5 }
  0xc7   :  { %7072 = vmatmul.mubr.msk.bf16.vlgmr.msra.gmra.mrb[16].mxu0 %vm178_vm1, %v8589_v8  ;;  %1556 = vmatprep.subr.bf16.mxu1 %v8594_v57  ;;  %v8645_v33 = vcombine.low %v2699_v44, %v2709_v60  ;;  %v8676_v55 = vcombine.low %v2723_v26, %v2733_v3  ;;  %v1677_v60 = vshrl.u32 %v1670_v19, 16  ;;  %v7821_v3 = vld [vmem:[#allocation2 + $0xd8] sm:$0xff] }
  0xc8   :  { %2793 = vmatpush1.bf16.msra.mxu0 %v8622_v48  ;;  %2824 = vmatprep.mubr.bf16.mxu0 %v10773_v63  ;;  %v8715_v51 = vcombine.high %v7821_v3, %v2966_v59  ;;  %v6587_v53 = vcombine.low %v7821_v3, %v2966_v59 }
  0xc9   :  { %6577 = vmatprep.subr.msk.bf16.mxu0 %vm185_vm0, %v8612_v13  ;;  %6515 = vmatmul.mubr.msk.bf16.gmra.mrb[16].mxu1 %vm178_vm1, %v8317_v31 }
  0xca   :  { %7031 = vmatprep.mubr.msk.bf16.mxu1 %vm178_vm1, %v8280_v52  ;;  %v2913_v52 = vshrl.u32 %v2906_v5, 16  ;;  %v2939_v5 = vrot.slane %v2937_v29, 4 }
  0xcc   :  { %2795 = vmatpush1.bf16.msra.mxu0 %v8637_v22  ;;  %v2915_v61 = vrot.slane %v2913_v52, 4  ;;  %v2942_v52 = vrot.slane %v2940_v24, 5  ;;  %v8750_v24 = vld [vmem:[#allocation2 + $0xc8] ss:$12 sps:$4 sm:$0xff]  }
  0xcd   :  { %7075 = vmatprep.subr.bf16.mxu0 %v8641_v2 }
  0xce   :  { %v2919_v15 = vor.u32 %v2918_v1, %v2915_v61  ;;  %v2911_v61 = vld [vmem:[%s10767_s22 + $0x14] sm:$0x1]  ;;  %v1679_v1 = vrot.slane %v1677_v60, 4  ;;  %v2943_v29 = vor.u32 %v2942_v52, %v2939_v5 }
  0xcf   :  { %6578 = vmatmul.mubr.msk.bf16.vlgmr.msra.gmra.mrb[8].mxu0 %vm178_vm1, %v8645_v33 }
  0xd0   :  { %7076 = vmatpush3.bf16.msra.mxu0 %v8641_v2  ;;  %2834 = vmatprep.mubr.bf16.mxu0 %v10773_v63  ;;  %v2920_v40 = vrot.slane %v2919_v15, 4  ;;  %v8736_v15 = vld [vmem:[#allocation2 + $0xc0] ss:$12 sps:$4 sm:$0xff]  }
  0xd1   :  { %7032 = vmatmul.mubr.msk.bf16.vlgmr.msra.gmra.mrb[20].mxu1 %vm178_vm1, %v8317_v31  ;;  %7504 = vmatprep.subr.msk.bf16.mxu0 %vm185_vm0, %v8652_v45  ;;  %v2908_v31 = vld [vmem:[%s10767_s22 + $0x8] sm:$0x1] }
  0xd2   :  { %1557 = vmatpush1.bf16.msra.mxu1 %v8622_v48  ;;  %1588 = vmatprep.mubr.bf16.mxu1 %v10773_v63  ;;  %v2932_v18 = vshll.u32 %v2908_v31, 16 }
  0xd3   :  { %6518 = vmatprep.subr.msk.bf16.mxu1 %vm185_vm0, %v8234_v36  ;;  %v2910_v36 = vld [vmem:[%s10767_s22 + $0x10] sm:$0xf] }
  0xd4   :  { %7078 = vmatpush3.bf16.msra.mxu0 %v8672_v50  ;;  %v2946_v28 = vshll.u32 %v2910_v36, 16  ;;  %v2950_v44 = vshrl.u32 %v2910_v36, 16  ;;  %v2934_v7 = vrot.slane %v2932_v18, 5  ;;  %v1673_v36 = vld [vmem:[%s10766_s29 + $0xc] sm:$0xf] }
  0xd5   :  { %3018 = vmatprep.subr.bf16.mxu0 %v8689_v37  ;;  %v1701_v60 = vshrl.u32 %v1673_v36, 16  ;;  %v1704_v59 = vshll.u32 %v1673_v36, 16 }
  0xd6   :  { %1559 = vmatpush1.bf16.msra.mxu1 %v8242_v38  ;;  %v2929_v38 = vor.u32 %v2928_v12, %v8684_v0  ;;  %v8713_v23 = vrot.slane %v2946_v28, 5  ;;  %v2952_v26 = vrot.slane %v2950_v44, 4  ;;  %v1688_v12 = vrot.slane %v1686_v46, 5 }
  0xd7   :  { %6579 = vmatmul.mubr.msk.bf16.gmra.mrb[12].mxu0 %vm178_vm1, %v8676_v55  ;;  %7035 = vmatprep.subr.bf16.mxu1 %v8299_v6  ;;  %v1680_v6 = vshll.u32 %v1670_v19, 16  ;;  %v2925_v19 = vsel %vm8325_vm4, %v2920_v40, %v8684_v0  ;;  %v8746_v0 = vsel %vm185_vm0, %v6587_v53, 0  ;;  %v2944_v40 = vrot.slane %v2943_v29, 4 }
  0xd8   :  { %7079 = vmatprep.mubr.msk.bf16.mxu0 %vm178_vm1, %v8645_v33  ;;  %v2930_v39 = vrot.slane %v2929_v38, 4  ;;  %v2953_v21 = vor.u32 %v2952_v26, %v8713_v23  ;;  %v2956_v38 = vshll.u32 %v2911_v61, 16  ;;  %v1703_v3 = vrot.slane %v1701_v60, 4  ;;  %v7824_v60 = vld [vmem:[#allocation2 + $0xe0] ss:$12 sps:$4 sm:$0x3f]  }
  0xd9   :  { %6519 = vmatmul.mubr.msk.bf16.vlgmr.msra.gmra.mrb[12].mxu1 %vm178_vm1, %v8344_v58  ;;  %v1682_v31 = vrot.slane %v1680_v6, 5  ;;  %v1693_v6 = vor.u32 %v1692_v14, %v1688_v12 }
  0xda   :  { %1598 = vmatprep.mubr.bf16.mxu1 %v10773_v63  ;;  %7036 = vmatpush3.bf16.msra.mxu1 %v7820_v4  ;;  %v2935_v18 = vsel %vm8325_vm4, %v2930_v39, %v2934_v7  ;;  %v2954_v7 = vrot.slane %v2953_v21, 4  ;;  %v2958_v5 = vrot.slane %v2956_v38, 5  ;;  %v8758_v39 = vld [vmem:[#allocation2 + $0xe0] ss:$12 sps:$4 sm:$0x3f]  }
  0xdb   :  { %7499 = vmatprep.subr.msk.bf16.mxu1 %vm185_vm0, %v8332_v49  ;;  %v1672_v49 = vld [vmem:[%s10766_s29 + $0x8] sm:$0x1]  ;;  %v1683_v28 = vor.u32 %v1682_v31, %v1679_v1  ;;  %v8754_v35 = vcombine.low %v2925_v19, %v2935_v18  ;;  %v1694_v53 = vrot.slane %v1693_v6, 4  ;;  %v1675_v31 = vld [vmem:[%s10766_s29 + $0x14] sm:$0x1]  ;;  %v8778_v36 = vsel %vm185_vm0, %v8758_v39, 0 }
  0xdc   :  { %v1696_v44 = vshll.u32 %v1672_v49, 16  ;;  %v2949_v49 = vsel %vm8325_vm4, %v2944_v40, %v8713_v23  ;;  %v2959_v14 = vsel %vm8325_vm4, %v2954_v7, %v2958_v5  ;;  %v7829_v40 = vld [vmem:[#allocation2 + $0x4] ss:$12 sps:$4 sm:$0xff]  }
  0xdd   :  { %v1684_v52 = vrot.slane %v1683_v28, 4  ;;  %v8786_v29 = vcombine.low %v2949_v49, %v2959_v14  ;;  %v10774_v7 = vld [vmem:[#allocation18_spill] sm:$0xff] }
  0xde   :  { %7038 = vmatpush3.bf16.msra.mxu1 %v8350_v56  ;;  %v1674_v56 = vld [vmem:[%s10766_s29 + $0x10] sm:$0xf]  ;;  %v1698_v26 = vrot.slane %v1696_v44, 5  ;;  %v7823_v44 = vld [vmem:[#allocation2 + $0xc8] ss:$12 sps:$4 sm:$0xff]  }
  0xdf   :  { %7080 = vmatmul.mubr.msk.bf16.vlgmr.msra.gmra.mrb[16].mxu0 %vm178_vm1, %v8676_v55  ;;  %1736 = vmatprep.subr.bf16.mxu1 %v8689_v37  ;;  %v1710_v4 = vshll.u32 %v1674_v56, 16  ;;  %v1714_v46 = vshrl.u32 %v1674_v56, 16  ;;  %v1689_v19 = vsel %vm8325_vm4, %v1684_v52, %v1688_v12  ;;  %v10775_v52 = vld [vmem:[#allocation17_spill] sm:$0xff] }
  0xe0   :  { %3019 = vmatpush1.bf16.msra.mxu0 %v8736_v15  ;;  %3050 = vmatprep.mubr.bf16.mxu0 %v10773_v63  ;;  %v1699_v23 = vsel %vm8325_vm4, %v1694_v53, %v1698_v26 }
  0xe1   :  { %6590 = vmatprep.subr.msk.bf16.mxu0 %vm185_vm0, %v8715_v51  ;;  %6520 = vmatmul.mubr.msk.bf16.gmra.mrb[16].mxu1 %vm178_vm1, %v8370_v25  ;;  %v1712_v61 = vrot.slane %v1710_v4, 5  ;;  %v1716_v1 = vrot.slane %v1714_v46, 4  ;;  %v6523_v21 = vcombine.low %v1689_v19, %v1699_v23  ;;  %v7826_v4 = vld [vmem:[#allocation2 + $0x30] ss:$12 sps:$4 sm:$0xff]   ;;  %v3754_v23 = vld [vmem:[%s10632_s3] sm:$0xf] }
  0xe2   :  { %7039 = vmatprep.mubr.msk.bf16.mxu1 %vm178_vm1, %v8344_v58  ;;  %v1706_v58 = vrot.slane %v1704_v59, 5  ;;  %v7825_v59 = vld [vmem:[#allocation2 + $0x34] ss:$12 sps:$4 sm:$0xff]   ;;  %v7828_v46 = vld [vmem:[#allocation2 + $0x50] ss:$12 sps:$4 sm:$0x3f]  }
  0xe3   :  { %v1717_v18 = vor.u32 %v1716_v1, %v1712_v61  ;;  %v7833_v1 = vld [vmem:[%s10632_s3 + $0xc] sm:$0xff]  }
  0xe4   :  { %3021 = vmatpush1.bf16.msra.mxu0 %v8746_v0  ;;  %v1707_v56 = vor.u32 %v1706_v58, %v1703_v3  ;;  %v7832_v58 = vld [vmem:[#allocation2 + $0x64] ss:$12 sps:$4 sm:$0xff]  }
  0xe5   :  { %7083 = vmatprep.subr.bf16.mxu0 %v8750_v24  ;;  %v1718_v38 = vrot.slane %v1717_v18, 4 }
  0xe6   :  { %v1708_v12 = vrot.slane %v1707_v56, 4 }
  0xe7   :  { %6591 = vmatmul.mubr.msk.bf16.vlgmr.msra.gmra.mrb[8].mxu0 %vm178_vm1, %v8754_v35 }
  0xe8   :  { %3060 = vmatprep.mubr.bf16.mxu0 %v10773_v63  ;;  %7084 = vmatpush3.bf16.msra.mxu0 %v8750_v24 }
  0xe9   :  { %7040 = vmatmul.mubr.msk.bf16.vlgmr.msra.gmra.mrb[20].mxu1 %vm178_vm1, %v8370_v25  ;;  %7505 = vmatprep.subr.msk.bf16.mxu0 %vm185_vm0, %v8758_v39  ;;  %v1720_v25 = vshll.u32 %v1675_v31, 16 }
  0xea   :  { %1737 = vmatpush1.bf16.msra.mxu1 %v8736_v15  ;;  %1768 = vmatprep.mubr.bf16.mxu1 %v10773_v63 }
  0xeb   :  { %6525 = vmatprep.subr.msk.bf16.mxu1 %vm185_vm0, %v8297_v62  ;;  %v1722_v28 = vrot.slane %v1720_v25, 5  ;;  %v1713_v62 = vsel %vm8325_vm4, %v1708_v12, %v1712_v61 }
  0xec   :  { %7086 = vmatpush3.bf16.msra.mxu0 %v8778_v36 }
  0xee   :  { %1739 = vmatpush1.bf16.msra.mxu1 %v8312_v27  ;;  %v1723_v27 = vsel %vm8325_vm4, %v1718_v38, %v1722_v28  ;;  %v3761_v28 = vshrl.u32 %v3754_v23, 16 }
  0xef   :  { %6592 = vmatmul.mubr.msk.bf16.gmra.mrb[12].mxu0 %vm178_vm1, %v8786_v29  ;;  %7043 = vmatprep.subr.bf16.mxu1 %v7823_v44  ;;  %v6524_v6 = vcombine.low %v1713_v62, %v1723_v27 }
  0xf0   :  { %7087 = vmatprep.mubr.msk.bf16.mxu0 %vm178_vm1, %v8754_v35 }
  0xf1   :  { %6526 = vmatmul.mubr.msk.bf16.vlgmr.msra.gmra.mrb[12].mxu1 %vm178_vm1, %v6523_v21 }
  0xf2   :  { %1778 = vmatprep.mubr.bf16.mxu1 %v10773_v63  ;;  %7044 = vmatpush3.bf16.msra.mxu1 %v7823_v44  ;;  %v3764_v44 = vshll.u32 %v3754_v23, 16 }
  0xf3   :  { %7500 = vmatprep.subr.msk.bf16.mxu1 %vm185_vm0, %v7824_v60 }
  0xf6   :  { %7046 = vmatpush3.bf16.msra.mxu1 %v8381_v34  ;;  %v7827_v34 = vld [vmem:[#allocation2 + $0x38] ss:$12 sps:$4 sm:$0xff]  }
  0xf7   :  { %7088 = vmatmul.mubr.msk.bf16.vlgmr.msra.gmra.mrb[16].mxu0 %vm178_vm1, %v8786_v29  ;;  %3322 = vmatprep.subr.bf16.mxu1 %v7825_v59 }
  0xf9   :  { %6527 = vmatmul.mubr.msk.bf16.gmra.mrb[16].mxu1 %vm178_vm1, %v6524_v6 }
  0xfa   :  { %7047 = vmatprep.mubr.msk.bf16.mxu1 %vm178_vm1, %v6523_v21 }
 0x101   :  { %7048 = vmatmul.mubr.msk.bf16.vlgmr.msra.gmra.mrb[20].mxu1 %vm178_vm1, %v6524_v6 }
 0x102   :  { %3323 = vmatpush1.bf16.msra.mxu1 %v7826_v4  ;;  %3354 = vmatprep.mubr.bf16.mxu1 %v10773_v63 }
 0x103   :  { %6595 = vmatprep.subr.msk.bf16.mxu1 %vm185_vm0, %v8353_v10  ;;  %v7830_v10 = vld [vmem:[#allocation2] ss:$12 sps:$4 sm:$0xff]  }
 0x106   :  { %3325 = vmatpush1.bf16.msra.mxu1 %v8368_v11 }
 0x107   :  { %7091 = vmatprep.subr.bf16.mxu1 %v7827_v34 }
 0x109   :  { %6596 = vmatmul.mubr.msk.bf16.vlgmr.msra.gmra.mrb[24].mxu1 %vm178_vm1, %v8568_v16 }
 0x10a   :  { %3364 = vmatprep.mubr.bf16.mxu1 %v10773_v63  ;;  %7092 = vmatpush3.bf16.msra.mxu1 %v7827_v34 }
 0x10b   :  { %7506 = vmatprep.subr.msk.bf16.mxu1 %vm185_vm0, %v7828_v46 }
 0x10e   :  { %7094 = vmatpush3.bf16.msra.mxu1 %v8398_v41 }
 0x10f   :  { %3424 = vmatprep.subr.bf16.mxu1 %v7829_v40 }
 0x111   :  { %6597 = vmatmul.mubr.msk.bf16.gmra.mrb[28].mxu1 %vm178_vm1, %v8589_v8 }
 0x112   :  { %7095 = vmatprep.mubr.msk.bf16.mxu1 %vm178_vm1, %v8568_v16  ;;  %v7831_v16 = vld [vmem:[%s10632_s3] sm:$0xff]  }
 0x119   :  { %7096 = vmatmul.mubr.msk.bf16.vlgmr.msra.gmra.mrb[32].mxu1 %vm178_vm1, %v8589_v8  ;;  %v10776_v8 = vld [vmem:[#allocation16_spill] sm:$0xff] }
 0x11a   :  { %3425 = vmatpush1.bf16.msra.mxu1 %v7830_v10  ;;  %3456 = vmatprep.mubr.bf16.mxu1 %v10773_v63  ;;  %v3763_v10 = vrot.slane %v3761_v28, 4 }
 0x11b   :  { %6600 = vmatprep.subr.msk.bf16.mxu1 %vm185_vm0, %v8422_v17 }
 0x11c   :  { %v229_v11 = vpop.f32.mrb[0].mxu1 }
 0x11d   :  { %v231_v41 = vpop.f32.mrb[1].mxu1 }
 0x11e   :  { %3427 = vmatpush1.bf16.msra.mxu1 %v10774_v7  ;;  %v233_v5 = vpop.f32.mrb[2].mxu1 }
 0x11f   :  { %7099 = vmatprep.subr.bf16.mxu1 %v10775_v52  ;;  %v235_v26 = vpop.f32.mrb[3].mxu1 }
 0x121   :  { %6601 = vmatmul.mubr.msk.bf16.vlgmr.msra.gmra.mrb[24].mxu1 %vm178_vm1, %v7831_v16 }
 0x122   :  { %3466 = vmatprep.mubr.bf16.mxu1 %v10773_v63  ;;  %7100 = vmatpush3.bf16.msra.mxu1 %v10775_v52 }
 0x123   :  { %7507 = vmatprep.subr.msk.bf16.mxu1 %vm185_vm0, %v10776_v8 }
 0x124   :  { %v8837_v17 = vpop.f32.mrb[4].mxu1 }
 0x125   :  { %v8839_v3 = vpop.f32.mrb[5].mxu1 }
 0x126   :  { %7102 = vmatpush3.bf16.msra.mxu1 %v8463_v54  ;;  %v8842_v53 = vpop.f32.mrb[6].mxu1  ;;  %v10658_v54 = vlaneseq }
 0x127   :  { %3526 = vmatprep.subr.bf16.mxu1 %v7832_v58  ;;  %v8844_v61 = vpop.f32.mrb[7].mxu1 }
 0x129   :  { %6602 = vmatmul.mubr.msk.bf16.gmra.mrb[28].mxu1 %vm178_vm1, %v7833_v1 }
 0x12a   :  { %7103 = vmatprep.mubr.msk.bf16.mxu1 %vm178_vm1, %v7831_v16 }
 0x131   :  { %7104 = vmatmul.mubr.msk.bf16.vlgmr.msra.gmra.mrb[32].mxu1 %vm178_vm1, %v7833_v1 }
 0x132   :  { %3527 = vmatpush1.bf16.msra.mxu1 %v8585_v43  ;;  %3558 = vmatprep.mubr.bf16.mxu1 %v10773_v63 }
 0x133   :  { %6605 = vmatprep.subr.msk.bf16.mxu1 %vm185_vm0, %v8548_v20 }
 0x136   :  { %3529 = vmatpush1.bf16.msra.mxu1 %v8512_v32  ;;  %v8869_v32 = vshrl.u32 %v10658_v54, 7 }
 0x137   :  { %7107 = vmatprep.subr.bf16.mxu1 %v8552_v30 }
 0x138   :  { %10777 = vst [vmem:[#allocation18_spill] sm:$0xff] %v8869_v32  ;;  %v8874_v20 = vsub.s32 0, %v8869_v32  ;;  %v103_v47 = vadd.s32 16, %v8869_v32 }
 0x139   :  { %6606 = vmatmul.mubr.msk.bf16.vlgmr.msra.gmra.mrb[24].mxu1 %vm178_vm1, %v8645_v33 }
 0x13a   :  { %3568 = vmatprep.mubr.bf16.mxu1 %v10773_v63  ;;  %7108 = vmatpush3.bf16.msra.mxu1 %v8552_v30  ;;  %10778 = vst [vmem:[#allocation17_spill] sm:$0xff] %v8874_v20  ;;  %v8887_v30 = vld [vmem:[%s10635_s6] sm:$0x7] }
 0x13b   :  { %7508 = vmatprep.subr.msk.bf16.mxu1 %vm185_vm0, %v8503_v42  ;;  %v8879_v42 = vld [vmem:[%s10634_s5] sm:$0x7]  ;;  %v8905_v14 = vrot.slane %v8887_v30, %v8874_v20 }
 0x13c   :  { %v8891_v43 = vrot.slane %v8879_v42, %v8874_v20 }
 0x13e   :  { %7110 = vmatpush3.bf16.msra.mxu1 %v8524_v9  ;;  %v8882_v9 = vsub.s32 1, %v8869_v32 }
 0x13f   :  { %3640 = vmatprep.subr.bf16.mxu1 %v8594_v57 }
 0x140   :  { %10779 = vst [vmem:[#allocation16_spill] sm:$0xff] %v8882_v9 }
 0x141   :  { %6607 = vmatmul.mubr.msk.bf16.gmra.mrb[28].mxu1 %vm178_vm1, %v8676_v55 }
 0x142   :  { %7111 = vmatprep.mubr.msk.bf16.mxu1 %vm178_vm1, %v8645_v33  ;;  %v8897_v33 = vrot.slane %v8879_v42, %v8882_v9 }
 0x149   :  { %7112 = vmatmul.mubr.msk.bf16.vlgmr.msra.gmra.mrb[32].mxu1 %vm178_vm1, %v8676_v55 }
 0x14a   :  { %v965_v57 = vpop.f32.mrb[0].mxu0  ;;  %3641 = vmatpush1.bf16.msra.mxu1 %v8622_v48  ;;  %3672 = vmatprep.mubr.bf16.mxu1 %v10773_v63  ;;  %v3755_v48 = vld [vmem:[%s10632_s3 + $0x4] sm:$0xf] }
 0x14b   :  { %v7255_v31 = vadd.f32 %v965_v57, %v229_v11  ;;  %v967_v49 = vpop.f32.mrb[1].mxu0  ;;  %6610 = vmatprep.subr.msk.bf16.mxu1 %vm185_vm0, %v8612_v13  ;;  %v8916_v13 = vrot.slane %v8887_v30, %v8882_v9  ;;  %v3770_v62 = vshll.u32 %v3755_v48, 16  ;;  %v3774_v6 = vshrl.u32 %v3755_v48, 16 }
 0x14c   :  { %v7256_v19 = vadd.f32 %v967_v49, %v231_v41  ;;  %v969_v55 = vpop.f32.mrb[2].mxu0  ;;  %v3766_v11 = vrot.slane %v3764_v44, 5 }
 0x14d   :  { %v7257_v56 = vadd.f32 %v969_v55, %v233_v5  ;;  %v971_v18 = vpop.f32.mrb[3].mxu0  ;;  %v1062_v25 = vmul.f32 %v7255_v31, %v8891_v43  ;;  %v8934_v41 = vrot.slane %v3770_v62, 5  ;;  %v3757_v31 = vld [vmem:[%s10632_s3 + $0xc] sm:$0xf] }
 0x14e   :  { %v1063_v21 = vmul.f32 %v7256_v19, %v8897_v33  ;;  %v7258_v12 = vadd.f32 %v971_v18, %v235_v26  ;;  %3643 = vmatpush1.bf16.msra.mxu1 %v8637_v22  ;;  %v3767_v19 = vor.u32 %v3766_v11, %v3763_v10  ;;  %v3785_v18 = vshrl.u32 %v3757_v31, 16 }
 0x14f   :  { %v1091_v38 = vadd.f32 %v8905_v14, %v1062_v25  ;;  %7115 = vmatprep.subr.bf16.mxu1 %v8641_v2  ;;  %v1065_v27 = vmul.f32 %v7257_v56, %v8891_v43  ;;  %v3788_v25 = vshll.u32 %v3757_v31, 16 }
 0x150   :  { %v1066_v60 = vmul.f32 %v7258_v12, %v8897_v33  ;;  %v1092_v4 = vadd.f32 %v8916_v13, %v1063_v21 }
 0x151   :  { %v1103_v59 = vmax.f32 %v1091_v38, 0.0  ;;  %6611 = vmatmul.mubr.msk.bf16.vlgmr.msra.gmra.mrb[24].mxu1 %vm178_vm1, %v8754_v35  ;;  %v1094_v26 = vadd.f32 %v8905_v14, %v1065_v27  ;;  %v3768_v38 = vrot.slane %v3767_v19, 4 }
 0x152   :  { %v975_v34 = vpop.f32.mrb[4].mxu0  ;;  %v1095_v22 = vadd.f32 %v8916_v13, %v1066_v60  ;;  %3682 = vmatprep.mubr.bf16.mxu1 %v10773_v63  ;;  %7116 = vmatpush3.bf16.msra.mxu1 %v8641_v2  ;;  %v3776_v2 = vrot.slane %v3774_v6, 4  ;;  %v8942_v58 = vmax.f32 %v1092_v4, 0.0  ;;  %v3790_v4 = vrot.slane %v3788_v25, 5 }
 0x153   :  { %v7259_v46 = vadd.f32 %v975_v34, %v8837_v17  ;;  %1145 = vrot.lane.b32.xlu0 %v1103_v59, %s7981_s4  ;;  %v977_v40 = vpop.f32.mrb[5].mxu0  ;;  %7509 = vmatprep.subr.msk.bf16.mxu1 %vm185_vm0, %v8652_v45  ;;  %v3756_v45 = vld [vmem:[%s10632_s3 + $0x8] sm:$0x1]  ;;  %v1106_v49 = vmax.f32 %v1094_v26, 0.0 }
 0x154   :  { %v7260_v7 = vadd.f32 %v977_v40, %v8839_v3  ;;  %v979_v5 = vpop.f32.mrb[6].mxu0  ;;  %v8937_v52 = vmax.f32 %v1095_v22, 0.0  ;;  %v3780_v55 = vshll.u32 %v3756_v45, 16  ;;  %v3759_v40 = vld [vmem:[%s10632_s3 + $0x14] sm:$0x1] }
 0x155   :  { %v1068_v16 = vmul.f32 %v7259_v46, %v8891_v43  ;;  %v7261_v8 = vadd.f32 %v979_v5, %v8842_v53  ;;  %v981_v17 = vpop.f32.mrb[7].mxu0 }
 0x156   :  { %v1069_v1 = vmul.f32 %v7260_v7, %v8897_v33  ;;  %v7262_v3 = vadd.f32 %v981_v17, %v8844_v61  ;;  %1151 = vrot.lane.b32.xlu1 %v8937_v52, %s7981_s4  ;;  %7118 = vmatpush3.bf16.msra.mxu1 %v8672_v50  ;;  %v3758_v61 = vld [vmem:[%s10632_s3 + $0x10] sm:$0xf]  ;;  %v3777_v50 = vor.u32 %v3776_v2, %v8934_v41  ;;  %v3782_v6 = vrot.slane %v3780_v55, 5 }
 0x157   :  { %v1071_v57 = vmul.f32 %v7261_v8, %v8891_v43  ;;  %1147 = vrot.lane.b32.xlu0 %v8942_v58, %s7981_s4  ;;  %v1097_v53 = vadd.f32 %v8905_v14, %v1068_v16  ;;  %3820 = vmatprep.subr.bf16.mxu1 %v8689_v37  ;;  %v3794_v21 = vshll.u32 %v3758_v61, 16  ;;  %v3798_v12 = vshrl.u32 %v3758_v61, 16 }
 0x158   :  { %v1072_v23 = vmul.f32 %v7262_v3, %v8897_v33  ;;  %v1098_v37 = vadd.f32 %v8916_v13, %v1069_v1  ;;  %v3778_v28 = vrot.slane %v3777_v50, 4  ;;  %v3773_v7 = vsel %vm8325_vm4, %v3768_v38, %v8934_v41 }
 0x159   :  { %v1109_v48 = vmax.f32 %v1097_v53, 0.0  ;;  %6612 = vmatmul.mubr.msk.bf16.gmra.mrb[28].mxu1 %vm178_vm1, %v8786_v29  ;;  %v1100_v56 = vadd.f32 %v8905_v14, %v1071_v57  ;;  %v3796_v34 = vrot.slane %v3794_v21, 5  ;;  %v3800_v22 = vrot.slane %v3798_v12, 4 }
 0x15a   :  { %7119 = vmatprep.mubr.msk.bf16.mxu1 %vm178_vm1, %v8754_v35  ;;  %v8975_v62 = vmax.f32 %v1098_v37, 0.0  ;;  %v1101_v60 = vadd.f32 %v8916_v13, %v1072_v23  ;;  %v3787_v35 = vrot.slane %v3785_v18, 4  ;;  %v3783_v5 = vsel %vm8325_vm4, %v3778_v28, %v3782_v6 }
 0x15b   :  { %1149 = vrot.lane.b32.xlu0 %v1106_v49, %s7981_s4  ;;  %1153 = vrot.lane.b32.xlu1 %v1109_v48, %s7981_s4  ;;  %v1112_v27 = vmax.f32 %v1100_v56, 0.0  ;;  %v3801_v2 = vor.u32 %v3800_v22, %v3796_v34  ;;  %v3804_v16 = vshll.u32 %v3759_v40, 16 }
 0x15c   :  { %v8973_v44 = vpop.f32.mrb[8].mxu1  ;;  %v8986_v11 = vmax.f32 %v1101_v60, 0.0  ;;  %v3791_v26 = vor.u32 %v3790_v4, %v3787_v35 }
 0x15d   :  { %v1018_v59 = vpop.f32.mrb[9].mxu1  ;;  %v3802_v8 = vrot.slane %v3801_v2, 4 }
 0x15e   :  { %v8978_v46 = vpop.f32.mrb[10].mxu1  ;;  %v3792_v41 = vrot.slane %v3791_v26, 4 }
 0x15f   :  { %1155 = vrot.lane.b32.xlu1 %v8975_v62, %s7981_s4  ;;  %1157 = vrot.lane.b32.xlu0 %v1112_v27, %s7981_s4  ;;  %v1021_v10 = vpop.f32.mrb[11].mxu1 }
 0x160   :  { %v3797_v17 = vsel %vm8325_vm4, %v3792_v41, %v3796_v34 }
 0x161   :  { %7120 = vmatmul.mubr.msk.bf16.vlgmr.msra.gmra.mrb[32].mxu1 %vm178_vm1, %v8786_v29  ;;  %v6615_v29 = vcombine.low %v3773_v7, %v3783_v5 }
 0x162   :  { %3821 = vmatpush1.bf16.msra.mxu1 %v8736_v15  ;;  %3852 = vmatprep.mubr.bf16.mxu1 %v10773_v63  ;;  %v3806_v15 = vrot.slane %v3804_v16, 5 }
 0x163   :  { %1159 = vrot.lane.b32.xlu1 %v8986_v11, %s7981_s4  ;;  %6617 = vmatprep.subr.msk.bf16.mxu1 %vm185_vm0, %v8715_v51 }
 0x164   :  { %v3807_v45 = vsel %vm8325_vm4, %v3802_v8, %v3806_v15 }
 0x165   :  { %v6616_v51 = vcombine.low %v3797_v17, %v3807_v45 }
 0x166   :  { %3823 = vmatpush1.bf16.msra.mxu1 %v8746_v0  ;;  %v9024_v0 = vld [vmem:[%s10635_s6] sm:$0x7] }
 0x167   :  { %7123 = vmatprep.subr.bf16.mxu1 %v8750_v24  ;;  %v9039_v1 = vrot.slane %v9024_v0, %v8874_v20  ;;  %v9043_v57 = vrot.slane %v9024_v0, %v8882_v9 }
 0x169   :  { %6618 = vmatmul.mubr.msk.bf16.vlgmr.msra.gmra.mrb[24].mxu1 %vm178_vm1, %v6615_v29 }
 0x16a   :  { %3862 = vmatprep.mubr.bf16.mxu1 %v10773_v63  ;;  %7124 = vmatpush3.bf16.msra.mxu1 %v8750_v24  ;;  %v9019_v63 = vld [vmem:[%s10634_s5] sm:$0x7] }
 0x16b   :  { %7510 = vmatprep.subr.msk.bf16.mxu1 %vm185_vm0, %v8758_v39  ;;  %v9028_v24 = vrot.slane %v9019_v63, %v8874_v20  ;;  %v9032_v39 = vrot.slane %v9019_v63, %v8882_v9 }
 0x16e   :  { %7126 = vmatpush3.bf16.msra.mxu1 %v8778_v36  ;;  %v9035_v36 = vsub.s32 2, %v8869_v32 }
 0x170   :  { %v9051_v19 = vrot.slane %v8879_v42, %v9035_v36  ;;  %v9061_v56 = vrot.slane %v8887_v30, %v9035_v36 }
 0x171   :  { %6619 = vmatmul.mubr.msk.bf16.gmra.mrb[28].mxu1 %vm178_vm1, %v6616_v51 }
 0x172   :  { %7127 = vmatprep.mubr.msk.bf16.mxu1 %vm178_vm1, %v6615_v29  ;;  %v1064_v18 = vmul.f32 %v9051_v19, %v1018_v59  ;;  %v1067_v59 = vmul.f32 %v9051_v19, %v1021_v10  ;;  %v1070_v26 = vmul.f32 %v8973_v44, %v9051_v19 }
 0x174   :  { %v1093_v30 = vadd.f32 %v9061_v56, %v1064_v18  ;;  %v1096_v10 = vadd.f32 %v9061_v56, %v1067_v59 }
 0x176   :  { %v1105_v2 = vmax.f32 %v1093_v30, 0.0 }
 0x179   :  { %7128 = vmatmul.mubr.msk.bf16.vlgmr.msra.gmra.mrb[32].mxu1 %vm178_vm1, %v6616_v51 }
 0x1ba   :  { %v3052_v3 = vpop.f32.mrb[8].mxu0 }
 0x1bb   :  { %v3149_v53 = vmul.f32 %v9028_v24, %v3052_v3  ;;  %v3054_v31 = vpop.f32.mrb[9].mxu0  ;;  %v1099_v3 = vadd.f32 %v9061_v56, %v1070_v26 }
 0x1bc   :  { %v3150_v61 = vmul.f32 %v9032_v39, %v3054_v31  ;;  %v9047_v49 = vpop.f32.mrb[10].mxu0 }
 0x1bd   :  { %v9053_v50 = vpop.f32.mrb[11].mxu0  ;;  %v3178_v55 = vadd.f32 %v9039_v1, %v3149_v53  ;;  %v1073_v53 = vmul.f32 %v8978_v46, %v9051_v19 }
 0x1be   :  { %v3179_v23 = vadd.f32 %v9043_v57, %v3150_v61 }
 0x1bf   :  { %v3190_v48 = vmax.f32 %v3178_v55, 0.0  ;;  %v1108_v55 = vmax.f32 %v1096_v10, 0.0  ;;  %v1102_v30 = vadd.f32 %v9061_v56, %v1073_v53 }
 0x1c0   :  { %v9057_v37 = vmax.f32 %v3179_v23, 0.0 }
 0x1c1   :  { %3230 = vrot.lane.b32.xlu0 %v3190_v48, %s7981_s4  ;;  %v1114_v10 = vmax.f32 %v1102_v30, 0.0  ;;  %v9199_v30 = vrot.slane %v9024_v0, %v9035_v36 }
 0x1c2   :  { %v3062_v25 = vpop.f32.mrb[12].mxu0  ;;  %3232 = vrot.lane.b32.xlu1 %v9057_v37, %s7981_s4 }
 0x1c3   :  { %v3155_v42 = vmul.f32 %v9028_v24, %v3062_v25  ;;  %v3064_v21 = vpop.f32.mrb[13].mxu0 }
 0x1c4   :  { %v3156_v12 = vmul.f32 %v9032_v39, %v3064_v21  ;;  %v9069_v38 = vpop.f32.mrb[14].mxu0  ;;  %v9071_v28 = vpop.f32.mrb[12].mxu1 }
 0x1c5   :  { %v9074_v27 = vpop.permute.xlu0 %1145  ;;  %v9076_v60 = vpop.f32.mrb[15].mxu0  ;;  %v3184_v6 = vadd.f32 %v9039_v1, %v3155_v42 }
 0x1c6   :  { %v3185_v35 = vadd.f32 %v9043_v57, %v3156_v12  ;;  %v9081_v4 = vpop.f32.mrb[13].mxu1  ;;  %vm10683_vm6 = vcmp.gt.f32.partialorder %v8942_v58, %v9074_v27  ;;  %v1111_v12 = vmax.f32 %v1099_v3, 0.0 }
 0x1c7   :  { %v3196_v34 = vmax.f32 %v3184_v6, 0.0  ;;  %v9083_v22 = vpop.f32.mrb[14].mxu1  ;;  %v1182_v17 = vsel %vm10683_vm6, %v8942_v58, %v9074_v27 }
 0x1c8   :  { %v9085_v40 = vmax.f32 %v3185_v35, 0.0  ;;  %v1152_v7 = vpop.permute.xlu1 %1151  ;;  %v9087_v5 = vpop.f32.mrb[15].mxu1 }
 0x1c9   :  { %v1148_v16 = vpop.permute.xlu0 %1147  ;;  %3238 = vrot.lane.b32.xlu0 %v3196_v34, %s7981_s4 }
 0x1ca   :  { %10780 = vst [vmem:[#allocation19_spill] sm:$0xff] %v9085_v40  ;;  %v1162_v29 = vsel %vm10684_vm5, %v9074_v27, %v1148_v16  ;;  %v7089_v41 = vpop.f32.mrb[16].mxu0  ;;  %3240 = vrot.lane.b32.xlu1 %v9085_v40, %s7981_s4 }
 0x1cb   :  { %v3105_v8 = vpop.f32.mrb[17].mxu0  ;;  %vm9099_vm7 = vcmp.gt.f32.partialorder %v1105_v2, %v1162_v29 }
 0x1cc   :  { %v9103_v44 = vpop.f32.mrb[18].mxu0  ;;  %v1183_v45 = vsel %vm9099_vm7, %v1105_v2, %v1162_v29  ;;  %v9112_v51 = vpop.f32.mrb[16].mxu1 }
 0x1cd   :  { %v9117_v31 = vpop.permute.xlu0 %1149  ;;  %v9119_v61 = vpop.permute.xlu1 %1153  ;;  %1906 = vrot.lane.b32.xlu0 %v1182_v17, %s7981_s4 }
 0x1ce   :  { %v9122_v23 = vpop.f32.mrb[19].mxu0  ;;  %1908 = vrot.lane.b32.xlu1 %v1183_v45, %s7981_s4  ;;  %vm10680_vm8 = vcmp.gt.f32.partialorder %v8937_v52, %v9117_v31  ;;  %v9127_v48 = vpop.f32.mrb[17].mxu1  ;;  %v1163_v18 = vsel %vm10684_vm5, %v9117_v31, %v1152_v7  ;;  %vm10673_vm10 = vcmp.gt.f32.partialorder %v8975_v62, %v9119_v61 }
 0x1cf   :  { %v9131_v46 = vpop.f32.mrb[18].mxu1  ;;  %v1184_v25 = vsel %vm10680_vm8, %v8937_v52, %v9117_v31  ;;  %vm9138_vm9 = vcmp.gt.f32.partialorder %v1108_v55, %v1163_v18  ;;  %v1186_v26 = vsel %vm10673_vm10, %v8975_v62, %v9119_v61 }
 0x1d0   :  { %v9142_v21 = vpop.f32.mrb[19].mxu1  ;;  %v1185_v59 = vsel %vm9138_vm9, %v1108_v55, %v1163_v18 }
 0x1d1   :  { %v1156_v6 = vpop.permute.xlu1 %1155  ;;  %1910 = vrot.lane.b32.xlu0 %v1184_v25, %s7981_s4  ;;  %v9152_v34 = vpop.permute.xlu0 %1157 }
 0x1d2   :  { %v1164_v35 = vsel %vm10684_vm5, %v9119_v61, %v1156_v6  ;;  %1912 = vrot.lane.b32.xlu1 %v1185_v59, %s7981_s4  ;;  %vm10672_vm12 = vcmp.gt.f32.partialorder %v8986_v11, %v9152_v34 }
 0x1d3   :  { %vm9155_vm11 = vcmp.gt.f32.partialorder %v1111_v12, %v1164_v35  ;;  %v1188_v18 = vsel %vm10672_vm12, %v8986_v11, %v9152_v34 }
 0x1d4   :  { %v1187_v2 = vsel %vm9155_vm11, %v1111_v12, %v1164_v35  ;;  %v9166_v16 = vpop.f32.mrb[20].mxu1  ;;  %v9195_v12 = vrot.slane %v9019_v63, %v9035_v36  ;;  %v10790_v36 = vmov 0 }
 0x1d5   :  { %1914 = vrot.lane.b32.xlu0 %v1186_v26, %s7981_s4  ;;  %v1160_v29 = vpop.permute.xlu1 %1159  ;;  %v9171_v17 = vpop.f32.mrb[21].mxu1 }
 0x1d6   :  { %v1165_v45 = vsel %vm10684_vm5, %v9152_v34, %v1160_v29  ;;  %1916 = vrot.lane.b32.xlu1 %v1187_v2, %s7981_s4  ;;  %v9176_v3 = vpop.f32.mrb[22].mxu1  ;;  %v3151_v6 = vmul.f32 %v9195_v12, %v3105_v8  ;;  %v3157_v26 = vmul.f32 %v7089_v41, %v9195_v12  ;;  %v3152_v41 = vmul.f32 %v9028_v24, %v9047_v49 }
 0x1d7   :  { %vm9178_vm13 = vcmp.gt.f32.partialorder %v1114_v10, %v1165_v45  ;;  %v9182_v55 = vpop.f32.mrb[23].mxu1  ;;  %v1850_v49 = vmul.f32 %v9071_v28, %v8891_v43 }
 0x1d8   :  { %v1189_v25 = vsel %vm9178_vm13, %v1114_v10, %v1165_v45  ;;  %v3180_v59 = vadd.f32 %v9199_v30, %v3151_v6  ;;  %v3186_v29 = vadd.f32 %v9199_v30, %v3157_v26  ;;  %v3153_v45 = vmul.f32 %v9032_v39, %v9053_v50 }
 0x1d9   :  { %1918 = vrot.lane.b32.xlu0 %v1188_v18, %s7981_s4  ;;  %v3158_v6 = vmul.f32 %v9028_v24, %v9069_v38  ;;  %v3159_v50 = vmul.f32 %v9032_v39, %v9076_v60  ;;  %v10794_v60 = vmov 0  ;;  %v1862_v54 = vadd.f32 %v1850_v49, %v8905_v14 }
 0x1da   :  { %1920 = vrot.lane.b32.xlu1 %v1189_v25, %s7981_s4  ;;  %v3192_v2 = vmax.f32 %v3180_v59, 0.0  ;;  %v3181_v25 = vadd.f32 %v9039_v1, %v3152_v41  ;;  %v3198_v59 = vmax.f32 %v3186_v29, 0.0 }
 0x1db   :  { %v3187_v9 = vadd.f32 %v9039_v1, %v3158_v6  ;;  %v3188_v20 = vadd.f32 %v9043_v57, %v3159_v50  ;;  %v1856_v6 = vmul.f32 %v9112_v51, %v8891_v43  ;;  %v10800_v51 = vmov 0 }
 0x233   :  { %v9203_v35 = vpop.permute.xlu0 %3230 }
 0x234   :  { %10789 = vst [vmem:[#allocation20_spill] sm:$0xff] %v9203_v35  ;;  %v3233_v10 = vpop.permute.xlu1 %3232  ;;  %vm10669_vm14 = vcmp.gt.f32.partialorder %v9057_v37, %v9203_v35 }
 0x235   :  { %v3246_v63 = vsel %vm10684_vm5, %v9203_v35, %v3233_v10  ;;  %v3266_v0 = vsel %vm10669_vm14, %v9057_v37, %v9203_v35 }
 0x236   :  { %3990 = vrot.lane.b32.xlu0 %v3266_v0, %s7981_s4  ;;  %vm9216_vm15 = vcmp.gt.f32.partialorder %v3192_v2, %v3246_v63  ;;  %v1851_v0 = vmul.f32 %v9081_v4, %v8897_v33 }
 0x237   :  { %v10791_v36 = vsel %vm9216_vm15, 4294967295, %v10790_v36  ;;  %v3267_v8 = vsel %vm9216_vm15, %v3192_v2, %v3246_v63  ;;  %v3182_v63 = vadd.f32 %v9043_v57, %v3153_v45  ;;  %v1853_v45 = vmul.f32 %v9083_v22, %v8891_v43 }
 0x238   :  { %10792 = vst [vmem:[#allocation21_spill] sm:$0xff] %v10791_v36  ;;  %3992 = vrot.lane.b32.xlu1 %v3267_v8, %s7981_s4 }
 0x23b   :  { %v9228_v18 = vpop.permute.xlu0 %3238 }
 0x23c   :  { %10793 = vst [vmem:[#allocation22_spill] sm:$0xff] %v9228_v18  ;;  %v3241_v10 = vpop.permute.xlu1 %3240  ;;  %vm10668_vm0 = vcmp.gt.f32.partialorder %v9085_v40, %v9228_v18  ;;  %v9237_v26 = vpop.f32.mrb[24].mxu1 }
 0x23d   :  { %v3248_v2 = vsel %vm10684_vm5, %v9228_v18, %v3241_v10  ;;  %v3270_v38 = vsel %vm10668_vm0, %v9085_v40, %v9228_v18  ;;  %v9248_v28 = vpop.f32.mrb[25].mxu1  ;;  %v9272_v18 = vmax.f32 %v3182_v63, 0.0  ;;  %v3199_v63 = vmax.f32 %v3187_v9, 0.0 }
 0x23e   :  { %3998 = vrot.lane.b32.xlu0 %v3270_v38, %s7981_s4  ;;  %vm9254_vm1 = vcmp.gt.f32.partialorder %v3198_v59, %v3248_v2  ;;  %v9258_v41 = vpop.f32.mrb[26].mxu1  ;;  %v3193_v38 = vmax.f32 %v3181_v25, 0.0  ;;  %v1865_v25 = vadd.f32 %v1853_v45, %v8905_v14 }
 0x23f   :  { %v10795_v60 = vsel %vm9254_vm1, 4294967295, %v10794_v60  ;;  %v1907_v8 = vpop.permute.xlu0 %1906  ;;  %v3271_v29 = vsel %vm9254_vm1, %v3198_v59, %v3248_v2  ;;  %v9262_v10 = vpop.f32.mrb[27].mxu1  ;;  %v1863_v59 = vadd.f32 %v1851_v0, %v8916_v13  ;;  %v1854_v2 = vmul.f32 %v9087_v5, %v8897_v33 }
 0x240   :  { %10796 = vst [vmem:[#allocation23_spill] sm:$0xff] %v10795_v60  ;;  %4000 = vrot.lane.b32.xlu1 %v3271_v29, %s7981_s4  ;;  %v9268_v4 = vpop.permute.xlu1 %1908  ;;  %v1874_v29 = vmax.f32 %v1862_v54, 0.0  ;;  %v9289_v5 = vmax.f32 %v3188_v20, 0.0 }
 0x241   :  { %10797 = vst [vmem:[#allocation24_spill] sm:$0xff] %v9268_v4  ;;  %v1922_v22 = vsel %vm10684_vm5, %v1907_v8, %v9268_v4  ;;  %v9291_v60 = vmax.f32 %v1863_v59, 0.0  ;;  %v1866_v54 = vadd.f32 %v1854_v2, %v8916_v13  ;;  %v1857_v8 = vmul.f32 %v9127_v48, %v8897_v33 }
 0x242   :  { %3234 = vrot.lane.b32.xlu0 %v3193_v38, %s7981_s4  ;;  %vm9297_vm2 = vcmp.gt.f32.partialorder %v1874_v29, %v1922_v22  ;;  %v1877_v59 = vmax.f32 %v1865_v25, 0.0  ;;  %v1868_v2 = vadd.f32 %v1856_v6, %v8905_v14  ;;  %v1859_v48 = vmul.f32 %v9131_v46, %v8891_v43 }
 0x243   :  { %v1911_v49 = vpop.permute.xlu0 %1910  ;;  %10799 = vst [vmem:[#allocation26_spill] sm:$0xff] %v9291_v60  ;;  %v10801_v51 = vsel %vm9297_vm2, 4294967295, %v10800_v51  ;;  %vm10671_vm3 = vcmp.gt.f32.partialorder %v9291_v60, %v9268_v4  ;;  %v1942_v36 = vsel %vm9297_vm2, %v1874_v29, %v1922_v22  ;;  %v9318_v35 = vmax.f32 %v1866_v54, 0.0 }
 0x244   :  { %3236 = vrot.lane.b32.xlu1 %v9272_v18, %s7981_s4  ;;  %v9285_v50 = vpop.permute.xlu1 %1912  ;;  %v9287_v0 = vpop.f32.mrb[28].mxu1  ;;  %10802 = vst [vmem:[#allocation27_spill] sm:$0xff] %v10801_v51  ;;  %v1860_v25 = vmul.f32 %v9142_v21, %v8897_v33  ;;  %v10805_v43 = vmov 0  ;;  %v1943_v22 = vsel %vm10671_vm3, %v9291_v60, %v9268_v4  ;;  %v1880_v6 = vmax.f32 %v1868_v2, 0.0  ;;  %v7612_v4 = vld [vmem:[#allocation5 + $0x114] ss:$8 sps:$4 sm:$0xff]  }
 0x245   :  { %10798 = vst [vmem:[#allocation25_spill] sm:$0xff] %v9285_v50  ;;  %v3866_v38 = vpop.f32.mrb[29].mxu1  ;;  %v1923_v20 = vsel %vm10684_vm5, %v1911_v49, %v9285_v50  ;;  %10804 = vst [vmem:[#allocation29_spill] sm:$0xff] %v9318_v35  ;;  %v1869_v49 = vadd.f32 %v1857_v8, %v8916_v13  ;;  %v1871_v54 = vadd.f32 %v1859_v48, %v8905_v14  ;;  %v10810_v14 = vmov 0 }
 0x246   :  { %3242 = vrot.lane.b32.xlu0 %v3199_v63, %s7981_s4  ;;  %v9301_v45 = vpop.f32.mrb[30].mxu1  ;;  %vm9324_vm0 = vcmp.gt.f32.partialorder %v1877_v59, %v1923_v20  ;;  %vm10674_vm14 = vcmp.gt.f32.partialorder %v9318_v35, %v9285_v50 }
 0x247   :  { %v1915_v9 = vpop.permute.xlu0 %1914  ;;  %v9303_v40 = vpop.f32.mrb[31].mxu1  ;;  %v10806_v43 = vsel %vm9324_vm0, 4294967295, %v10805_v43  ;;  %v9347_v51 = vmax.f32 %v1869_v49, 0.0 }
 0x248   :  { %3244 = vrot.lane.b32.xlu1 %v9289_v5, %s7981_s4  ;;  %v9312_v63 = vpop.permute.xlu1 %1916  ;;  %10807 = vst [vmem:[#allocation30_spill] sm:$0xff] %v10806_v43 }
 0x249   :  { %10803 = vst [vmem:[#allocation28_spill] sm:$0xff] %v9312_v63  ;;  %v1924_v29 = vsel %vm10684_vm5, %v1915_v9, %v9312_v63  ;;  %10809 = vst [vmem:[#allocation32_spill] sm:$0xff] %v9347_v51  ;;  %v1872_v9 = vadd.f32 %v1860_v25, %v8916_v13  ;;  %v1883_v13 = vmax.f32 %v1871_v54, 0.0  ;;  %vm10676_vm12 = vcmp.gt.f32.partialorder %v9347_v51, %v9312_v63 }
 0x24a   :  { %1994 = vrot.lane.b32.xlu0 %v1942_v36, %s7981_s4  ;;  %v1944_v36 = vsel %vm9324_vm0, %v1877_v59, %v1923_v20  ;;  %vm9351_vm3 = vcmp.gt.f32.partialorder %v1880_v6, %v1924_v29  ;;  %v1945_v20 = vsel %vm10674_vm14, %v9318_v35, %v9285_v50  ;;  %v3935_v54 = vmul.f32 %v9248_v28, %v9032_v39  ;;  %v7606_v50 = vld [vmem:[#allocation5 + $0xf4] ss:$8 sps:$4 sm:$0xff]  }
 0x24b   :  { %v1919_v46 = vpop.permute.xlu0 %1918  ;;  %v10811_v14 = vsel %vm9351_vm3, 4294967295, %v10810_v14  ;;  %v1946_v49 = vsel %vm9351_vm3, %v1880_v6, %v1924_v29  ;;  %v9371_v25 = vmax.f32 %v1872_v9, 0.0 }
 0x24c   :  { %1996 = vrot.lane.b32.xlu1 %v1943_v22, %s7981_s4  ;;  %v9337_v33 = vpop.permute.xlu1 %1920  ;;  %v9341_v21 = vpop.f32.mrb[32].mxu1  ;;  %10812 = vst [vmem:[#allocation33_spill] sm:$0xff] %v10811_v14  ;;  %v10814_v22 = vmov 0  ;;  %v3947_v9 = vadd.f32 %v3935_v54, %v9043_v57  ;;  %v7600_v14 = vld [vmem:[#allocation5 + $0xd4] ss:$8 sps:$4 sm:$0xff]  }
 0x24d   :  { %10808 = vst [vmem:[#allocation31_spill] sm:$0xff] %v9337_v33  ;;  %v9345_v8 = vpop.f32.mrb[33].mxu1  ;;  %v1925_v48 = vsel %vm10684_vm5, %v1919_v46, %v9337_v33  ;;  %10813 = vst [vmem:[#allocation34_spill] sm:$0xff] %v9371_v25  ;;  %v1947_v46 = vsel %vm10676_vm12, %v9347_v51, %v9312_v63  ;;  %vm10675_vm14 = vcmp.gt.f32.partialorder %v9371_v25, %v9337_v33 }
 0x24e   :  { %1998 = vrot.lane.b32.xlu0 %v1944_v36, %s7981_s4  ;;  %v9355_v2 = vpop.f32.mrb[34].mxu1  ;;  %vm9374_vm10 = vcmp.gt.f32.partialorder %v1883_v13, %v1925_v48  ;;  %v1949_v6 = vsel %vm10675_vm14, %v9371_v25, %v9337_v33  ;;  %v3934_v36 = vmul.f32 %v9237_v26, %v9028_v24 }
 0x24f   :  { %v9362_v59 = vpop.f32.mrb[35].mxu1  ;;  %v10815_v22 = vsel %vm9374_vm10, 4294967295, %v10814_v22  ;;  %v1948_v29 = vsel %vm9374_vm10, %v1883_v13, %v1925_v48  ;;  %v9401_v48 = vmax.f32 %v3947_v9, 0.0  ;;  %v3941_v13 = vmul.f32 %v3866_v38, %v9032_v39 }
 0x250   :  { %2000 = vrot.lane.b32.xlu1 %v1945_v20, %s7981_s4  ;;  %10816 = vst [vmem:[#allocation35_spill] sm:$0xff] %v10815_v22  ;;  %v3946_v20 = vadd.f32 %v3934_v36, %v9039_v1  ;;  %v10819_v38 = vmov 0  ;;  %v3154_v36 = vmul.f32 %v9195_v12, %v9122_v23  ;;  %vm5107_vm10 = vcmask 1046532  }
 0x251   :  { %10817 = vst [vmem:[#allocation36_spill] sm:$0xff] %v9401_v48 }
 0x252   :  { %2002 = vrot.lane.b32.xlu0 %v1946_v49, %s7981_s4  ;;  %v3958_v49 = vmax.f32 %v3946_v20, 0.0 }
 0x254   :  { %2004 = vrot.lane.b32.xlu1 %v1947_v46, %s7981_s4  ;;  %v3940_v46 = vmul.f32 %v9287_v0, %v9028_v24  ;;  %v3953_v0 = vadd.f32 %v3941_v13, %v9043_v57  ;;  %v3183_v13 = vadd.f32 %v9199_v30, %v3154_v36  ;;  %v1852_v36 = vmul.f32 %v9171_v17, %v9051_v19 }
 0x256   :  { %2006 = vrot.lane.b32.xlu0 %v1948_v29, %s7981_s4  ;;  %v3952_v9 = vadd.f32 %v3940_v46, %v9039_v1 }
 0x258   :  { %2008 = vrot.lane.b32.xlu1 %v1949_v6, %s7981_s4  ;;  %v3964_v22 = vmax.f32 %v3952_v9, 0.0 }
 0x2a8   :  { %v3991_v29 = vpop.permute.xlu0 %3990 }
 0x2aa   :  { %v9406_v6 = vpop.permute.xlu1 %3992 }
 0x2ab   :  { %10818 = vst [vmem:[#allocation37_spill] sm:$0xff] %v9406_v6  ;;  %vm10679_vm14 = vcmp.gt.f32.partialorder %v9401_v48, %v9406_v6  ;;  %v4006_v26 = vsel %vm10684_vm5, %v3991_v29, %v9406_v6  ;;  %v9429_v29 = vmax.f32 %v3953_v0, 0.0 }
 0x2ac   :  { %v4027_v28 = vsel %vm10679_vm14, %v9401_v48, %v9406_v6  ;;  %vm9417_vm12 = vcmp.gt.f32.partialorder %v3958_v49, %v4006_v26  ;;  %v3160_v6 = vmul.f32 %v9103_v44, %v9195_v12  ;;  %v10824_v44 = vmov 0 }
 0x2ad   :  { %v10820_v38 = vsel %vm9417_vm12, 4294967295, %v10819_v38  ;;  %4080 = vrot.lane.b32.xlu1 %v4027_v28, %s7981_s4  ;;  %v4026_v54 = vsel %vm9417_vm12, %v3958_v49, %v4006_v26  ;;  %10822 = vst [vmem:[#allocation39_spill] sm:$0xff] %v9429_v29 }
 0x2ae   :  { %10821 = vst [vmem:[#allocation38_spill] sm:$0xff] %v10820_v38  ;;  %4078 = vrot.lane.b32.xlu0 %v4026_v54, %s7981_s4  ;;  %v3189_v0 = vadd.f32 %v9199_v30, %v3160_v6  ;;  %v3195_v54 = vmax.f32 %v3183_v13, 0.0  ;;  %v1864_v13 = vadd.f32 %v1852_v36, %v9061_v56  ;;  %v10832_v36 = vmov 0 }
 0x2b0   :  { %v3999_v20 = vpop.permute.xlu0 %3998  ;;  %v3201_v6 = vmax.f32 %v3189_v0, 0.0 }
 0x2b2   :  { %v9434_v28 = vpop.permute.xlu1 %4000 }
 0x2b3   :  { %10823 = vst [vmem:[#allocation40_spill] sm:$0xff] %v9434_v28  ;;  %vm10681_vm14 = vcmp.gt.f32.partialorder %v9429_v29, %v9434_v28  ;;  %v4008_v23 = vsel %vm10684_vm5, %v3999_v20, %v9434_v28 }
 0x2b4   :  { %v9440_v49 = vpop.permute.xlu0 %3234  ;;  %v4031_v46 = vsel %vm10681_vm14, %v9429_v29, %v9434_v28  ;;  %vm9447_vm8 = vcmp.gt.f32.partialorder %v3964_v22, %v4008_v23 }
 0x2b5   :  { %v10825_v44 = vsel %vm9447_vm8, 4294967295, %v10824_v44  ;;  %4088 = vrot.lane.b32.xlu1 %v4031_v46, %s7981_s4  ;;  %v4030_v26 = vsel %vm9447_vm8, %v3964_v22, %v4008_v23  ;;  %vm10685_vm14 = vcmp.gt.f32.partialorder %v9272_v18, %v9440_v49  ;;  %v1855_v23 = vmul.f32 %v9182_v55, %v9051_v19 }
 0x2b6   :  { %10826 = vst [vmem:[#allocation41_spill] sm:$0xff] %v10825_v44  ;;  %v3237_v9 = vpop.permute.xlu1 %3236  ;;  %4086 = vrot.lane.b32.xlu0 %v4030_v26, %s7981_s4  ;;  %v3268_v17 = vsel %vm10685_vm14, %v9272_v18, %v9440_v49  ;;  %vm10830_vm14 = vcmask 523264   ;;  %v7597_v44 = vld [vmem:[#allocation5 + $0xc4] ss:$8 sps:$4 sm:$0xff]  }
 0x2b7   :  { %v3247_v20 = vsel %vm10684_vm5, %v9440_v49, %v3237_v9  ;;  %v1858_v9 = vmul.f32 %v9166_v16, %v9051_v19  ;;  %v1867_v16 = vadd.f32 %v1855_v23, %v9061_v56  ;;  %4403 = vmatprep.subr.bf16.mxu0 %v7597_v44  ;;  %5360 = vmatprep.subr.bf16.mxu1 %v7597_v44 }
 0x2b8   :  { %v9462_v28 = vpop.permute.xlu0 %3242  ;;  %vm9464_vm6 = vcmp.gt.f32.partialorder %v3195_v54, %v3247_v20 }
 0x2b9   :  { %10827 = vst [vmem:[#allocation42_spill] sm:$0xff] %v9462_v28  ;;  %v3269_v22 = vsel %vm9464_vm6, %v3195_v54, %v3247_v20  ;;  %vm10689_vm5 = vcmp.gt.f32.partialorder %v9289_v5, %v9462_v28  ;;  %v1870_v38 = vadd.f32 %v1858_v9, %v9061_v56 }
 0x2ba   :  { %v3245_v26 = vpop.permute.xlu1 %3244  ;;  %3994 = vrot.lane.b32.xlu0 %v3268_v17, %s7981_s4  ;;  %3996 = vrot.lane.b32.xlu1 %v3269_v22, %s7981_s4  ;;  %v3272_v55 = vsel %vm10689_vm5, %v9289_v5, %v9462_v28  ;;  %v1876_v17 = vmax.f32 %v1864_v13, 0.0  ;;  %vm10835_vm5 = vcmask 523264   ;;  %v10836_v13 = vmov 0 }
 0x2bb   :  { %v3249_v54 = vsel %vm10830_vm14, %v9462_v28, %v3245_v26  ;;  %v7595_v26 = vld [vmem:[#allocation5 + $0xc0] ss:$8 sps:$4 sm:$0xff]   ;;  %v7610_v28 = vld [vmem:[#allocation5 + $0x110] ss:$8 sps:$4 sm:$0xff]  }
 0x2bc   :  { %v9486_v0 = vpop.permute.xlu0 %1994  ;;  %vm9488_vm8 = vcmp.gt.f32.partialorder %v3201_v6, %v3249_v54  ;;  %4404 = vmatpush1.bf16.msra.mxu0 %v7595_v26  ;;  %5361 = vmatpush1.bf16.msra.mxu1 %v7595_v26 }
 0x2bd   :  { %10831 = vst [vmem:[#allocation43_spill] sm:$0xff] %v9486_v0  ;;  %v10833_v36 = vsel %vm9488_vm8, 4294967295, %v10832_v36  ;;  %v3273_v20 = vsel %vm9488_vm8, %v3201_v6, %v3249_v54  ;;  %vm10693_vm14 = vcmp.gt.f32.partialorder %v9291_v60, %v9486_v0  ;;  %v1861_v6 = vmul.f32 %v9176_v3, %v9051_v19  ;;  %v7598_v19 = vld [vmem:[#allocation5 + $0xd0] ss:$8 sps:$4 sm:$0xff]   ;;  %4405 = vmatprep.subr.bf16.mxu0 %v7600_v14 }
 0x2be   :  { %10834 = vst [vmem:[#allocation44_spill] sm:$0xff] %v10833_v36  ;;  %v1997_v22 = vpop.permute.xlu1 %1996  ;;  %4002 = vrot.lane.b32.xlu0 %v3272_v55, %s7981_s4  ;;  %4004 = vrot.lane.b32.xlu1 %v3273_v20, %s7981_s4  ;;  %v9520_v9 = vsel %vm10693_vm14, %v9291_v60, %v9486_v0  ;;  %v1879_v3 = vmax.f32 %v1867_v16, 0.0  ;;  %v7603_v20 = vld [vmem:[#allocation5 + $0xe4] ss:$8 sps:$4 sm:$0xff]   ;;  %vm10840_vm14 = vcmask 523264   ;;  %v10841_v16 = vmov 0 }
 0x2bf   :  { %v2010_v33 = vsel %vm10835_vm5, %v9486_v0, %v1997_v22  ;;  %5362 = vmatprep.subr.bf16.mxu1 %v7600_v14  ;;  %v1882_v22 = vmax.f32 %v1870_v38, 0.0 }
 0x2c0   :  { %vm9509_vm12 = vcmp.gt.f32.partialorder %v1876_v17, %v2010_v33  ;;  %v9513_v23 = vpop.permute.xlu0 %1998  ;;  %4406 = vmatpush1.bf16.msra.mxu0 %v7598_v19  ;;  %5363 = vmatpush1.bf16.msra.mxu1 %v7598_v19 }
 0x2c1   :  { %v10837_v13 = vsel %vm9509_vm12, 4294967295, %v10836_v13  ;;  %10839 = vst [vmem:[#allocation46_spill] sm:$0xff] %v9513_v23  ;;  %v9524_v54 = vsel %vm9509_vm12, %v1876_v17, %v2010_v33  ;;  %vm10702_vm5 = vcmp.gt.f32.partialorder %v9318_v35, %v9513_v23  ;;  %v1873_v33 = vadd.f32 %v1861_v6, %v9061_v56  ;;  %4407 = vmatprep.subr.bf16.mxu0 %v7603_v20 }
 0x2c2   :  { %10838 = vst [vmem:[#allocation45_spill] sm:$0xff] %v10837_v13  ;;  %v6830_v55 = vpack.c.bf16 %v9524_v54, %v9520_v9  ;;  %v2001_v44 = vpop.permute.xlu1 %2000  ;;  %v2032_v14 = vsel %vm10702_vm5, %v9318_v35, %v9513_v23  ;;  %5364 = vmatprep.subr.bf16.mxu1 %v7603_v20  ;;  %vm10845_vm5 = vcmask 523264  }
 0x2c3   :  { %v2011_v13 = vsel %vm10840_vm14, %v9513_v23, %v2001_v44  ;;  %v7601_v44 = vld [vmem:[#allocation5 + $0xe0] ss:$8 sps:$4 sm:$0xff]   ;;  %vm5106_vm14 = vcmask 1042432  }
 0x2c4   :  { %v4629_v17 = vshrl.u32 %v6830_v55, 16  ;;  %v4632_v0 = vshll.u32 %v6830_v55, 16  ;;  %vm9533_vm12 = vcmp.gt.f32.partialorder %v1879_v3, %v2011_v13  ;;  %v9537_v26 = vpop.permute.xlu0 %2002  ;;  %vm9557_vm0 = vmor %vm5106_vm14, %vm5107_vm10  ;;  %4408 = vmatpush1.bf16.msra.mxu0 %v7601_v44  ;;  %5365 = vmatpush1.bf16.msra.mxu1 %v7601_v44 }
 0x2c5   :  { %v10842_v16 = vsel %vm9533_vm12, 4294967295, %v10841_v16  ;;  %10844 = vst [vmem:[#allocation48_spill] sm:$0xff] %v9537_v26  ;;  %v2033_v38 = vsel %vm9533_vm12, %v1879_v3, %v2011_v13  ;;  %vm10722_vm3 = vcmp.gt.f32.partialorder %v9347_v51, %v9537_v26  ;;  %v10846_v13 = vmov 0  ;;  %4409 = vmatprep.subr.bf16.mxu0 %v7606_v50  ;;  %5366 = vmatprep.subr.bf16.mxu1 %v7606_v50 }
 0x2c6   :  { %10843 = vst [vmem:[#allocation47_spill] sm:$0xff] %v10842_v16  ;;  %v6831_v56 = vpack.c.bf16 %v2033_v38, %v2032_v14  ;;  %v2005_v6 = vpop.permute.xlu1 %2004  ;;  %v4631_v63 = vrot.slane %v4629_v17, 4  ;;  %v4634_v43 = vrot.slane %v4632_v0, 5  ;;  %v1885_v17 = vmax.f32 %v1873_v33, 0.0  ;;  %v7654_v14 = vld [vmem:[#allocation5 + $0x74] ss:$8 sps:$4 sm:$0xff]  }
 0x2c7   :  { %v2012_v23 = vsel %vm10845_vm5, %v9537_v26, %v2005_v6  ;;  %v9566_v20 = vsel %vm10722_vm3, %v9347_v51, %v9537_v26  ;;  %v7609_v26 = vld [vmem:[#allocation5 + $0x104] ss:$8 sps:$4 sm:$0xff]   ;;  %v10852_v51 = vmov 0 }
 0x2c8   :  { %v4638_v16 = vshll.u32 %v6831_v56, 16  ;;  %vm9550_vm12 = vcmp.gt.f32.partialorder %v1882_v22, %v2012_v23  ;;  %v9554_v19 = vpop.permute.xlu0 %2006  ;;  %v4635_v3 = vor.u32 %v4634_v43, %v4631_v63  ;;  %v5111_v0 = vrot.slane %v6831_v56, 5  ;;  %v7604_v63 = vld [vmem:[#allocation5 + $0xf0] ss:$8 sps:$4 sm:$0xff]  }
 0x2c9   :  { %v10847_v13 = vsel %vm9550_vm12, 4294967295, %v10846_v13  ;;  %10849 = vst [vmem:[#allocation50_spill] sm:$0xff] %v9554_v19  ;;  %v9570_v38 = vsel %vm9550_vm12, %v1882_v22, %v2012_v23  ;;  %v6738_v43 = vrot.slane %v6830_v55, 9  ;;  %vm10721_vm10 = vcmp.gt.f32.partialorder %v9371_v25, %v9554_v19  ;;  %4410 = vmatpush1.bf16.msra.mxu0 %v7604_v63  ;;  %5367 = vmatpush1.bf16.msra.mxu1 %v7604_v63 }
 0x2ca   :  { %10848 = vst [vmem:[#allocation49_spill] sm:$0xff] %v10847_v13  ;;  %v6832_v6 = vpack.c.bf16 %v9570_v38, %v9566_v20  ;;  %v2009_v33 = vpop.permute.xlu1 %2008  ;;  %v4636_v56 = vrot.slane %v4635_v3, 4  ;;  %v4640_v35 = vrot.slane %v4638_v16, 5  ;;  %v2036_v50 = vsel %vm10721_vm10, %v9371_v25, %v9554_v19  ;;  %4411 = vmatprep.subr.bf16.mxu0 %v7609_v26  ;;  %5368 = vmatprep.subr.bf16.mxu1 %v7609_v26 }
 0x2cb   :  { %v2013_v23 = vsel %vm10845_vm5, %v9554_v19, %v2009_v33  ;;  %v9582_v55 = vsel %vm9557_vm0, %v6738_v43, %v5111_v0  ;;  %v7607_v0 = vld [vmem:[#allocation5 + $0x100] ss:$8 sps:$4 sm:$0xff]   ;;  %vm10856_vm10 = vcmask 523264  }
 0x2cc   :  { %v4643_v44 = vshrl.u32 %v6832_v6, 16  ;;  %v4646_v13 = vshll.u32 %v6832_v6, 16  ;;  %vm9584_vm14 = vcmp.gt.f32.partialorder %v1885_v17, %v2013_v23  ;;  %v9590_v16 = vsel %vm8325_vm4, %v4636_v56, %v4640_v35 }
 0x2cd   :  { %v10853_v51 = vsel %vm9584_vm14, 4294967295, %v10852_v51  ;;  %v2037_v3 = vsel %vm9584_vm14, %v1885_v17, %v2013_v23  ;;  %v6739_v60 = vrot.slane %v6832_v6, 9  ;;  %4412 = vmatpush1.bf16.msra.mxu0 %v7607_v0  ;;  %5369 = vmatpush1.bf16.msra.mxu1 %v7607_v0  ;;  %v7615_v17 = vld [vmem:[#allocation5 + $0x124] ss:$8 sps:$4 sm:$0xff]   ;;  %v7630_v0 = vld [vmem:[#allocation5 + $0x174] ss:$8 sps:$4 sm:$0xff]  }
 0x2ce   :  { %10854 = vst [vmem:[#allocation51_spill] sm:$0xff] %v10853_v51  ;;  %v6833_v43 = vpack.c.bf16 %v2037_v3, %v2036_v50  ;;  %v4645_v33 = vrot.slane %v4643_v44, 4  ;;  %v4648_v22 = vrot.slane %v4646_v13, 5  ;;  %4413 = vmatprep.subr.bf16.mxu0 %v7612_v4  ;;  %5370 = vmatprep.subr.bf16.mxu1 %v7612_v4  ;;  %v7621_v44 = vld [vmem:[#allocation5 + $0x144] ss:$8 sps:$4 sm:$0xff]  }
 0x2cf   :  { %v7622_v50 = vld [vmem:[#allocation5 + $0x150] ss:$8 sps:$4 sm:$0xff]   ;;  %v7625_v3 = vld [vmem:[#allocation5 + $0x160] ss:$8 sps:$4 sm:$0xff]  }
 0x2d0   :  { %v4652_v35 = vshll.u32 %v6833_v43, 16  ;;  %v4649_v56 = vor.u32 %v4648_v22, %v4645_v33  ;;  %v5115_v36 = vrot.slane %v6833_v43, 5  ;;  %v7613_v22 = vld [vmem:[#allocation5 + $0x120] ss:$8 sps:$4 sm:$0xff]   ;;  %v7628_v43 = vld [vmem:[#allocation5 + $0x170] ss:$8 sps:$4 sm:$0xff]   ;;  %v3936_v33 = vmul.f32 %v9345_v8, %v9195_v12 }
 0x2d1   :  { %4414 = vmatpush1.bf16.msra.mxu0 %v7610_v28  ;;  %5371 = vmatpush1.bf16.msra.mxu1 %v7610_v28  ;;  %v7627_v28 = vld [vmem:[#allocation5 + $0x164] ss:$8 sps:$4 sm:$0xff]  }
 0x2d2   :  { %v4650_v19 = vrot.slane %v4649_v56, 4  ;;  %v4654_v25 = vrot.slane %v4652_v35, 5  ;;  %v9601_v63 = vsel %vm9557_vm0, %v6739_v60, %v5115_v36  ;;  %4415 = vmatprep.subr.bf16.mxu0 %v7615_v17  ;;  %v7618_v60 = vld [vmem:[#allocation5 + $0x134] ss:$8 sps:$4 sm:$0xff]   ;;  %5372 = vmatprep.subr.bf16.mxu1 %v7615_v17  ;;  %v7616_v36 = vld [vmem:[#allocation5 + $0x130] ss:$8 sps:$4 sm:$0xff]   ;;  %v3948_v35 = vadd.f32 %v3936_v33, %v9199_v30 }
 0x2d3   :  { %v3942_v17 = vmul.f32 %v9341_v21, %v9195_v12 }
 0x2d4   :  { %v9609_v6 = vsel %vm8325_vm4, %v4650_v19, %v4654_v25  ;;  %v7619_v25 = vld [vmem:[#allocation5 + $0x140] ss:$8 sps:$4 sm:$0xff]   ;;  %v7624_v19 = vld [vmem:[#allocation5 + $0x154] ss:$8 sps:$4 sm:$0xff]  }
 0x2d5   :  { %v6680_v23 = vcombine.low %v9590_v16, %v9609_v6  ;;  %4416 = vmatpush1.bf16.msra.mxu0 %v7613_v22  ;;  %5373 = vmatpush1.bf16.msra.mxu1 %v7613_v22  ;;  %v3960_v22 = vmax.f32 %v3948_v35, 0.0 }
 0x2d6   :  { %4417 = vmatprep.subr.bf16.mxu0 %v7618_v60  ;;  %5374 = vmatprep.subr.bf16.mxu1 %v7618_v60 }
 0x2d9   :  { %4418 = vmatpush1.bf16.msra.mxu0 %v7616_v36  ;;  %5375 = vmatpush1.bf16.msra.mxu1 %v7616_v36 }
 0x2da   :  { %4419 = vmatprep.subr.bf16.mxu0 %v7621_v44  ;;  %5376 = vmatprep.subr.bf16.mxu1 %v7621_v44  ;;  %v7633_v44 = vld [vmem:[#allocation5 + $0x4] ss:$8 sps:$4 sm:$0xff]  }
 0x2dd   :  { %4420 = vmatpush1.bf16.msra.mxu0 %v7619_v25  ;;  %5377 = vmatpush1.bf16.msra.mxu1 %v7619_v25  ;;  %v10857_v25 = vmov 0 }
 0x2de   :  { %4421 = vmatprep.subr.bf16.mxu0 %v7624_v19  ;;  %5378 = vmatprep.subr.bf16.mxu1 %v7624_v19  ;;  %v3954_v19 = vadd.f32 %v3942_v17, %v9199_v30  ;;  %v3943_v17 = vmul.f32 %v9301_v45, %v9028_v24 }
 0x2e1   :  { %4422 = vmatpush1.bf16.msra.mxu0 %v7622_v50  ;;  %5379 = vmatpush1.bf16.msra.mxu1 %v7622_v50 }
 0x2e2   :  { %4423 = vmatprep.subr.bf16.mxu0 %v7627_v28  ;;  %5380 = vmatprep.subr.bf16.mxu1 %v7627_v28  ;;  %v3937_v28 = vmul.f32 %v9258_v41, %v9028_v24  ;;  %v10862_v41 = vmov 0 }
 0x2e5   :  { %4424 = vmatpush1.bf16.msra.mxu0 %v7625_v3  ;;  %5381 = vmatpush1.bf16.msra.mxu1 %v7625_v3 }
 0x2e6   :  { %4425 = vmatprep.subr.bf16.mxu0 %v7630_v0  ;;  %5382 = vmatprep.subr.bf16.mxu1 %v7630_v0  ;;  %v3938_v0 = vmul.f32 %v9262_v10, %v9032_v39  ;;  %v3949_v10 = vadd.f32 %v3937_v28, %v9039_v1 }
 0x2e8   :  { %v3961_v45 = vmax.f32 %v3949_v10, 0.0  ;;  %v10876_v10 = vpack.c.bf16 %v9570_v38, %v9524_v54 }
 0x2e9   :  { %4426 = vmatpush1.bf16.msra.mxu0 %v7628_v43  ;;  %5383 = vmatpush1.bf16.msra.mxu1 %v7628_v43  ;;  %v3966_v43 = vmax.f32 %v3954_v19, 0.0  ;;  %v3944_v19 = vmul.f32 %v9303_v40, %v9032_v39 }
 0x2ea   :  { %4577 = vmatprep.subr.bf16.mxu0 %v7633_v44  ;;  %5403 = vmatprep.subr.bf16.mxu1 %v7633_v44  ;;  %v3950_v44 = vadd.f32 %v3938_v0, %v9043_v57 }
 0x2eb   :  { %v3956_v39 = vadd.f32 %v3944_v19, %v9043_v57  ;;  %v7636_v19 = vld [vmem:[#allocation5 + $0x14] ss:$8 sps:$4 sm:$0xff]  }
 0x2ec   :  { %v9676_v28 = vmax.f32 %v3950_v44, 0.0 }
 0x2ee   :  { %10866 = vst [vmem:[#allocation57_spill] sm:$0xff] %v9676_v28 }
 0x31f   :  { %v4081_v56 = vpop.permute.xlu1 %4080 }
 0x320   :  { %v9620_v60 = vpop.permute.xlu0 %4078 }
 0x321   :  { %10855 = vst [vmem:[#allocation52_spill] sm:$0xff] %v9620_v60  ;;  %vm10723_vm5 = vcmp.gt.f32.partialorder %v9401_v48, %v9620_v60  ;;  %v4094_v36 = vsel %vm10856_vm10, %v9620_v60, %v4081_v56 }
 0x322   :  { %v4114_v8 = vsel %vm10723_vm5, %v9401_v48, %v9620_v60  ;;  %vm9631_vm3 = vcmp.gt.f32.partialorder %v3960_v22, %v4094_v36  ;;  %vm10861_vm5 = vcmask 523264   ;;  %v10062_v48 = vld [vmem:[#allocation5 + $0x354] ss:$8 sps:$4 sm:$0xff]  }
 0x323   :  { %v10858_v25 = vsel %vm9631_vm3, 4294967295, %v10857_v25  ;;  %v4115_v21 = vsel %vm9631_vm3, %v3960_v22, %v4094_v36 }
 0x324   :  { %10859 = vst [vmem:[#allocation53_spill] sm:$0xff] %v10858_v25  ;;  %v9638_v50 = vpack.c.bf16 %v4115_v21, %v4114_v8  ;;  %v10010_v25 = vld [vmem:[#allocation5 + $0x304] ss:$8 sps:$4 sm:$0xff]  }
 0x327   :  { %v4089_v3 = vpop.permute.xlu1 %4088 }
 0x328   :  { %v9644_v33 = vpop.permute.xlu0 %4086 }
 0x329   :  { %10860 = vst [vmem:[#allocation54_spill] sm:$0xff] %v9644_v33  ;;  %vm10725_vm10 = vcmp.gt.f32.partialorder %v9429_v29, %v9644_v33  ;;  %v4096_v35 = vsel %vm10861_vm5, %v9644_v33, %v4089_v3 }
 0x32a   :  { %v4118_v56 = vsel %vm10725_vm10, %v9429_v29, %v9644_v33  ;;  %vm9655_vm3 = vcmp.gt.f32.partialorder %v3966_v43, %v4096_v35  ;;  %v10043_v29 = vld [vmem:[#allocation5 + $0x320] ss:$8 sps:$4 sm:$0xff]  }
 0x32b   :  { %v10863_v41 = vsel %vm9655_vm3, 4294967295, %v10862_v41  ;;  %v6826_v22 = vpack.c.bf16 %v4118_v56, %v4114_v8  ;;  %v4119_v36 = vsel %vm9655_vm3, %v3966_v43, %v4096_v35  ;;  %v3955_v8 = vadd.f32 %v3943_v17, %v9039_v1 }
 0x32c   :  { %10864 = vst [vmem:[#allocation55_spill] sm:$0xff] %v10863_v41  ;;  %v9667_v3 = vpop.permute.xlu1 %3996  ;;  %v3995_v26 = vpop.permute.xlu0 %3994  ;;  %v6827_v13 = vpack.c.bf16 %v4119_v36, %v4115_v21  ;;  %v9669_v4 = vpack.c.bf16 %v4119_v36, %v4118_v56  ;;  %v10868_v21 = vmov 0  ;;  %v10871_v1 = vcombine.high %v9590_v16, %v9609_v6 }
 0x32d   :  { %10865 = vst [vmem:[#allocation56_spill] sm:$0xff] %v9667_v3  ;;  %4273 = vrot.lane.b32.xlu0 %v6826_v22, %s7981_s4  ;;  %v4007_v24 = vsel %vm10861_vm5, %v3995_v26, %v9667_v3  ;;  %vm10729_vm3 = vcmp.gt.f32.partialorder %v9676_v28, %v9667_v3  ;;  %v3967_v57 = vmax.f32 %v3955_v8, 0.0  ;;  %v9697_v26 = vmax.f32 %v3956_v39, 0.0  ;;  %v7631_v22 = vld [vmem:[#allocation5] ss:$8 sps:$4 sm:$0xff]  }
 0x32e   :  { %4275 = vrot.lane.b32.xlu1 %v6827_v13, %s7981_s4  ;;  %vm9685_vm10 = vcmp.gt.f32.partialorder %v3961_v45, %v4007_v24  ;;  %v4029_v43 = vsel %vm10729_vm3, %v9676_v28, %v9667_v3  ;;  %v10873_v16 = vmov 0  ;;  %v6828_v56 = vpack.c.bf16 %v9566_v20, %v9520_v9  ;;  %v7634_v20 = vld [vmem:[#allocation5 + $0x10] ss:$8 sps:$4 sm:$0xff]   ;;  %v7639_v39 = vld [vmem:[#allocation5 + $0x24] ss:$8 sps:$4 sm:$0xff]  }
 0x32f   :  { %v10869_v21 = vsel %vm9685_vm10, 4294967295, %v10868_v21  ;;  %10872 = vst [vmem:[#allocation60_spill] sm:$0xff] %v9697_v26  ;;  %v3939_v36 = vmul.f32 %v9362_v59, %v9195_v12  ;;  %v3945_v9 = vmul.f32 %v9355_v2, %v9195_v12  ;;  %v4875_v59 = vshll.u32 %v9638_v50, 16  ;;  %v10054_v3 = vld [vmem:[#allocation5 + $0x344] ss:$8 sps:$4 sm:$0xff]  }
 0x330   :  { %v9679_v40 = vpop.permute.xlu1 %4004  ;;  %v4003_v0 = vpop.permute.xlu0 %4002  ;;  %10870 = vst [vmem:[#allocation59_spill] sm:$0xff] %v10869_v21  ;;  %v4886_v2 = vshrl.u32 %v9669_v4, 16 }
 0x331   :  { %10867 = vst [vmem:[#allocation58_spill] sm:$0xff] %v9679_v40  ;;  %4687 = vrot.lane.b32.xlu0 %v6680_v23, %s7981_s4  ;;  %v4009_v13 = vsel %vm10861_vm5, %v4003_v0, %v9679_v40  ;;  %v4028_v23 = vsel %vm9685_vm10, %v3961_v45, %v4007_v24  ;;  %vm10728_vm14 = vcmp.gt.f32.partialorder %v9697_v26, %v9679_v40  ;;  %v4872_v45 = vshrl.u32 %v9638_v50, 16 }
 0x332   :  { %4689 = vrot.lane.b32.xlu1 %v10871_v1, %s7981_s4  ;;  %vm9707_vm5 = vcmp.gt.f32.partialorder %v3967_v57, %v4009_v13  ;;  %v4033_v35 = vsel %vm10728_vm14, %v9697_v26, %v9679_v40  ;;  %vm10877_vm14 = vcmask 523264   ;;  %v3951_v38 = vadd.f32 %v3939_v36, %v9199_v30 }
 0x333   :  { %v10874_v16 = vsel %vm9707_vm5, 4294967295, %v10873_v16  ;;  %v4032_v6 = vsel %vm9707_vm5, %v3967_v57, %v4009_v13  ;;  %vm10878_vm3 = vmmov %vm10877_vm14  ;;  %v3957_v12 = vadd.f32 %v3945_v9, %v9199_v30  ;;  %v4889_v13 = vshll.u32 %v9669_v4, 16  ;;  %v7637_v57 = vld [vmem:[#allocation5 + $0x20] ss:$8 sps:$4 sm:$0xff]   ;;  %v7642_v30 = vld [vmem:[#allocation5 + $0x34] ss:$8 sps:$4 sm:$0xff]  }
 0x334   :  { %10875 = vst [vmem:[#allocation61_spill] sm:$0xff] %v10874_v16  ;;  %vm10881_vm12 = vmmov %vm10878_vm3  ;;  %v4888_v36 = vrot.slane %v4886_v2, 4  ;;  %v10018_v16 = vld [vmem:[#allocation5 + $0x300] ss:$8 sps:$4 sm:$0xff]  }
 0x335   :  { %4082 = vrot.lane.b32.xlu0 %v4028_v23, %s7981_s4  ;;  %v3963_v23 = vmax.f32 %v3951_v38, 0.0  ;;  %v4891_v9 = vrot.slane %v4889_v13, 5  ;;  %v7640_v38 = vld [vmem:[#allocation5 + $0x30] ss:$8 sps:$4 sm:$0xff]   ;;  %v7645_v13 = vld [vmem:[#allocation5 + $0x44] ss:$8 sps:$4 sm:$0xff]  }
 0x336   :  { %4084 = vrot.lane.b32.xlu1 %v4029_v43, %s7981_s4  ;;  %v4874_v43 = vrot.slane %v4872_v45, 4  ;;  %v3969_v45 = vmax.f32 %v3957_v12, 0.0 }
 0x339   :  { %4090 = vrot.lane.b32.xlu0 %v4032_v6, %s7981_s4  ;;  %v4877_v6 = vrot.slane %v4875_v59, 5 }
 0x33a   :  { %4092 = vrot.lane.b32.xlu1 %v4033_v35, %s7981_s4 }
 0x33d   :  { %4448 = vrot.lane.b32.xlu0 %v6828_v56, %s7981_s4 }
 0x33e   :  { %4450 = vrot.lane.b32.xlu1 %v10876_v10, %s7981_s4  ;;  %v10882_v10 = vlaneseq }
 0x39f   :  { %v4274_v17 = vpop.permute.xlu0 %4273 }
 0x3a0   :  { %v4276_v44 = vpop.permute.xlu1 %4275 }
 0x3a1   :  { %6648 = vmatprep.mubr.msk.bf16.mxu0 %vm10877_vm14, %v4276_v44  ;;  %v9734_v24 = vsel %vm10878_vm3, %v4274_v17, %v4276_v44  ;;  %vm10879_vm14 = vmmov %vm10878_vm3  ;;  %v9762_v17 = vand.u32 127, %v10882_v10 }
 0x3a2   :  { %4436 = vmatmul.mubr.bf16.vlgmr.msra.gmra.mrb[20].mxu0 %v9734_v24 }
 0x3a3   :  { %4578 = vmatpush1.bf16.msra.mxu0 %v7631_v22  ;;  %v4688_v54 = vpop.permute.xlu0 %4687  ;;  %10883 = vst [vmem:[#allocation63_spill] sm:$0xff] %v9762_v17 }
 0x3a4   :  { %v9742_v8 = vpop.permute.xlu1 %4689  ;;  %4579 = vmatprep.subr.bf16.mxu0 %v7636_v19 }
 0x3a5   :  { %6767 = vmatprep.mubr.msk.bf16.mxu1 %vm10878_vm3, %v9742_v8  ;;  %v9748_v0 = vsel %vm10879_vm14, %v4688_v54, %v9742_v8 }
 0x3a6   :  { %5393 = vmatmul.mubr.bf16.vlgmr.msra.gmra.mrb[36].mxu1 %v9748_v0 }
 0x3a7   :  { %4580 = vmatpush1.bf16.msra.mxu0 %v7634_v20  ;;  %5404 = vmatpush1.bf16.msra.mxu1 %v7631_v22  ;;  %v9754_v1 = vpop.permute.xlu0 %4082  ;;  %v10884_v22 = vmov 0 }
 0x3a8   :  { %10880 = vst [vmem:[#allocation62_spill] sm:$0xff] %v9754_v1  ;;  %6768 = vmatprep.mubr.msk.bf16.mxu1 %vm10878_vm3, %v4276_v44  ;;  %vm10733_vm14 = vcmp.gt.f32.partialorder %v9676_v28, %v9754_v1  ;;  %v4085_v35 = vpop.permute.xlu1 %4084  ;;  %4581 = vmatprep.subr.bf16.mxu0 %v7639_v39 }
 0x3a9   :  { %v4095_v56 = vsel %vm10881_vm12, %v9754_v1, %v4085_v35  ;;  %5405 = vmatprep.subr.bf16.mxu1 %v7636_v19  ;;  %v4116_v44 = vsel %vm10733_vm14, %v9676_v28, %v9754_v1  ;;  %v4878_v35 = vor.u32 %v4877_v6, %v4874_v43  ;;  %v7643_v6 = vld [vmem:[#allocation5 + $0x40] ss:$8 sps:$4 sm:$0xff]  }
 0x3aa   :  { %vm9764_vm5 = vcmp.gt.f32.partialorder %v3963_v23, %v4095_v56 }
 0x3ab   :  { %v10885_v22 = vsel %vm9764_vm5, 4294967295, %v10884_v22  ;;  %v4117_v54 = vsel %vm9764_vm5, %v3963_v23, %v4095_v56  ;;  %4582 = vmatpush1.bf16.msra.mxu0 %v7637_v57  ;;  %5406 = vmatpush1.bf16.msra.mxu1 %v7634_v20  ;;  %v9775_v19 = vpop.permute.xlu0 %4090  ;;  %v10888_v23 = vmov 0  ;;  %v6771_v20 = vrot.slane %v9638_v50, 9  ;;  %v7648_v50 = vld [vmem:[#allocation5 + $0x54] ss:$8 sps:$4 sm:$0xff]  }
 0x3ac   :  { %10886 = vst [vmem:[#allocation64_spill] sm:$0xff] %v10885_v22  ;;  %10887 = vst [vmem:[#allocation65_spill] sm:$0xff] %v9775_v19  ;;  %v6835_v59 = vpack.c.bf16 %v4117_v54, %v4116_v44  ;;  %vm4112_vm12 = vcmp.gt.f32.partialorder %v9697_v26, %v9775_v19  ;;  %v4093_v2 = vpop.permute.xlu1 %4092  ;;  %4583 = vmatprep.subr.bf16.mxu0 %v7642_v30  ;;  %5407 = vmatprep.subr.bf16.mxu1 %v7639_v39  ;;  %v107_v56 = vadd.s32 128, %v9762_v17 }
 0x3ad   :  { %v4097_v10 = vsel %vm10878_vm3, %v9775_v19, %v4093_v2  ;;  %v4120_v39 = vsel %vm4112_vm12, %v9697_v26, %v9775_v19  ;;  %v4892_v44 = vor.u32 %v4891_v9, %v4888_v36  ;;  %v6772_v36 = vrot.slane %v9669_v4, 9  ;;  %v7696_v19 = vld [vmem:[#allocation5 + $0x214] ss:$8 sps:$4 sm:$0xff]  }
 0x3ae   :  { %v4881_v41 = vshll.u32 %v6835_v59, 16  ;;  %vm9781_vm14 = vcmp.gt.f32.partialorder %v3969_v45, %v4097_v10  ;;  %v5542_v12 = vrot.slane %v6835_v59, 5  ;;  %v4879_v59 = vrot.slane %v4878_v35, 4 }
 0x3af   :  { %v10889_v23 = vsel %vm9781_vm14, 4294967295, %v10888_v23  ;;  %v4121_v43 = vsel %vm9781_vm14, %v3969_v45, %v4097_v10  ;;  %4584 = vmatpush1.bf16.msra.mxu0 %v7640_v38  ;;  %5408 = vmatpush1.bf16.msra.mxu1 %v7637_v57  ;;  %v113_v45 = vshra.s32 %v107_v56, 4  ;;  %v4893_v10 = vrot.slane %v4892_v44, 4 }
 0x3b0   :  { %10890 = vst [vmem:[#allocation66_spill] sm:$0xff] %v10889_v23  ;;  %v6837_v54 = vpack.c.bf16 %v4121_v43, %v4120_v39  ;;  %v9794_v2 = vpop.permute.xlu1 %4450  ;;  %4585 = vmatprep.subr.bf16.mxu0 %v7645_v13  ;;  %5409 = vmatprep.subr.bf16.mxu1 %v7642_v30  ;;  %v4883_v33 = vrot.slane %v4881_v41, 5  ;;  %v5543_v22 = vsel %vm9557_vm0, %v6771_v20, %v5542_v12  ;;  %v7646_v30 = vld [vmem:[#allocation5 + $0x50] ss:$8 sps:$4 sm:$0xff]   ;;  %v7651_v41 = vld [vmem:[#allocation5 + $0x64] ss:$8 sps:$4 sm:$0xff]  }
 0x3b1   :  { %6675 = vmatprep.mubr.msk.bf16.mxu0 %vm10878_vm3, %v9794_v2  ;;  %v108_v12 = vand.u32 15, %v8869_v32  ;;  %v9807_v39 = vadd.s32 8, %v8869_v32  ;;  %v112_v4 = vshra.s32 %v9762_v17, 4  ;;  %v9812_v44 = vmul.u32 2, %v113_v45 }
 0x3b2   :  { %v4895_v23 = vshll.u32 %v6837_v54, 16  ;;  %v4884_v57 = vsel %vm8325_vm4, %v4879_v59, %v4883_v33  ;;  %v5546_v9 = vrot.slane %v6837_v54, 5  ;;  %v10893_v45 = vcombine.low %v9582_v55, %v9601_v63 }
 0x3b3   :  { %4586 = vmatpush1.bf16.msra.mxu0 %v7643_v6  ;;  %5410 = vmatpush1.bf16.msra.mxu1 %v7640_v38  ;;  %10891 = vst [vmem:[#allocation67_spill] sm:$0xff] %v9807_v39  ;;  %v9814_v54 = vmul.u32 96, %v108_v12  ;;  %v109_v59 = vand.u32 15, %v9807_v39 }
 0x3b4   :  { %4587 = vmatprep.subr.bf16.mxu0 %v7648_v50  ;;  %5411 = vmatprep.subr.bf16.mxu1 %v7645_v13  ;;  %v4897_v35 = vrot.slane %v4895_v23, 5  ;;  %v5547_v20 = vsel %vm9557_vm0, %v6772_v36, %v5546_v9  ;;  %v7649_v13 = vld [vmem:[#allocation5 + $0x60] ss:$8 sps:$4 sm:$0xff]   ;;  %v9817_v36 = vmul.u32 2, %v112_v4  ;;  %v10892_v9 = vcombine.high %v9582_v55, %v9601_v63  ;;  %vm10896_vm0 = vmmov %vm10878_vm3 }
 0x3b5   :  { %v6774_v33 = vcombine.high %v5543_v22, %v5547_v20  ;;  %v6773_v56 = vcombine.low %v5543_v22, %v5547_v20  ;;  %v7652_v22 = vld [vmem:[#allocation5 + $0x70] ss:$8 sps:$4 sm:$0xff]   ;;  %v7660_v20 = vld [vmem:[#allocation5 + $0x94] ss:$8 sps:$4 sm:$0xff]  }
 0x3b6   :  { %v4898_v38 = vsel %vm8325_vm4, %v4893_v10, %v4897_v35  ;;  %v110_v10 = vand.u32 15, %v103_v47  ;;  %v7655_v35 = vld [vmem:[#allocation5 + $0x80] ss:$8 sps:$4 sm:$0xff]   ;;  %vm10895_vm4 = vmmov %vm10878_vm3 }
 0x3b7   :  { %4588 = vmatpush1.bf16.msra.mxu0 %v7646_v30  ;;  %5412 = vmatpush1.bf16.msra.mxu1 %v7643_v6  ;;  %v6712_v43 = vcombine.high %v4884_v57, %v4898_v38  ;;  %v6711_v23 = vcombine.low %v4884_v57, %v4898_v38  ;;  %v7657_v6 = vld [vmem:[#allocation5 + $0x84] ss:$8 sps:$4 sm:$0xff]   ;;  %v9826_v57 = vmul.u32 96, %v109_v59  ;;  %vm10901_vm3 = vmmov %vm10896_vm0 }
 0x3b8   :  { %4589 = vmatprep.subr.bf16.mxu0 %v7651_v41  ;;  %5413 = vmatprep.subr.bf16.mxu1 %v7648_v50  ;;  %v9824_v50 = vadd.s32 %v9812_v44, %v9814_v54  ;;  %v9853_v38 = vmul.u32 96, %v110_v10 }
 0x3b9   :  { %4932 = vrot.lane.b32.xlu1 %v6712_v43, %s7981_s4  ;;  %4930 = vrot.lane.b32.xlu0 %v6711_v23, %s7981_s4  ;;  %v9844_v4 = vadd.s32 %v9812_v44, %v9826_v57  ;;  %v9851_v63 = vadd.s32 %v9817_v36, %v9826_v57  ;;  %v7658_v43 = vld [vmem:[#allocation5 + $0x90] ss:$8 sps:$4 sm:$0xff]   ;;  %v7663_v23 = vld [vmem:[#allocation5 + $0xa4] ss:$8 sps:$4 sm:$0xff]  }
 0x3ba   :  { %v1130_v12 = vadd.s32 1, %v9824_v50  ;;  %v1125_v59 = vadd.s32 %v9817_v36, %v9853_v38 }
 0x3bb   :  { %4590 = vmatpush1.bf16.msra.mxu0 %v7649_v13  ;;  %5414 = vmatpush1.bf16.msra.mxu1 %v7646_v30  ;;  %v9838_v30 = vadd.s32 %v9817_v36, %v9814_v54 }
 0x3bc   :  { %4591 = vmatprep.subr.bf16.mxu0 %v7654_v14  ;;  %5415 = vmatprep.subr.bf16.mxu1 %v7651_v41  ;;  %v104_v41 = vadd.s32 24, %v8869_v32  ;;  %v10005_v32 = vld [vmem:[#allocation5 + $0x2f0] ss:$8 sps:$4 sm:$0xff]  }
 0x3bd   :  { %5150 = vrot.lane.b32.xlu1 %v10892_v9, %s7981_s4  ;;  %5148 = vrot.lane.b32.xlu0 %v10893_v45, %s7981_s4  ;;  %v1129_v55 = vadd.s32 1, %v9838_v30  ;;  %v1133_v45 = vadd.s32 1, %v1125_v59 }
 0x3bf   :  { %4592 = vmatpush1.bf16.msra.mxu0 %v7652_v22  ;;  %5416 = vmatpush1.bf16.msra.mxu1 %v7649_v13  ;;  %v111_v13 = vand.u32 15, %v104_v41 }
 0x3c0   :  { %4593 = vmatprep.subr.bf16.mxu0 %v7657_v6  ;;  %5417 = vmatprep.subr.bf16.mxu1 %v7654_v14  ;;  %v1132_v14 = vadd.s32 1, %v9844_v4 }
 0x3c1   :  { %5556 = vrot.lane.b32.xlu1 %v6774_v33, %s7981_s4  ;;  %5554 = vrot.lane.b32.xlu0 %v6773_v56, %s7981_s4  ;;  %v1131_v33 = vadd.s32 1, %v9851_v63  ;;  %v1126_v56 = vadd.s32 %v9812_v44, %v9853_v38  ;;  %v9863_v47 = vmul.u32 96, %v111_v13  ;;  %v4449_v13 = vpop.permute.xlu0 %4448 }
 0x3c3   :  { %4594 = vmatpush1.bf16.msra.mxu0 %v7655_v35  ;;  %5418 = vmatpush1.bf16.msra.mxu1 %v7652_v22  ;;  %10894 = vst [vmem:[#allocation68_spill] sm:$0xff] %v9863_v47  ;;  %v7661_v22 = vld [vmem:[#allocation5 + $0xa0] ss:$8 sps:$4 sm:$0xff]   ;;  %v1134_v9 = vadd.s32 1, %v1126_v56  ;;  %v1128_v10 = vadd.s32 %v9812_v44, %v9863_v47  ;;  %v1127_v41 = vadd.s32 %v9817_v36, %v9863_v47 }
 0x3c4   :  { %4595 = vmatprep.subr.bf16.mxu0 %v7660_v20  ;;  %5419 = vmatprep.subr.bf16.mxu1 %v7657_v6  ;;  %v7666_v6 = vld [vmem:[#allocation5 + $0xb4] ss:$8 sps:$4 sm:$0xff]  }
 0x3c5   :  { %1192 = vrot.lane.b32.xlu1 %v1130_v12, %s7981_s4  ;;  %1190 = vrot.lane.b32.xlu0 %v1129_v55, %s7981_s4  ;;  %v7664_v12 = vld [vmem:[#allocation5 + $0xb0] ss:$8 sps:$4 sm:$0xff]   ;;  %v1135_v55 = vadd.s32 1, %v1127_v41 }
 0x3c7   :  { %4596 = vmatpush1.bf16.msra.mxu0 %v7658_v43  ;;  %5420 = vmatpush1.bf16.msra.mxu1 %v7655_v35  ;;  %v7669_v35 = vld [vmem:[#allocation5 + $0x184] ss:$8 sps:$4 sm:$0xff]  }
 0x3c8   :  { %4597 = vmatprep.subr.bf16.mxu0 %v7663_v23  ;;  %5421 = vmatprep.subr.bf16.mxu1 %v7660_v20  ;;  %v1136_v20 = vadd.s32 1, %v1128_v10 }
 0x3c9   :  { %1196 = vrot.lane.b32.xlu1 %v1132_v14, %s7981_s4  ;;  %1194 = vrot.lane.b32.xlu0 %v1131_v33, %s7981_s4  ;;  %v7667_v14 = vld [vmem:[#allocation5 + $0x180] ss:$8 sps:$4 sm:$0xff]   ;;  %v7672_v33 = vld [vmem:[#allocation5 + $0x194] ss:$8 sps:$4 sm:$0xff]  }
 0x3cb   :  { %4598 = vmatpush1.bf16.msra.mxu0 %v7661_v22  ;;  %5422 = vmatpush1.bf16.msra.mxu1 %v7658_v43  ;;  %v4452_v43 = vsel %vm10895_vm4, %v4449_v13, %v9794_v2  ;;  %v7673_v2 = vld [vmem:[#allocation5 + $0x1a0] ss:$8 sps:$4 sm:$0xff]   ;;  %vm10902_vm4 = vmmov %vm10896_vm0 }
 0x3cc   :  { %4599 = vmatprep.subr.bf16.mxu0 %v7666_v6  ;;  %5423 = vmatprep.subr.bf16.mxu1 %v7663_v23  ;;  %v7670_v23 = vld [vmem:[#allocation5 + $0x190] ss:$8 sps:$4 sm:$0xff]  }
 0x3cd   :  { %1200 = vrot.lane.b32.xlu1 %v1134_v9, %s7981_s4  ;;  %1198 = vrot.lane.b32.xlu0 %v1133_v45, %s7981_s4  ;;  %v7679_v9 = vld [vmem:[#allocation5 + $0x1c0] ss:$8 sps:$4 sm:$0xff]   ;;  %v7684_v45 = vld [vmem:[#allocation5 + $0x1d4] ss:$8 sps:$4 sm:$0xff]  }
 0x3cf   :  { %4600 = vmatpush1.bf16.msra.mxu0 %v7664_v12  ;;  %5424 = vmatpush1.bf16.msra.mxu1 %v7661_v22  ;;  %v7675_v22 = vld [vmem:[#allocation5 + $0x1a4] ss:$8 sps:$4 sm:$0xff]  }
 0x3d0   :  { %4816 = vmatprep.subr.bf16.mxu0 %v7669_v35  ;;  %5425 = vmatprep.subr.bf16.mxu1 %v7666_v6  ;;  %v7678_v6 = vld [vmem:[#allocation5 + $0x1b4] ss:$8 sps:$4 sm:$0xff]  }
 0x3d1   :  { %1204 = vrot.lane.b32.xlu1 %v1136_v20, %s7981_s4  ;;  %1202 = vrot.lane.b32.xlu0 %v1135_v55, %s7981_s4  ;;  %v9915_v20 = vadd.s32 48, %v9853_v38  ;;  %v7682_v55 = vld [vmem:[#allocation5 + $0x1d0] ss:$8 sps:$4 sm:$0xff]  }
 0x3d2   :  { %4610 = vmatmul.mubr.bf16.vlgmr.msra.gmra.mrb[20].mxu0 %v4452_v43  ;;  %v9925_v43 = vadd.s32 48, %v9863_v47  ;;  %v10083_v47 = vld [vmem:[#allocation5 + $0x374] ss:$8 sps:$4 sm:$0xff]  }
 0x3d3   :  { %4817 = vmatpush1.bf16.msra.mxu0 %v7667_v14  ;;  %6706 = vmatprep.mubr.msk.bf16.mxu0 %vm10896_vm0, %v9742_v8  ;;  %v9889_v8 = vadd.s32 48, %v9814_v54  ;;  %10899 = vst [vmem:[#allocation71_spill] sm:$0xff] %v9915_v20 }
 0x3d4   :  { %5426 = vmatpush1.bf16.msra.mxu1 %v7664_v12  ;;  %4818 = vmatprep.subr.bf16.mxu0 %v7672_v33  ;;  %10900 = vst [vmem:[#allocation72_spill] sm:$0xff] %v9925_v43 }
 0x3d5   :  { %1212 = vrot.lane.b32.xlu1 %v9824_v50, %s7981_s4  ;;  %1210 = vrot.lane.b32.xlu0 %v9838_v30, %s7981_s4  ;;  %10897 = vst [vmem:[#allocation69_spill] sm:$0xff] %v9889_v8  ;;  %v7676_v50 = vld [vmem:[#allocation5 + $0x1b0] ss:$8 sps:$4 sm:$0xff]   ;;  %v7681_v30 = vld [vmem:[#allocation5 + $0x1c4] ss:$8 sps:$4 sm:$0xff]  }
 0x3d6   :  { %5446 = vmatprep.subr.bf16.mxu1 %v7669_v35 }
 0x3d7   :  { %5436 = vmatmul.mubr.bf16.vlgmr.msra.gmra.mrb[36].mxu1 %v9734_v24  ;;  %4819 = vmatpush1.bf16.msra.mxu0 %v7670_v23  ;;  %v9892_v24 = vadd.s32 48, %v9826_v57 }
 0x3d8   :  { %4820 = vmatprep.subr.bf16.mxu0 %v7675_v22  ;;  %5447 = vmatpush1.bf16.msra.mxu1 %v7667_v14  ;;  %v7687_v14 = vld [vmem:[#allocation5 + $0x1e4] ss:$8 sps:$4 sm:$0xff]  }
 0x3d9   :  { %1216 = vrot.lane.b32.xlu1 %v9844_v4, %s7981_s4  ;;  %1214 = vrot.lane.b32.xlu0 %v9851_v63, %s7981_s4  ;;  %10898 = vst [vmem:[#allocation70_spill] sm:$0xff] %v9892_v24  ;;  %v9898_v4 = vadd.s32 %v9889_v8, %v9812_v44  ;;  %v9902_v63 = vadd.s32 %v9889_v8, %v9817_v36  ;;  %v10076_v8 = vld [vmem:[#allocation5 + $0x360] ss:$8 sps:$4 sm:$0xff]  }
 0x3da   :  { %5448 = vmatprep.subr.bf16.mxu1 %v7672_v33  ;;  %v9906_v12 = vadd.s32 %v9892_v24, %v9812_v44  ;;  %v3208_v35 = vadd.s32 %v9892_v24, %v9817_v36  ;;  %v3210_v33 = vadd.s32 %v9915_v20, %v9817_v36 }
 0x3db   :  { %4821 = vmatpush1.bf16.msra.mxu0 %v7673_v2 }
 0x3dc   :  { %4822 = vmatprep.subr.bf16.mxu0 %v7678_v6  ;;  %5449 = vmatpush1.bf16.msra.mxu1 %v7670_v23  ;;  %v3217_v13 = vadd.s32 1, %v9906_v12  ;;  %v7685_v23 = vld [vmem:[#allocation5 + $0x1e0] ss:$8 sps:$4 sm:$0xff]  }
 0x3dd   :  { %1220 = vrot.lane.b32.xlu1 %v1126_v56, %s7981_s4  ;;  %1218 = vrot.lane.b32.xlu0 %v1125_v59, %s7981_s4  ;;  %v3215_v56 = vadd.s32 1, %v9898_v4  ;;  %v3214_v59 = vadd.s32 1, %v9902_v63 }
 0x3de   :  { %5450 = vmatprep.subr.bf16.mxu1 %v7675_v22  ;;  %v7690_v22 = vld [vmem:[#allocation5 + $0x1f4] ss:$8 sps:$4 sm:$0xff]  }
 0x3df   :  { %4823 = vmatpush1.bf16.msra.mxu0 %v7676_v50 }
 0x3e0   :  { %4824 = vmatprep.subr.bf16.mxu0 %v7681_v30  ;;  %5451 = vmatpush1.bf16.msra.mxu1 %v7673_v2 }
 0x3e1   :  { %1224 = vrot.lane.b32.xlu1 %v1128_v10, %s7981_s4  ;;  %1222 = vrot.lane.b32.xlu0 %v1127_v41, %s7981_s4  ;;  %v3216_v10 = vadd.s32 1, %v3208_v35  ;;  %v3211_v41 = vadd.s32 %v9915_v20, %v9812_v44  ;;  %v10070_v20 = vld [vmem:[#allocation5 + $0x364] ss:$8 sps:$4 sm:$0xff]  }
 0x3e2   :  { %5452 = vmatprep.subr.bf16.mxu1 %v7678_v6  ;;  %v3218_v6 = vadd.s32 1, %v3210_v33 }
 0x3e3   :  { %4825 = vmatpush1.bf16.msra.mxu0 %v7679_v9  ;;  %v3219_v2 = vadd.s32 1, %v3211_v41 }
 0x3e4   :  { %4826 = vmatprep.subr.bf16.mxu0 %v7684_v45  ;;  %5453 = vmatpush1.bf16.msra.mxu1 %v7676_v50  ;;  %v3213_v50 = vadd.s32 %v9925_v43, %v9812_v44 }
 0x3e5   :  { %3276 = vrot.lane.b32.xlu1 %v3215_v56, %s7981_s4  ;;  %3274 = vrot.lane.b32.xlu0 %v3214_v59, %s7981_s4  ;;  %v3212_v56 = vadd.s32 %v9925_v43, %v9817_v36  ;;  %v7693_v59 = vld [vmem:[#allocation5 + $0x204] ss:$8 sps:$4 sm:$0xff]  }
 0x3e6   :  { %5454 = vmatprep.subr.bf16.mxu1 %v7681_v30  ;;  %v7688_v30 = vld [vmem:[#allocation5 + $0x1f0] ss:$8 sps:$4 sm:$0xff]  }
 0x3e7   :  { %4827 = vmatpush1.bf16.msra.mxu0 %v7682_v55 }
 0x3e8   :  { %4828 = vmatprep.subr.bf16.mxu0 %v7687_v14  ;;  %5455 = vmatpush1.bf16.msra.mxu1 %v7679_v9  ;;  %v3221_v9 = vadd.s32 1, %v3213_v50 }
 0x3e9   :  { %3280 = vrot.lane.b32.xlu1 %v3217_v13, %s7981_s4  ;;  %3278 = vrot.lane.b32.xlu0 %v3216_v10, %s7981_s4  ;;  %v3220_v13 = vadd.s32 1, %v3212_v56  ;;  %v7691_v10 = vld [vmem:[#allocation5 + $0x200] ss:$8 sps:$4 sm:$0xff]  }
 0x3ea   :  { %5456 = vmatprep.subr.bf16.mxu1 %v7684_v45  ;;  %v7694_v45 = vld [vmem:[#allocation5 + $0x210] ss:$8 sps:$4 sm:$0xff]  }
 0x3eb   :  { %4829 = vmatpush1.bf16.msra.mxu0 %v7685_v23 }
 0x3ec   :  { %4830 = vmatprep.subr.bf16.mxu0 %v7690_v22  ;;  %5457 = vmatpush1.bf16.msra.mxu1 %v7682_v55  ;;  %v7699_v55 = vld [vmem:[#allocation5 + $0x224] ss:$8 sps:$4 sm:$0xff]  }
 0x3ed   :  { %3284 = vrot.lane.b32.xlu1 %v3219_v2, %s7981_s4  ;;  %3282 = vrot.lane.b32.xlu0 %v3218_v6, %s7981_s4  ;;  %v7705_v2 = vld [vmem:[#allocation5 + $0x244] ss:$8 sps:$4 sm:$0xff]   ;;  %v9963_v6 = vld [vmem:[#allocation5 + $0x280] ss:$8 sps:$4 sm:$0xff]  }
 0x3ee   :  { %5458 = vmatprep.subr.bf16.mxu1 %v7687_v14  ;;  %v7697_v14 = vld [vmem:[#allocation5 + $0x220] ss:$8 sps:$4 sm:$0xff]  }
 0x3ef   :  { %4831 = vmatpush1.bf16.msra.mxu0 %v7688_v30 }
 0x3f0   :  { %4832 = vmatprep.subr.bf16.mxu0 %v7693_v59  ;;  %5459 = vmatpush1.bf16.msra.mxu1 %v7685_v23  ;;  %v7702_v23 = vld [vmem:[#allocation5 + $0x234] ss:$8 sps:$4 sm:$0xff]  }
 0x3f1   :  { %3288 = vrot.lane.b32.xlu1 %v3221_v9, %s7981_s4  ;;  %3286 = vrot.lane.b32.xlu0 %v3220_v13, %s7981_s4  ;;  %v9978_v9 = vld [vmem:[#allocation5 + $0x2b4] ss:$8 sps:$4 sm:$0xff]   ;;  %v9981_v13 = vld [vmem:[#allocation5 + $0x2b0] ss:$8 sps:$4 sm:$0xff]  }
 0x3f2   :  { %5460 = vmatprep.subr.bf16.mxu1 %v7690_v22  ;;  %v7700_v22 = vld [vmem:[#allocation5 + $0x230] ss:$8 sps:$4 sm:$0xff]  }
 0x3f3   :  { %4833 = vmatpush1.bf16.msra.mxu0 %v7691_v10 }
 0x3f4   :  { %4834 = vmatprep.subr.bf16.mxu0 %v7696_v19  ;;  %5461 = vmatpush1.bf16.msra.mxu1 %v7688_v30  ;;  %v9972_v30 = vld [vmem:[#allocation5 + $0x2a4] ss:$8 sps:$4 sm:$0xff]  }
 0x3f5   :  { %3296 = vrot.lane.b32.xlu1 %v9898_v4, %s7981_s4  ;;  %3294 = vrot.lane.b32.xlu0 %v9902_v63, %s7981_s4  ;;  %v7703_v4 = vld [vmem:[#allocation5 + $0x240] ss:$8 sps:$4 sm:$0xff]   ;;  %v7708_v63 = vld [vmem:[#allocation5 + $0x254] ss:$8 sps:$4 sm:$0xff]  }
 0x3f6   :  { %5462 = vmatprep.subr.bf16.mxu1 %v7693_v59  ;;  %v9975_v59 = vld [vmem:[#allocation5 + $0x2a0] ss:$8 sps:$4 sm:$0xff]  }
 0x3f7   :  { %4835 = vmatpush1.bf16.msra.mxu0 %v7694_v45 }
 0x3f8   :  { %4836 = vmatprep.subr.bf16.mxu0 %v7699_v55  ;;  %5463 = vmatpush1.bf16.msra.mxu1 %v7691_v10  ;;  %v9984_v10 = vld [vmem:[#allocation5 + $0x2c4] ss:$8 sps:$4 sm:$0xff]  }
 0x3f9   :  { %3300 = vrot.lane.b32.xlu1 %v9906_v12, %s7981_s4  ;;  %3298 = vrot.lane.b32.xlu0 %v3208_v35, %s7981_s4  ;;  %v9949_v12 = vld [vmem:[#allocation5 + $0x264] ss:$8 sps:$4 sm:$0xff]   ;;  %v9951_v35 = vld [vmem:[#allocation5 + $0x260] ss:$8 sps:$4 sm:$0xff]  }
 0x3fa   :  { %5464 = vmatprep.subr.bf16.mxu1 %v7696_v19  ;;  %v7706_v19 = vld [vmem:[#allocation5 + $0x250] ss:$8 sps:$4 sm:$0xff]  }
 0x3fb   :  { %4837 = vmatpush1.bf16.msra.mxu0 %v7697_v14 }
 0x3fc   :  { %4838 = vmatprep.subr.bf16.mxu0 %v7702_v23  ;;  %5465 = vmatpush1.bf16.msra.mxu1 %v7694_v45  ;;  %v9987_v45 = vld [vmem:[#allocation5 + $0x2c0] ss:$8 sps:$4 sm:$0xff]  }
 0x3fd   :  { %3304 = vrot.lane.b32.xlu1 %v3211_v41, %s7981_s4  ;;  %3302 = vrot.lane.b32.xlu0 %v3210_v33, %s7981_s4  ;;  %v9954_v41 = vld [vmem:[#allocation5 + $0x274] ss:$8 sps:$4 sm:$0xff]   ;;  %v9957_v33 = vld [vmem:[#allocation5 + $0x270] ss:$8 sps:$4 sm:$0xff]  }
 0x3fe   :  { %5466 = vmatprep.subr.bf16.mxu1 %v7699_v55  ;;  %v9990_v55 = vld [vmem:[#allocation5 + $0x2d4] ss:$8 sps:$4 sm:$0xff]  }
 0x3ff   :  { %4839 = vmatpush1.bf16.msra.mxu0 %v7700_v22 }
 0x400   :  { %5059 = vmatprep.subr.bf16.mxu0 %v7705_v2  ;;  %5467 = vmatpush1.bf16.msra.mxu1 %v7697_v14  ;;  %v9993_v14 = vld [vmem:[#allocation5 + $0x2d0] ss:$8 sps:$4 sm:$0xff]  }
 0x401   :  { %3308 = vrot.lane.b32.xlu1 %v3213_v50, %s7981_s4  ;;  %3306 = vrot.lane.b32.xlu0 %v3212_v56, %s7981_s4  ;;  %v9966_v50 = vld [vmem:[#allocation5 + $0x294] ss:$8 sps:$4 sm:$0xff]   ;;  %v9969_v56 = vld [vmem:[#allocation5 + $0x290] ss:$8 sps:$4 sm:$0xff]  }
 0x402   :  { %4849 = vmatmul.mubr.bf16.vlgmr.msra.gmra.mrb[20].mxu0 %v9748_v0  ;;  %5468 = vmatprep.subr.bf16.mxu1 %v7702_v23  ;;  %v9960_v0 = vld [vmem:[#allocation5 + $0x284] ss:$8 sps:$4 sm:$0xff]  }
 0x403   :  { %5060 = vmatpush1.bf16.msra.mxu0 %v7703_v4  ;;  %v9996_v23 = vld [vmem:[#allocation5 + $0x2e4] ss:$8 sps:$4 sm:$0xff]  }
 0x404   :  { %5061 = vmatprep.subr.bf16.mxu0 %v7708_v63  ;;  %5469 = vmatpush1.bf16.msra.mxu1 %v7700_v22  ;;  %v9999_v22 = vld [vmem:[#allocation5 + $0x2e0] ss:$8 sps:$4 sm:$0xff]  }
 0x405   :  { %5493 = vmatprep.subr.bf16.mxu1 %v7705_v2  ;;  %v10002_v2 = vld [vmem:[#allocation5 + $0x2f4] ss:$8 sps:$4 sm:$0xff]  }
 0x407   :  { %5062 = vmatpush1.bf16.msra.mxu0 %v7706_v19 }
 0x408   :  { %5063 = vmatprep.subr.bf16.mxu0 %v9949_v12 }
 0x40b   :  { %5064 = vmatpush1.bf16.msra.mxu0 %v9951_v35 }
 0x40c   :  { %5065 = vmatprep.subr.bf16.mxu0 %v9954_v41 }
 0x40f   :  { %5066 = vmatpush1.bf16.msra.mxu0 %v9957_v33 }
 0x410   :  { %5067 = vmatprep.subr.bf16.mxu0 %v9960_v0 }
 0x413   :  { %5068 = vmatpush1.bf16.msra.mxu0 %v9963_v6 }
 0x414   :  { %5069 = vmatprep.subr.bf16.mxu0 %v9966_v50 }
 0x417   :  { %5070 = vmatpush1.bf16.msra.mxu0 %v9969_v56 }
 0x418   :  { %5071 = vmatprep.subr.bf16.mxu0 %v9972_v30 }
 0x41b   :  { %5072 = vmatpush1.bf16.msra.mxu0 %v9975_v59 }
 0x41c   :  { %5073 = vmatprep.subr.bf16.mxu0 %v9978_v9 }
 0x41f   :  { %5074 = vmatpush1.bf16.msra.mxu0 %v9981_v13 }
 0x420   :  { %5075 = vmatprep.subr.bf16.mxu0 %v9984_v10 }
 0x423   :  { %5076 = vmatpush1.bf16.msra.mxu0 %v9987_v45 }
 0x424   :  { %5077 = vmatprep.subr.bf16.mxu0 %v9990_v55 }
 0x427   :  { %5078 = vmatpush1.bf16.msra.mxu0 %v9993_v14 }
 0x428   :  { %5079 = vmatprep.subr.bf16.mxu0 %v9996_v23 }
 0x42b   :  { %5080 = vmatpush1.bf16.msra.mxu0 %v9999_v22  ;;  %v4933_v39 = vpop.permute.xlu1 %4932  ;;  %v4931_v17 = vpop.permute.xlu0 %4930 }
 0x42c   :  { %v4934_v1 = vsel %vm10901_vm3, %v4931_v17, %v4933_v39  ;;  %6737 = vmatprep.mubr.msk.bf16.mxu0 %vm10902_vm4, %v4933_v39  ;;  %6769 = vmatprep.mubr.msk.bf16.mxu1 %vm10896_vm0, %v4933_v39  ;;  %vm10903_vm3 = vmmov %vm10896_vm0  ;;  %v10023_v17 = vld [vmem:[#allocation5 + $0x314] ss:$8 sps:$4 sm:$0xff]  }
 0x42d   :  { %5081 = vmatprep.subr.bf16.mxu0 %v10002_v2  ;;  %5479 = vmatmul.mubr.bf16.vlgmr.msra.gmra.mrb[36].mxu1 %v4934_v1  ;;  %vm10904_vm4 = vmmov %vm10896_vm0 }
 0x42e   :  { %5494 = vmatpush1.bf16.msra.mxu1 %v7703_v4 }
 0x42f   :  { %5082 = vmatpush1.bf16.msra.mxu0 %v10005_v32  ;;  %v10014_v60 = vpop.permute.xlu1 %5150  ;;  %v10016_v51 = vpop.permute.xlu0 %5148  ;;  %5495 = vmatprep.subr.bf16.mxu1 %v7708_v63  ;;  %v10030_v63 = vld [vmem:[#allocation5 + $0x310] ss:$8 sps:$4 sm:$0xff]  }
 0x430   :  { %6770 = vmatprep.mubr.msk.bf16.mxu1 %vm10903_vm3, %v10014_v60  ;;  %5277 = vmatprep.subr.bf16.mxu0 %v10010_v25  ;;  %vm10906_vm3 = vmmov %vm10896_vm0 }
 0x432   :  { %5092 = vmatmul.mubr.bf16.vlgmr.msra.gmra.mrb[20].mxu0 %v4934_v1  ;;  %5496 = vmatpush1.bf16.msra.mxu1 %v7706_v19  ;;  %v10038_v1 = vld [vmem:[#allocation5 + $0x324] ss:$8 sps:$4 sm:$0xff]  }
 0x433   :  { %5278 = vmatpush1.bf16.msra.mxu0 %v10018_v16  ;;  %6766 = vmatprep.mubr.msk.bf16.mxu0 %vm10904_vm4, %v10014_v60  ;;  %v10028_v39 = vpop.permute.xlu1 %5556  ;;  %v5555_v4 = vpop.permute.xlu0 %5554  ;;  %vm10907_vm4 = vmmov %vm10896_vm0 }
 0x434   :  { %v10034_v40 = vsel %vm10896_vm0, %v5555_v4, %v10028_v39  ;;  %5497 = vmatprep.subr.bf16.mxu1 %v9949_v12  ;;  %5279 = vmatprep.subr.bf16.mxu0 %v10023_v17  ;;  %v10046_v4 = vld [vmem:[#allocation5 + $0x334] ss:$8 sps:$4 sm:$0xff]   ;;  %vm10908_vm0 = vcmp.gt.f32.partialorder %v8942_v58, %v9074_v27  ;;  %v10093_v58 = vld [vmem:[#allocation5 + $0x370] ss:$8 sps:$4 sm:$0xff]  }
 0x435   :  { %10905 = vst [vmem:[#allocation73_spill] sm:$0xff] %v10034_v40 }
 0x436   :  { %5498 = vmatpush1.bf16.msra.mxu1 %v9951_v35  ;;  %v10051_v35 = vld [vmem:[#allocation5 + $0x330] ss:$8 sps:$4 sm:$0xff]  }
 0x437   :  { %5280 = vmatpush1.bf16.msra.mxu0 %v10030_v63  ;;  %v1193_v19 = vpop.permute.xlu1 %1192  ;;  %v1191_v26 = vpop.permute.xlu0 %1190  ;;  %5499 = vmatprep.subr.bf16.mxu1 %v9954_v41 }
 0x438   :  { %5281 = vmatprep.subr.bf16.mxu0 %v10038_v1 }
 0x43a   :  { %5500 = vmatpush1.bf16.msra.mxu1 %v9957_v33  ;;  %v10059_v33 = vld [vmem:[#allocation5 + $0x340] ss:$8 sps:$4 sm:$0xff]  }
 0x43b   :  { %5282 = vmatpush1.bf16.msra.mxu0 %v10043_v29  ;;  %v1197_v12 = vpop.permute.xlu1 %1196  ;;  %v1195_v21 = vpop.permute.xlu0 %1194  ;;  %5501 = vmatprep.subr.bf16.mxu1 %v9960_v0 }
 0x43c   :  { %5283 = vmatprep.subr.bf16.mxu0 %v10046_v4 }
 0x43e   :  { %5502 = vmatpush1.bf16.msra.mxu1 %v9963_v6  ;;  %v10067_v6 = vld [vmem:[#allocation5 + $0x350] ss:$8 sps:$4 sm:$0xff]  }
 0x43f   :  { %5284 = vmatpush1.bf16.msra.mxu0 %v10051_v35  ;;  %v1201_v41 = vpop.permute.xlu1 %1200  ;;  %v1199_v28 = vpop.permute.xlu0 %1198  ;;  %5503 = vmatprep.subr.bf16.mxu1 %v9966_v50  ;;  %v1206_v50 = vsel %vm10906_vm3, %v1191_v26, %v1193_v19  ;;  %v1207_v19 = vsel %vm10906_vm3, %v1195_v21, %v1197_v12 }
 0x440   :  { %5285 = vmatprep.subr.bf16.mxu0 %v10054_v3 }
 0x442   :  { %5504 = vmatpush1.bf16.msra.mxu1 %v9969_v56 }
 0x443   :  { %5286 = vmatpush1.bf16.msra.mxu0 %v10059_v33  ;;  %v1205_v0 = vpop.permute.xlu1 %1204  ;;  %v1203_v43 = vpop.permute.xlu0 %1202  ;;  %5505 = vmatprep.subr.bf16.mxu1 %v9972_v30 }
 0x444   :  { %5287 = vmatprep.subr.bf16.mxu0 %v10062_v48 }
 0x446   :  { %5506 = vmatpush1.bf16.msra.mxu1 %v9975_v59 }
 0x447   :  { %5288 = vmatpush1.bf16.msra.mxu0 %v10067_v6  ;;  %v1213_v24 = vpop.permute.xlu1 %1212  ;;  %v1211_v56 = vpop.permute.xlu0 %1210  ;;  %5507 = vmatprep.subr.bf16.mxu1 %v9978_v9 }
 0x448   :  { %v1226_v30 = vsel %vm10907_vm4, %v1211_v56, %v1213_v24  ;;  %5289 = vmatprep.subr.bf16.mxu0 %v10070_v20  ;;  %v1230_v40 = vsel %vm10908_vm0, %v1191_v26, %v1211_v56  ;;  %vm10909_vm4 = vmmov %vm10906_vm3  ;;  %v10143_v56 = vld [vmem:[#allocation5 + $0x3a0] ss:$8 sps:$4 sm:$0xff]  }
 0x449   :  { %1950 = vrot.lane.b32.xlu0 %v1230_v40, %s7981_s4  ;;  %v1231_v59 = vsel %vm9099_vm7, %v1206_v50, %v1226_v30  ;;  %vm10910_vm7 = vcmp.gt.f32.partialorder %v8937_v52, %v9117_v31  ;;  %v10100_v40 = vld [vmem:[#allocation5 + $0x384] ss:$8 sps:$4 sm:$0xff]   ;;  %vm10911_vm0 = vmmov %vm10906_vm3  ;;  %v10110_v52 = vld [vmem:[#allocation5 + $0x380] ss:$8 sps:$4 sm:$0xff]  }
 0x44a   :  { %5508 = vmatpush1.bf16.msra.mxu1 %v9981_v13  ;;  %1952 = vrot.lane.b32.xlu1 %v1231_v59, %s7981_s4  ;;  %v1208_v13 = vsel %vm10911_vm0, %v1199_v28, %v1201_v41  ;;  %vm10912_vm3 = vmmov %vm10911_vm0  ;;  %v10920_v59 = vld [vmem:[#allocation20_spill] sm:$0xff] }
 0x44b   :  { %5290 = vmatpush1.bf16.msra.mxu0 %v10076_v8  ;;  %v1217_v24 = vpop.permute.xlu1 %1216  ;;  %v1215_v9 = vpop.permute.xlu0 %1214  ;;  %5509 = vmatprep.subr.bf16.mxu1 %v9984_v10 }
 0x44c   :  { %v1227_v27 = vsel %vm10909_vm4, %v1215_v9, %v1217_v24  ;;  %5291 = vmatprep.subr.bf16.mxu0 %v10083_v47  ;;  %v1232_v15 = vsel %vm10910_vm7, %v1195_v21, %v1215_v9  ;;  %v10117_v21 = vld [vmem:[#allocation5 + $0x394] ss:$8 sps:$4 sm:$0xff]   ;;  %vm10914_vm4 = vmmov %vm10911_vm0 }
 0x44d   :  { %1954 = vrot.lane.b32.xlu0 %v1232_v15, %s7981_s4  ;;  %v1233_v26 = vsel %vm9138_vm9, %v1207_v19, %v1227_v27  ;;  %vm10913_vm9 = vcmp.gt.f32.partialorder %v8975_v62, %v9119_v61  ;;  %v1209_v41 = vsel %vm10914_vm4, %v1203_v43, %v1205_v0  ;;  %v10127_v62 = vld [vmem:[#allocation5 + $0x390] ss:$8 sps:$4 sm:$0xff]   ;;  %vm10915_vm7 = vmmov %vm10911_vm0  ;;  %vm10921_vm4 = vcmp.gt.f32.partialorder %v9057_v37, %v10920_v59 }
 0x44e   :  { %5510 = vmatpush1.bf16.msra.mxu1 %v9987_v45  ;;  %1956 = vrot.lane.b32.xlu1 %v1233_v26, %s7981_s4  ;;  %v1886_v27 = vadd.s32 24, %v9814_v54  ;;  %v10928_v26 = vld [vmem:[#allocation22_spill] sm:$0xff] }
 0x44f   :  { %5292 = vmatpush1.bf16.msra.mxu0 %v10093_v58  ;;  %v1221_v10 = vpop.permute.xlu1 %1220  ;;  %v1219_v12 = vpop.permute.xlu0 %1218  ;;  %5511 = vmatprep.subr.bf16.mxu1 %v9990_v55 }
 0x450   :  { %v1228_v31 = vsel %vm10912_vm3, %v1219_v12, %v1221_v10  ;;  %5293 = vmatprep.subr.bf16.mxu0 %v10100_v40  ;;  %v1234_v42 = vsel %vm10913_vm9, %v1199_v28, %v1219_v12  ;;  %v10134_v28 = vld [vmem:[#allocation5 + $0x3a4] ss:$8 sps:$4 sm:$0xff]   ;;  %vm10918_vm3 = vmmov %vm10911_vm0  ;;  %v1890_v10 = vadd.s32 %v1886_v27, %v9817_v36 }
 0x451   :  { %1958 = vrot.lane.b32.xlu0 %v1234_v42, %s7981_s4  ;;  %v1235_v45 = vsel %vm9155_vm11, %v1208_v13, %v1228_v31  ;;  %vm10916_vm11 = vcmp.gt.f32.partialorder %v8986_v11, %v9152_v34  ;;  %v10146_v11 = vld [vmem:[#allocation5 + $0x3b4] ss:$8 sps:$4 sm:$0xff]   ;;  %vm10919_vm9 = vmmov %vm10911_vm0 }
 0x452   :  { %5512 = vmatpush1.bf16.msra.mxu1 %v9993_v14  ;;  %1960 = vrot.lane.b32.xlu1 %v1235_v45, %s7981_s4 }
 0x453   :  { %5294 = vmatpush1.bf16.msra.mxu0 %v10110_v52  ;;  %v1225_v55 = vpop.permute.xlu1 %1224  ;;  %v1223_v50 = vpop.permute.xlu0 %1222  ;;  %5513 = vmatprep.subr.bf16.mxu1 %v9996_v23 }
 0x454   :  { %v1229_v61 = vsel %vm10915_vm7, %v1223_v50, %v1225_v55  ;;  %5295 = vmatprep.subr.bf16.mxu0 %v10117_v21  ;;  %v1236_v7 = vsel %vm10916_vm11, %v1203_v43, %v1223_v50  ;;  %v10151_v43 = vld [vmem:[#allocation5 + $0x3b0] ss:$8 sps:$4 sm:$0xff]   ;;  %vm10923_vm7 = vmmov %vm10911_vm0 }
 0x455   :  { %1962 = vrot.lane.b32.xlu0 %v1236_v7, %s7981_s4  ;;  %v1237_v14 = vsel %vm9178_vm13, %v1209_v41, %v1229_v61  ;;  %vm10917_vm13 = vmmov %vm10911_vm0  ;;  %v10933_v41 = vld [vmem:[#allocation42_spill] sm:$0xff]  ;;  %v1888_v7 = vadd.s32 24, %v9853_v38 }
 0x456   :  { %5514 = vmatpush1.bf16.msra.mxu1 %v9999_v22  ;;  %1964 = vrot.lane.b32.xlu1 %v1237_v14, %s7981_s4  ;;  %v5152_v22 = vsel %vm10917_vm13, %v10016_v51, %v10014_v60  ;;  %vm10924_vm11 = vmmov %vm10911_vm0  ;;  %vm10925_vm13 = vcmp.gt.f32.partialorder %v9272_v18, %v9440_v49  ;;  %v10927_v49 = vld [vmem:[#allocation19_spill] sm:$0xff] }
 0x457   :  { %5296 = vmatpush1.bf16.msra.mxu0 %v10127_v62  ;;  %v3277_v23 = vpop.permute.xlu1 %3276  ;;  %v3275_v0 = vpop.permute.xlu0 %3274  ;;  %5515 = vmatprep.subr.bf16.mxu1 %v10002_v2 }
 0x458   :  { %5297 = vmatprep.subr.bf16.mxu0 %v10134_v28  ;;  %v3290_v51 = vsel %vm10918_vm3, %v3275_v0, %v3277_v23  ;;  %vm10929_vm3 = vcmp.gt.f32.partialorder %v10927_v49, %v10928_v26  ;;  %v1894_v23 = vadd.s32 %v1888_v7, %v9817_v36 }
 0x45a   :  { %5516 = vmatpush1.bf16.msra.mxu1 %v10005_v32 }
 0x45b   :  { %5298 = vmatpush1.bf16.msra.mxu0 %v10143_v56  ;;  %v3281_v34 = vpop.permute.xlu1 %3280  ;;  %v3279_v53 = vpop.permute.xlu0 %3278  ;;  %5563 = vmatprep.subr.bf16.mxu1 %v10010_v25 }
 0x45c   :  { %5299 = vmatprep.subr.bf16.mxu0 %v10146_v11 }
 0x45d   :  { %5526 = vmatmul.mubr.bf16.vlgmr.msra.gmra.mrb[36].mxu1 %v5152_v22 }
 0x45e   :  { %5564 = vmatpush1.bf16.msra.mxu1 %v10018_v16  ;;  %6775 = vmatprep.mubr.msk.bf16.mxu1 %vm10911_vm0, %v10028_v39 }
 0x45f   :  { %5300 = vmatpush1.bf16.msra.mxu0 %v10151_v43  ;;  %v3285_v32 = vpop.permute.xlu1 %3284  ;;  %v3283_v2 = vpop.permute.xlu0 %3282  ;;  %5565 = vmatprep.subr.bf16.mxu1 %v10023_v17 }
 0x462   :  { %5310 = vmatmul.mubr.bf16.vlgmr.msra.gmra.mrb[20].mxu0 %v5152_v22  ;;  %5566 = vmatpush1.bf16.msra.mxu1 %v10030_v63 }
 0x463   :  { %v3289_v25 = vpop.permute.xlu1 %3288  ;;  %v3287_v30 = vpop.permute.xlu0 %3286  ;;  %5567 = vmatprep.subr.bf16.mxu1 %v10038_v1  ;;  %v3291_v1 = vsel %vm10923_vm7, %v3279_v53, %v3281_v34  ;;  %vm10943_vm7 = vmmov %vm10911_vm0 }
 0x466   :  { %5568 = vmatpush1.bf16.msra.mxu1 %v10043_v29 }
 0x467   :  { %v3297_v60 = vpop.permute.xlu1 %3296  ;;  %v3295_v16 = vpop.permute.xlu0 %3294  ;;  %5569 = vmatprep.subr.bf16.mxu1 %v10046_v4 }
 0x468   :  { %v3310_v39 = vsel %vm10919_vm9, %v3295_v16, %v3297_v60  ;;  %v3314_v17 = vsel %vm10921_vm4, %v3275_v0, %v3295_v16  ;;  %vm10932_vm9 = vmmov %vm10911_vm0  ;;  %v10936_v0 = vld [vmem:[#allocation68_spill] sm:$0xff]  ;;  %v10944_v16 = vld [vmem:[#allocation29_spill] sm:$0xff] }
 0x469   :  { %4034 = vrot.lane.b32.xlu0 %v3314_v17, %s7981_s4  ;;  %v3315_v19 = vsel %vm9216_vm15, %v3290_v51, %v3310_v39  ;;  %vm10926_vm15 = vmmov %vm10911_vm0  ;;  %v1889_v34 = vadd.s32 24, %v10936_v0  ;;  %v10945_v39 = vld [vmem:[#allocation25_spill] sm:$0xff]  ;;  %v10947_v17 = vld [vmem:[#allocation30_spill] sm:$0xff] }
 0x46a   :  { %5570 = vmatpush1.bf16.msra.mxu1 %v10051_v35  ;;  %4036 = vrot.lane.b32.xlu1 %v3315_v19, %s7981_s4  ;;  %v3292_v35 = vsel %vm10926_vm15, %v3283_v2, %v3285_v32  ;;  %v10949_v19 = vld [vmem:[#allocation69_spill] sm:$0xff] }
 0x46b   :  { %v3301_v29 = vpop.permute.xlu1 %3300  ;;  %v3299_v24 = vpop.permute.xlu0 %3298  ;;  %5571 = vmatprep.subr.bf16.mxu1 %v10054_v3  ;;  %v1897_v32 = vadd.s32 %v1889_v34, %v9812_v44 }
 0x46c   :  { %v3311_v4 = vsel %vm10924_vm11, %v3299_v24, %v3301_v29  ;;  %v3316_v37 = vsel %vm10925_vm13, %v3279_v53, %v3299_v24  ;;  %v1982_v53 = vadd.s32 1, %v1894_v23  ;;  %vm10946_vm11 = vcmp.gt.f32.partialorder %v10944_v16, %v10945_v39 }
 0x46d   :  { %4038 = vrot.lane.b32.xlu0 %v3316_v37, %s7981_s4  ;;  %v3317_v9 = vsel %vm9464_vm6, %v3291_v1, %v3311_v4  ;;  %vm10931_vm6 = vmmov %vm10911_vm0  ;;  %vm10948_vm13 = vnez %v10947_v17  ;;  %v3970_v1 = vadd.s32 24, %v10949_v19  ;;  %v10951_v37 = vld [vmem:[#allocation32_spill] sm:$0xff]  ;;  %v10980_v19 = vld [vmem:[#allocation41_spill] sm:$0xff] }
 0x46e   :  { %5572 = vmatpush1.bf16.msra.mxu1 %v10059_v33  ;;  %4040 = vrot.lane.b32.xlu1 %v3317_v9, %s7981_s4  ;;  %v1887_v33 = vadd.s32 24, %v9826_v57  ;;  %v3293_v12 = vsel %vm10931_vm6, %v3287_v30, %v3289_v25  ;;  %v10939_v25 = vld [vmem:[#allocation26_spill] sm:$0xff]  ;;  %v10952_v9 = vld [vmem:[#allocation28_spill] sm:$0xff] }
 0x46f   :  { %v3305_v3 = vpop.permute.xlu1 %3304  ;;  %v3303_v15 = vpop.permute.xlu0 %3302  ;;  %5573 = vmatprep.subr.bf16.mxu1 %v10062_v48  ;;  %v1891_v48 = vadd.s32 %v1886_v27, %v9812_v44  ;;  %vm10953_vm15 = vcmp.gt.f32.partialorder %v10951_v37, %v10952_v9  ;;  %v10978_v17 = vld [vmem:[#allocation40_spill] sm:$0xff] }
 0x470   :  { %v3312_v18 = vsel %vm10911_vm0, %v3303_v15, %v3305_v3  ;;  %v3318_v13 = vsel %vm10929_vm3, %v3283_v2, %v3303_v15  ;;  %v1892_v61 = vadd.s32 %v1887_v33, %v9817_v36  ;;  %v1893_v14 = vadd.s32 %v1887_v33, %v9812_v44  ;;  %v10959_v33 = vld [vmem:[#allocation31_spill] sm:$0xff]  ;;  %v10983_v9 = vld [vmem:[#allocation60_spill] sm:$0xff] }
 0x471   :  { %4042 = vrot.lane.b32.xlu0 %v3318_v13, %s7981_s4  ;;  %v3319_v54 = vsel %vm9254_vm1, %v3292_v35, %v3312_v18  ;;  %vm10934_vm1 = vcmp.gt.f32.partialorder %v9289_v5, %v10933_v41  ;;  %v10954_v35 = vld [vmem:[#allocation33_spill] sm:$0xff]  ;;  %v3975_v15 = vadd.s32 %v3970_v1, %v9812_v44  ;;  %v10956_v18 = vld [vmem:[#allocation70_spill] sm:$0xff]  ;;  %v3974_v13 = vadd.s32 %v3970_v1, %v9817_v36  ;;  %v10963_v41 = vld [vmem:[#allocation71_spill] sm:$0xff] }
 0x472   :  { %5574 = vmatpush1.bf16.msra.mxu1 %v10067_v6  ;;  %4044 = vrot.lane.b32.xlu1 %v3319_v54, %s7981_s4  ;;  %v1978_v6 = vadd.s32 1, %v1890_v10  ;;  %v1980_v5 = vadd.s32 1, %v1892_v61  ;;  %v1981_v38 = vadd.s32 1, %v1893_v14  ;;  %v3971_v49 = vadd.s32 24, %v10956_v18 }
 0x473   :  { %v3309_v31 = vpop.permute.xlu1 %3308  ;;  %v3307_v42 = vpop.permute.xlu0 %3306  ;;  %5575 = vmatprep.subr.bf16.mxu1 %v10070_v20  ;;  %v1979_v20 = vadd.s32 1, %v1891_v48  ;;  %v4062_v57 = vadd.s32 1, %v3974_v13  ;;  %v7984_v18 = vmov 0.0  }
 0x474   :  { %v3313_v45 = vsel %vm10932_vm9, %v3307_v42, %v3309_v31  ;;  %v3320_v55 = vsel %vm10934_vm1, %v3287_v30, %v3307_v42  ;;  %v10940_v30 = vld [vmem:[#allocation24_spill] sm:$0xff]  ;;  %v4063_v42 = vadd.s32 1, %v3975_v15  ;;  %7131 = vmatprep.subr.bf16.mxu0 %v7984_v18 }
 0x475   :  { %4046 = vrot.lane.b32.xlu0 %v3320_v55, %s7981_s4  ;;  %v3321_v50 = vsel %vm9488_vm8, %v3293_v12, %v3313_v45  ;;  %vm10938_vm8 = vmmov %vm10911_vm0  ;;  %vm10941_vm4 = vcmp.gt.f32.partialorder %v10939_v25, %v10940_v30  ;;  %v3977_v45 = vadd.s32 %v3971_v49, %v9812_v44  ;;  %v3972_v55 = vadd.s32 24, %v10963_v41  ;;  %v10972_v30 = vld [vmem:[#allocation57_spill] sm:$0xff] }
 0x476   :  { %5576 = vmatpush1.bf16.msra.mxu1 %v10076_v8  ;;  %4048 = vrot.lane.b32.xlu1 %v3321_v50, %s7981_s4  ;;  %v1895_v8 = vadd.s32 %v1888_v7, %v9812_v44  ;;  %v3976_v50 = vadd.s32 %v3971_v49, %v9817_v36  ;;  %v10964_v7 = vld [vmem:[#allocation72_spill] sm:$0xff] }
 0x477   :  { %5577 = vmatprep.subr.bf16.mxu1 %v10083_v47  ;;  %v1896_v47 = vadd.s32 %v1889_v34, %v9817_v36 }
 0x478   :  { %v1983_v22 = vadd.s32 1, %v1895_v8 }
 0x479   :  { %2038 = vrot.lane.b32.xlu0 %v1978_v6, %s7981_s4  ;;  %v4065_v6 = vadd.s32 1, %v3977_v45 }
 0x47a   :  { %5578 = vmatpush1.bf16.msra.mxu1 %v10093_v58  ;;  %2040 = vrot.lane.b32.xlu1 %v1979_v20, %s7981_s4  ;;  %v1984_v58 = vadd.s32 1, %v1896_v47  ;;  %v3973_v20 = vadd.s32 24, %v10964_v7 }
 0x47b   :  { %5579 = vmatprep.subr.bf16.mxu1 %v10100_v40  ;;  %v1985_v40 = vadd.s32 1, %v1897_v32 }
 0x47c   :  { %v3981_v0 = vadd.s32 %v3973_v20, %v9812_v44 }
 0x47d   :  { %2042 = vrot.lane.b32.xlu0 %v1980_v5, %s7981_s4  ;;  %v3978_v5 = vadd.s32 %v3972_v55, %v9817_v36 }
 0x47e   :  { %5580 = vmatpush1.bf16.msra.mxu1 %v10110_v52  ;;  %2044 = vrot.lane.b32.xlu1 %v1981_v38, %s7981_s4  ;;  %v10937_v52 = vld [vmem:[#allocation73_spill] sm:$0xff]  ;;  %v3980_v38 = vadd.s32 %v3973_v20, %v9817_v36  ;;  %v10969_v36 = vld [vmem:[#allocation38_spill] sm:$0xff] }
 0x47f   :  { %5581 = vmatprep.subr.bf16.mxu1 %v10117_v21  ;;  %v4066_v34 = vadd.s32 1, %v3978_v5  ;;  %v10992_v20 = vld [vmem:[#allocation45_spill] sm:$0xff] }
 0x481   :  { %2046 = vrot.lane.b32.xlu0 %v1982_v53, %s7981_s4  ;;  %v4068_v53 = vadd.s32 1, %v3980_v38 }
 0x482   :  { %5582 = vmatpush1.bf16.msra.mxu1 %v10127_v62  ;;  %2048 = vrot.lane.b32.xlu1 %v1983_v22, %s7981_s4 }
 0x483   :  { %5583 = vmatprep.subr.bf16.mxu1 %v10134_v28 }
 0x485   :  { %2050 = vrot.lane.b32.xlu0 %v1984_v58, %s7981_s4  ;;  %v10967_v58 = vld [vmem:[#allocation37_spill] sm:$0xff] }
 0x486   :  { %5584 = vmatpush1.bf16.msra.mxu1 %v10143_v56  ;;  %2052 = vrot.lane.b32.xlu1 %v1985_v40, %s7981_s4 }
 0x487   :  { %5585 = vmatprep.subr.bf16.mxu1 %v10146_v11 }
 0x48a   :  { %5586 = vmatpush1.bf16.msra.mxu1 %v10151_v43 }
 0x48b   :  { %7209 = vmatprep.subr.bf16.mxu1 %v7984_v18 }
 0x48d   :  { %5596 = vmatmul.mubr.bf16.vlgmr.msra.gmra.mrb[36].mxu1 %v10937_v52 }
 0x4bb   :  { %v1951_v21 = vpop.permute.xlu0 %1950 }
 0x4bc   :  { %v1953_v2 = vpop.permute.xlu1 %1952 }
 0x4bd   :  { %v1966_v62 = vsel %vm10938_vm8, %v1951_v21, %v1953_v2  ;;  %v1971_v28 = vsel %vm10941_vm4, %v1891_v48, %v1953_v2  ;;  %v10961_v48 = vld [vmem:[#allocation35_spill] sm:$0xff]  ;;  %vm10970_vm4 = vnez %v10969_v36 }
 0x4be   :  { %2060 = vrot.lane.b32.xlu1 %v1971_v28, %s7981_s4  ;;  %v1970_v56 = vsel %vm9297_vm2, %v1890_v10, %v1966_v62  ;;  %vm10950_vm2 = vmmov %vm10911_vm0  ;;  %vm10955_vm0 = vnez %v10954_v35  ;;  %v10958_v10 = vld [vmem:[#allocation34_spill] sm:$0xff]  ;;  %vm10962_vm9 = vnez %v10961_v48  ;;  %v10973_v28 = vld [vmem:[#allocation56_spill] sm:$0xff] }
 0x4bf   :  { %2058 = vrot.lane.b32.xlu0 %v1970_v56, %s7981_s4  ;;  %v1955_v11 = vpop.permute.xlu0 %1954  ;;  %vm10957_vm3 = vmmov %vm10950_vm2  ;;  %vm10960_vm6 = vcmp.gt.f32.partialorder %v10958_v10, %v10959_v33 }
 0x4c0   :  { %v1957_v60 = vpop.permute.xlu1 %1956  ;;  %vm10965_vm1 = vmmov %vm10950_vm2 }
 0x4c1   :  { %v1967_v43 = vsel %vm10943_vm7, %v1955_v11, %v1957_v60  ;;  %v1973_v59 = vsel %vm10946_vm11, %v1893_v14, %v1957_v60  ;;  %v4064_v14 = vadd.s32 1, %v3976_v50  ;;  %vm10971_vm7 = vmmov %vm10965_vm1  ;;  %vm10974_vm11 = vcmp.gt.f32.partialorder %v10972_v30, %v10973_v28 }
 0x4c2   :  { %2064 = vrot.lane.b32.xlu1 %v1973_v59, %s7981_s4  ;;  %v1972_v63 = vsel %vm10948_vm13, %v1892_v61, %v1967_v43  ;;  %v3979_v61 = vadd.s32 %v3972_v55, %v9812_v44  ;;  %v10966_v44 = vld [vmem:[#allocation36_spill] sm:$0xff]  ;;  %vm10976_vm13 = vmmov %vm10965_vm1  ;;  %v10977_v59 = vld [vmem:[#allocation39_spill] sm:$0xff] }
 0x4c3   :  { %2062 = vrot.lane.b32.xlu0 %v1972_v63, %s7981_s4  ;;  %v1959_v29 = vpop.permute.xlu0 %1958  ;;  %vm10968_vm8 = vcmp.gt.f32.partialorder %v10966_v44, %v10967_v58  ;;  %v5340_v55 = vld [vmem:[%s10638_s9] sm:$0x3]  ;;  %v10997_v58 = vld [vmem:[#allocation46_spill] sm:$0xff] }
 0x4c4   :  { %v1961_v24 = vpop.permute.xlu1 %1960 }
 0x4c5   :  { %v1968_v4 = vsel %vm10950_vm2, %v1959_v29, %v1961_v24  ;;  %v1975_v27 = vsel %vm10953_vm15, %v1895_v8, %v1961_v24  ;;  %v4069_v8 = vadd.s32 1, %v3981_v0  ;;  %vm10979_vm2 = vcmp.gt.f32.partialorder %v10977_v59, %v10978_v17 }
 0x4c6   :  { %2068 = vrot.lane.b32.xlu1 %v1975_v27, %s7981_s4  ;;  %v1974_v3 = vsel %vm10955_vm0, %v1894_v23, %v1968_v4  ;;  %v4067_v23 = vadd.s32 1, %v3979_v61  ;;  %vm10981_vm15 = vnez %v10980_v19  ;;  %v10984_v27 = vld [vmem:[#allocation58_spill] sm:$0xff]  ;;  %v11003_v19 = vld [vmem:[#allocation48_spill] sm:$0xff] }
 0x4c7   :  { %2066 = vrot.lane.b32.xlu0 %v1974_v3, %s7981_s4  ;;  %v1963_v26 = vpop.permute.xlu0 %1962  ;;  %vm10985_vm0 = vcmp.gt.f32.partialorder %v10983_v9, %v10984_v27  ;;  %v10986_v3 = vld [vmem:[#allocation61_spill] sm:$0xff] }
 0x4c8   :  { %v1965_v46 = vpop.permute.xlu1 %1964 }
 0x4c9   :  { %v1969_v54 = vsel %vm10957_vm3, %v1963_v26, %v1965_v46  ;;  %v1977_v12 = vsel %vm10960_vm6, %v1897_v32, %v1965_v46  ;;  %vm10987_vm3 = vnez %v10986_v3  ;;  %vm7985_vm6 = vmmov 0  }
 0x4ca   :  { %2072 = vrot.lane.b32.xlu1 %v1977_v12, %s7981_s4  ;;  %v1976_v31 = vsel %vm10962_vm9, %v1896_v47, %v1969_v54  ;;  %7133 = vmatprep.mubr.msk.bf16.mxu0 %vm7985_vm6, %v7984_v18  ;;  %vm10988_vm9 = vmmov %vm10965_vm1 }
 0x4cb   :  { %2070 = vrot.lane.b32.xlu0 %v1976_v31, %s7981_s4  ;;  %7211 = vmatprep.mubr.msk.bf16.mxu1 %vm7985_vm6, %v7984_v18  ;;  %v5324_v31 = vld [vmem:[%s10637_s8] sm:$0x3] }
 0x4ce   :  { %4124 = vrot.lane.b32.xlu1 %v4063_v42, %s7981_s4 }
 0x4cf   :  { %4122 = vrot.lane.b32.xlu0 %v4062_v57, %s7981_s4 }
 0x4d2   :  { %4128 = vrot.lane.b32.xlu1 %v4065_v6, %s7981_s4 }
 0x4d3   :  { %4126 = vrot.lane.b32.xlu0 %v4064_v14, %s7981_s4 }
 0x4d6   :  { %4132 = vrot.lane.b32.xlu1 %v4067_v23, %s7981_s4 }
 0x4d7   :  { %4130 = vrot.lane.b32.xlu0 %v4066_v34, %s7981_s4 }
 0x4da   :  { %4136 = vrot.lane.b32.xlu1 %v4069_v8, %s7981_s4 }
 0x4db   :  { %4134 = vrot.lane.b32.xlu0 %v4068_v53, %s7981_s4  ;;  %v4035_v47 = vpop.permute.xlu0 %4034 }
 0x4dc   :  { %v4037_v22 = vpop.permute.xlu1 %4036 }
 0x4dd   :  { %v4050_v32 = vsel %vm10965_vm1, %v4035_v47, %v4037_v22  ;;  %v4055_v40 = vsel %vm10968_vm8, %v3975_v15, %v4037_v22 }
 0x4de   :  { %4144 = vrot.lane.b32.xlu1 %v4055_v40, %s7981_s4  ;;  %v4054_v52 = vsel %vm10970_vm4, %v3974_v13, %v4050_v32  ;;  %vm10993_vm4 = vnez %v10992_v20 }
 0x4df   :  { %4142 = vrot.lane.b32.xlu0 %v4054_v52, %s7981_s4  ;;  %v4039_v21 = vpop.permute.xlu0 %4038 }
 0x4e0   :  { %v4041_v2 = vpop.permute.xlu1 %4040 }
 0x4e1   :  { %v4051_v62 = vsel %vm10971_vm7, %v4039_v21, %v4041_v2  ;;  %v4057_v51 = vsel %vm10974_vm11, %v3977_v45, %v4041_v2  ;;  %vm10995_vm7 = vmmov %vm10965_vm1  ;;  %v10999_v21 = vld [vmem:[#allocation47_spill] sm:$0xff] }
 0x4e2   :  { %4148 = vrot.lane.b32.xlu1 %v4057_v51, %s7981_s4  ;;  %v4056_v11 = vsel %vm9685_vm10, %v3976_v50, %v4051_v62  ;;  %vm10982_vm10 = vmmov %vm10965_vm1  ;;  %v10989_v50 = vld [vmem:[#allocation43_spill] sm:$0xff] }
 0x4e3   :  { %4146 = vrot.lane.b32.xlu0 %v4056_v11, %s7981_s4  ;;  %v4043_v60 = vpop.permute.xlu0 %4042  ;;  %vm10990_vm8 = vcmp.gt.f32.partialorder %v10939_v25, %v10989_v50  ;;  %vm10996_vm11 = vmmov %vm10965_vm1 }
 0x4e4   :  { %v4045_v43 = vpop.permute.xlu1 %4044 }
 0x4e5   :  { %v4052_v39 = vsel %vm10976_vm13, %v4043_v60, %v4045_v43  ;;  %v4059_v63 = vsel %vm10979_vm2, %v3979_v61, %v4045_v43  ;;  %v10991_v61 = vld [vmem:[#allocation17_spill] sm:$0xff]  ;;  %vm10998_vm13 = vcmp.gt.f32.partialorder %v10944_v16, %v10997_v58  ;;  %vm11000_vm2 = vnez %v10999_v21  ;;  %v11027_v21 = vld [vmem:[#allocation18_spill] sm:$0xff] }
 0x4e6   :  { %4152 = vrot.lane.b32.xlu1 %v4059_v63, %s7981_s4  ;;  %v4058_v1 = vsel %vm10981_vm15, %v3978_v5, %v4052_v39  ;;  %v10342_v7 = vrot.slane %v5324_v31, %v10991_v61  ;;  %v10994_v5 = vld [vmem:[#allocation16_spill] sm:$0xff]  ;;  %v10352_v34 = vrot.slane %v5340_v55, %v10991_v61  ;;  %vm11001_vm15 = vmmov %vm10965_vm1 }
 0x4e7   :  { %4150 = vrot.lane.b32.xlu0 %v4058_v1, %s7981_s4  ;;  %v4047_v29 = vpop.permute.xlu0 %4046  ;;  %v10348_v23 = vrot.slane %v5324_v31, %v10994_v5  ;;  %v10356_v8 = vrot.slane %v5340_v55, %v10994_v5  ;;  %v11015_v31 = vld [vmem:[#allocation51_spill] sm:$0xff] }
 0x4e8   :  { %v4049_v24 = vpop.permute.xlu1 %4048 }
 0x4e9   :  { %v4053_v4 = vsel %vm10982_vm10, %v4047_v29, %v4049_v24  ;;  %v4061_v35 = vsel %vm10985_vm0, %v3981_v0, %v4049_v24  ;;  %vm11002_vm10 = vmmov %vm10965_vm1  ;;  %vm11004_vm0 = vcmp.gt.f32.partialorder %v10951_v37, %v11003_v19 }
 0x4ea   :  { %4156 = vrot.lane.b32.xlu1 %v4061_v35, %s7981_s4  ;;  %v4060_v15 = vsel %vm10987_vm3, %v3980_v38, %v4053_v4  ;;  %v11005_v4 = vld [vmem:[#allocation49_spill] sm:$0xff] }
 0x4eb   :  { %4154 = vrot.lane.b32.xlu0 %v4060_v15, %s7981_s4  ;;  %v2039_v26 = vpop.permute.xlu0 %2038  ;;  %vm11006_vm3 = vnez %v11005_v4 }
 0x4ec   :  { %v2041_v49 = vpop.permute.xlu1 %2040 }
 0x4ed   :  { %v2054_v42 = vsel %vm10988_vm9, %v2039_v26, %v2041_v49  ;;  %vm11007_vm9 = vmmov %vm10965_vm1 }
 0x4ef   :  { %v2043_v46 = vpop.permute.xlu0 %2042 }
 0x4f0   :  { %v2045_v13 = vpop.permute.xlu1 %2044 }
 0x4f1   :  { %v2055_v0 = vsel %vm10995_vm7, %v2043_v46, %v2045_v13 }
 0x4f3   :  { %v2047_v33 = vpop.permute.xlu0 %2046 }
 0x4f4   :  { %v2049_v54 = vpop.permute.xlu1 %2048 }
 0x4f5   :  { %v2056_v62 = vsel %vm11001_vm15, %v2047_v33, %v2049_v54 }
 0x4f7   :  { %v2051_v48 = vpop.permute.xlu0 %2050 }
 0x4f8   :  { %v2053_v12 = vpop.permute.xlu1 %2052 }
 0x4f9   :  { %v2057_v35 = vsel %vm11007_vm9, %v2051_v48, %v2053_v12  ;;  %v6777_v12 = vld [vmem:[%s10639_s10 + $0x1] sm:$0x1] }
 0x530   :  { %v2061_v45 = vpop.permute.xlu1 %2060 }
 0x531   :  { %v2059_v41 = vpop.permute.xlu0 %2058 }
 0x532   :  { %v2074_v57 = vsel %vm10965_vm1, %v2059_v41, %v2061_v45  ;;  %v2078_v6 = vsel %vm10990_vm8, %v2039_v26, %v2059_v41  ;;  %vm11010_vm8 = vmmov %vm10995_vm7 }
 0x533   :  { %2090 = vrot.lane.b32.xlu0 %v2078_v6, %s7981_s4  ;;  %v2079_v14 = vsel %vm10993_vm4, %v2054_v42, %v2074_v57 }
 0x534   :  { %v2065_v38 = vpop.permute.xlu1 %2064  ;;  %2092 = vrot.lane.b32.xlu1 %v2079_v14, %s7981_s4 }
 0x535   :  { %v5311_v25 = vpop.f32.mrb[20].mxu0  ;;  %v2063_v53 = vpop.permute.xlu0 %2062 }
 0x536   :  { %v5336_v47 = vmul.f32 %v10342_v7, %v5311_v25  ;;  %v5313_v22 = vpop.f32.mrb[21].mxu0  ;;  %v2075_v32 = vsel %vm10996_vm11, %v2063_v53, %v2065_v38  ;;  %v2080_v40 = vsel %vm10998_vm13, %v2043_v46, %v2063_v53  ;;  %v11011_v46 = vld [vmem:[#allocation50_spill] sm:$0xff]  ;;  %vm11016_vm11 = vnez %v11015_v31  ;;  %vm11017_vm13 = vmmov %vm11010_vm8  ;;  %v11019_v38 = vld [vmem:[#allocation52_spill] sm:$0xff] }
 0x537   :  { %v5337_v36 = vmul.f32 %v10348_v23, %v5313_v22  ;;  %v5315_v52 = vpop.f32.mrb[22].mxu0  ;;  %2094 = vrot.lane.b32.xlu0 %v2080_v40, %s7981_s4  ;;  %v2081_v2 = vsel %vm11000_vm2, %v2055_v0, %v2075_v32  ;;  %vm11012_vm4 = vcmp.gt.f32.partialorder %v10958_v10, %v11011_v46  ;;  %vm11018_vm2 = vmmov %vm11010_vm8  ;;  %vm11020_vm15 = vcmp.gt.f32.partialorder %v10966_v44, %v11019_v38  ;;  %v11021_v53 = vld [vmem:[#allocation53_spill] sm:$0xff] }
 0x538   :  { %v5352_v28 = vadd.f32 %v10352_v34, %v5336_v47  ;;  %v5338_v51 = vmul.f32 %v10342_v7, %v5315_v52  ;;  %v5317_v56 = vpop.f32.mrb[23].mxu0  ;;  %v2069_v11 = vpop.permute.xlu1 %2068  ;;  %2096 = vrot.lane.b32.xlu1 %v2081_v2, %s7981_s4  ;;  %v4203_v44 = vand.u32 7, %v11027_v21  ;;  %v11028_v2 = vld [vmem:[#allocation63_spill] sm:$0xff] }
 0x539   :  { %v5353_v16 = vadd.f32 %v10356_v8, %v5337_v36  ;;  %v5339_v60 = vmul.f32 %v10348_v23, %v5317_v56  ;;  %v2067_v43 = vpop.permute.xlu0 %2066  ;;  %v11025_v36 = vld [vmem:[#allocation62_spill] sm:$0xff] }
 0x53a   :  { %v5356_v39 = vmax.f32 %v5352_v28, 0.0  ;;  %v5354_v17 = vadd.f32 %v10352_v34, %v5338_v51  ;;  %v2076_v63 = vsel %vm11002_vm10, %v2067_v43, %v2069_v11  ;;  %v2082_v1 = vsel %vm11004_vm0, %v2047_v33, %v2067_v43  ;;  %vm11023_vm0 = vmmov %vm11018_vm2  ;;  %v7776_v28 = vld [vmem:[#allocation7 + $0x48] sm:$0xff]  }
 0x53b   :  { %v5357_v29 = vmax.f32 %v5353_v16, 0.0  ;;  %v5355_v24 = vadd.f32 %v10356_v8, %v5339_v60  ;;  %2098 = vrot.lane.b32.xlu0 %v2082_v1, %s7981_s4  ;;  %v2083_v27 = vsel %vm11006_vm3, %v2056_v62, %v2076_v63  ;;  %vm11022_vm10 = vnez %v11021_v53  ;;  %vm11024_vm3 = vmmov %vm11023_vm0  ;;  %v11031_v16 = vld [vmem:[#allocation67_spill] sm:$0xff] }
 0x53c   :  { %v5358_v3 = vmax.f32 %v5354_v17, 0.0  ;;  %v2073_v15 = vpop.permute.xlu1 %2072  ;;  %2100 = vrot.lane.b32.xlu1 %v2083_v27, %s7981_s4  ;;  %vm11026_vm9 = vcmp.gt.f32.partialorder %v10972_v30, %v11025_v36  ;;  %v4205_v62 = vshra.s32 %v11028_v2, 5  ;;  %v4204_v60 = vand.u32 7, %v11031_v16  ;;  %v11035_v1 = vld [vmem:[#allocation55_spill] sm:$0xff] }
 0x53d   :  { %vm10384_vm1 = vcmp.gt.f32.partialorder %v5357_v29, %v5356_v39  ;;  %v5359_v37 = vmax.f32 %v5355_v24, 0.0  ;;  %v2071_v26 = vpop.permute.xlu0 %2070  ;;  %v5622_v63 = vmul.u32 16, %v4203_v44  ;;  %v7780_v16 = vld [vmem:[#allocation7 + $0x68] sm:$0xff]  }
 0x53e   :  { %v2077_v13 = vsel %vm11010_vm8, %v2071_v26, %v2073_v15  ;;  %v2084_v54 = vsel %vm11012_vm4, %v2051_v48, %v2071_v26  ;;  %v10394_v33 = vsel %vm10384_vm1, %v5357_v29, %v5356_v39  ;;  %vm11030_vm8 = vmmov %vm11023_vm0  ;;  %v11033_v39 = vld [vmem:[#allocation54_spill] sm:$0xff]  ;;  %v5624_v19 = vmul.u32 2, %v4205_v62 }
 0x53f   :  { %vm10396_vm7 = vcmp.gt.f32.partialorder %v5359_v37, %v5358_v3  ;;  %2102 = vrot.lane.b32.xlu0 %v2084_v54, %s7981_s4  ;;  %v2085_v42 = vsel %vm11016_vm11, %v2057_v35, %v2077_v13  ;;  %vm11032_vm4 = vmmov %vm11023_vm0  ;;  %vm11034_vm11 = vcmp.gt.f32.partialorder %v10977_v59, %v11033_v39  ;;  %v5623_v27 = vmul.u32 16, %v4204_v60  ;;  %v7781_v59 = vld [vmem:[#allocation7 + $0x70] sm:$0xff]  }
 0x540   :  { %v4125_v45 = vpop.permute.xlu1 %4124  ;;  %2104 = vrot.lane.b32.xlu1 %v2085_v42, %s7981_s4  ;;  %v10406_v10 = vsel %vm10396_vm7, %v5359_v37, %v5358_v3  ;;  %v5635_v15 = vadd.s32 8, %v5622_v63  ;;  %v5625_v26 = vadd.s32 %v5624_v19, %v5622_v63 }
 0x541   :  { %v4123_v48 = vpop.permute.xlu0 %4122  ;;  %v5636_v31 = vadd.s32 8, %v5623_v27  ;;  %v5626_v42 = vadd.s32 %v5624_v19, %v5623_v27 }
 0x542   :  { %v4138_v20 = vsel %vm11017_vm13, %v4123_v48, %v4125_v45  ;;  %vm11037_vm13 = vmmov %vm11023_vm0  ;;  %v5627_v9 = vadd.s32 1, %v5625_v26 }
 0x544   :  { %v4129_v41 = vpop.permute.xlu1 %4128 }
 0x545   :  { %v4127_v55 = vpop.permute.xlu0 %4126 }
 0x546   :  { %v4139_v22 = vsel %vm11023_vm0, %v4127_v55, %v4129_v41  ;;  %v5637_v41 = vadd.s32 %v5635_v15, %v5624_v19 }
 0x548   :  { %v4133_v57 = vpop.permute.xlu1 %4132 }
 0x549   :  { %v4131_v50 = vpop.permute.xlu0 %4130 }
 0x54a   :  { %v4140_v56 = vsel %vm11030_vm8, %v4131_v50, %v4133_v57  ;;  %vm11044_vm8 = vmmov %vm11023_vm0 }
 0x54c   :  { %v4137_v6 = vpop.permute.xlu1 %4136 }
 0x54d   :  { %v4135_v61 = vpop.permute.xlu0 %4134 }
 0x54e   :  { %v4141_v24 = vsel %vm11037_vm13, %v4135_v61, %v4137_v6  ;;  %vm11048_vm13 = vmmov %vm11023_vm0 }
 0x550   :  { %v4145_v14 = vpop.permute.xlu1 %4144 }
 0x551   :  { %v4143_v5 = vpop.permute.xlu0 %4142 }
 0x552   :  { %v4158_v0 = vsel %vm11018_vm2, %v4143_v5, %v4145_v14  ;;  %v4162_v25 = vsel %vm11020_vm15, %v4123_v48, %v4143_v5  ;;  %vm11038_vm2 = vmmov %vm11023_vm0  ;;  %v5638_v14 = vadd.s32 %v5636_v31, %v5624_v19 }
 0x553   :  { %4174 = vrot.lane.b32.xlu0 %v4162_v25, %s7981_s4  ;;  %v4163_v47 = vsel %vm11022_vm10, %v4138_v20, %v4158_v0  ;;  %v5628_v0 = vadd.s32 1, %v5626_v42  ;;  %vm11041_vm10 = vmmov %vm11023_vm0 }
 0x554   :  { %v4149_v32 = vpop.permute.xlu1 %4148  ;;  %4176 = vrot.lane.b32.xlu1 %v4163_v47, %s7981_s4 }
 0x555   :  { %v4147_v58 = vpop.permute.xlu0 %4146 }
 0x556   :  { %v4159_v40 = vsel %vm11024_vm3, %v4147_v58, %v4149_v32  ;;  %v4164_v52 = vsel %vm11026_vm9, %v4127_v55, %v4147_v58  ;;  %v5633_v32 = vsel %vm10384_vm1, %v5627_v9, %v5625_v26  ;;  %vm11042_vm3 = vmmov %vm11023_vm0  ;;  %v7782_v26 = vld [vmem:[#allocation7 + $0x78] sm:$0xff]  }
 0x557   :  { %4178 = vrot.lane.b32.xlu0 %v4164_v52, %s7981_s4  ;;  %v4165_v51 = vsel %vm9764_vm5, %v4139_v22, %v4159_v40  ;;  %vm11036_vm5 = vnez %v11035_v1  ;;  %v5645_v22 = vadd.s32 1, %v5637_v41  ;;  %v5646_v52 = vadd.s32 1, %v5638_v14  ;;  %vm11043_vm9 = vmmov %vm11023_vm0 }
 0x558   :  { %v4153_v11 = vpop.permute.xlu1 %4152  ;;  %4180 = vrot.lane.b32.xlu1 %v4165_v51, %s7981_s4  ;;  %v7777_v51 = vld [vmem:[#allocation7 + $0x50] sm:$0xff]  }
 0x559   :  { %v4151_v43 = vpop.permute.xlu0 %4150 }
 0x55a   :  { %v4160_v30 = vsel %vm11032_vm4, %v4151_v43, %v4153_v11  ;;  %v4166_v17 = vsel %vm11034_vm11, %v4131_v50, %v4151_v43  ;;  %v7779_v11 = vld [vmem:[#allocation7 + $0x60] sm:$0xff]   ;;  %vm11045_vm4 = vmmov %vm11023_vm0 }
 0x55b   :  { %4182 = vrot.lane.b32.xlu0 %v4166_v17, %s7981_s4  ;;  %v4167_v29 = vsel %vm11036_vm5, %v4140_v56, %v4160_v30  ;;  %v7778_v56 = vld [vmem:[#allocation7 + $0x58] sm:$0xff]   ;;  %vm11046_vm11 = vmmov %vm11023_vm0 }
 0x55c   :  { %v4157_v4 = vpop.permute.xlu1 %4156  ;;  %4184 = vrot.lane.b32.xlu1 %v4167_v29, %s7981_s4  ;;  %vm11047_vm5 = vmmov %vm11023_vm0 }
 0x55d   :  { %v4155_v35 = vpop.permute.xlu0 %4154 }
 0x55e   :  { %v4161_v3 = vsel %vm11038_vm2, %v4155_v35, %v4157_v4  ;;  %v4168_v37 = vsel %vm4112_vm12, %v4135_v61, %v4155_v35  ;;  %vm11049_vm2 = vmmov %vm11023_vm0 }
 0x55f   :  { %4186 = vrot.lane.b32.xlu0 %v4168_v37, %s7981_s4  ;;  %v4169_v46 = vsel %vm9781_vm14, %v4141_v24, %v4161_v3 }
 0x560   :  { %v5597_v54 = vpop.f32.mrb[36].mxu1  ;;  %4188 = vrot.lane.b32.xlu1 %v4169_v46, %s7981_s4 }
 0x561   :  { %v5610_v45 = vmul.f32 %v5597_v54, %v10342_v7  ;;  %v5599_v48 = vpop.f32.mrb[37].mxu1 }
 0x562   :  { %v5611_v55 = vmul.f32 %v5599_v48, %v10348_v23  ;;  %v5601_v57 = vpop.f32.mrb[38].mxu1 }
 0x563   :  { %v5614_v50 = vadd.f32 %v5610_v45, %v10352_v34  ;;  %v5612_v6 = vmul.f32 %v5601_v57, %v10342_v7  ;;  %v5603_v61 = vpop.f32.mrb[39].mxu1 }
 0x564   :  { %v5615_v20 = vadd.f32 %v5611_v55, %v10356_v8  ;;  %v5613_v5 = vmul.f32 %v5603_v61, %v10348_v23  ;;  %v5634_v23 = vsel %vm10396_vm7, %v5628_v0, %v5626_v42  ;;  %vm5657_vm7 = vcmask 130048   ;;  %v6805_v55 = vld [vmem:[%s10639_s10 + $0x3] sm:$0x1] }
 0x565   :  { %v5618_v38 = vmax.f32 %v5614_v50, 0.0  ;;  %v5616_v25 = vadd.f32 %v5612_v6, %v10352_v34 }
 0x566   :  { %v5619_v53 = vmax.f32 %v5615_v20, 0.0  ;;  %v5617_v47 = vadd.f32 %v5613_v5, %v10356_v8  ;;  %v7783_v20 = vld [vmem:[#allocation7] sm:$0xff]  }
 0x567   :  { %vm5639_vm14 = vcmp.gt.f32.partialorder %v5618_v38, %v10394_v33  ;;  %v5620_v7 = vmax.f32 %v5616_v25, 0.0  ;;  %v7784_v25 = vld [vmem:[#allocation7 + $0x8] sm:$0xff]  }
 0x568   :  { %v5643_v58 = vsel %vm5639_vm14, %v5637_v41, %v5633_v32  ;;  %v5641_v40 = vsel %vm5639_vm14, %v5618_v38, %v10394_v33  ;;  %v5621_v36 = vmax.f32 %v5617_v47, 0.0  ;;  %v5656_v33 = vld [vmem:[%s10639_s10] sm:$0x1]  ;;  %vm11050_vm14 = vmmov %vm11023_vm0  ;;  %v7786_v47 = vld [vmem:[#allocation7 + $0x18] sm:$0xff]  }
 0x569   :  { %vm5647_vm12 = vcmp.gt.f32.partialorder %v5619_v53, %v5641_v40  ;;  %vm5640_vm15 = vcmp.gt.f32.partialorder %v5620_v7, %v10406_v10  ;;  %v7788_v32 = vld [vmem:[#allocation7 + $0x28] sm:$0xff]  }
 0x56a   :  { %v5649_v34 = vsel %vm5647_vm12, %v5619_v53, %v5641_v40  ;;  %v5644_v8 = vsel %vm5640_vm15, %v5638_v14, %v5634_v23  ;;  %v5642_v21 = vsel %vm5640_vm15, %v5620_v7, %v10406_v10  ;;  %v5651_v49 = vsel %vm5647_vm12, %v5645_v22, %v5643_v58  ;;  %v7775_v10 = vld [vmem:[#allocation7 + $0x40] sm:$0xff]   ;;  %vm11051_vm12 = vmmov %vm11023_vm0  ;;  %v7785_v53 = vld [vmem:[#allocation7 + $0x10] sm:$0xff]  }
 0x56b   :  { %vm5648_vm1 = vcmp.gt.f32.partialorder %v5621_v36, %v5642_v21  ;;  %5653 = vst [vmem:[#allocation11] sm:$0xff] %v5651_v49  ;;  %vm11052_vm15 = vmmov %vm11023_vm0  ;;  %v7787_v22 = vld [vmem:[#allocation7 + $0x20] sm:$0xff]   ;;  %v7789_v7 = vld [vmem:[#allocation7 + $0x30] sm:$0xff]  }
 0x56c   :  { %v5650_v44 = vsel %vm5648_vm1, %v5621_v36, %v5642_v21  ;;  %v5652_v2 = vsel %vm5648_vm1, %v5646_v52, %v5644_v8  ;;  %vm11053_vm1 = vmmov %vm11023_vm0  ;;  %v7790_v58 = vld [vmem:[#allocation7 + $0x38] sm:$0xff]   ;;  %v6795_v36 = vld [vmem:[%s10639_s10 + $0x2] sm:$0x1] }
 0x56d   :  { %v10463_v62 = vpack.c.bf16 %v5650_v44, %v5649_v34  ;;  %5654 = vst [vmem:[#allocation11 + $0x8] sm:$0xff] %v5652_v2  ;;  %v7791_v52 = vld [vmem:[#allocation7 + $0x80] sm:$0xff]   ;;  %v7792_v23 = vld [vmem:[#allocation7 + $0x88] sm:$0xff]   ;;  %v7793_v34 = vld [vmem:[#allocation7 + $0x90] sm:$0xff]  }
 0x56e   :  { %v7794_v8 = vld [vmem:[#allocation7 + $0x98] sm:$0xff]   ;;  %v7795_v21 = vld [vmem:[#allocation7 + $0xa0] sm:$0xff]   ;;  %v7796_v49 = vld [vmem:[#allocation7 + $0xa8] sm:$0xff]  }
 0x56f   :  { %7132 = vmatpush3.bf16.msra.mxu0 %v10463_v62  ;;  %7210 = vmatpush3.bf16.msra.mxu1 %v10463_v62  ;;  %v7797_v44 = vld [vmem:[#allocation7 + $0xb0] sm:$0xff]   ;;  %v7798_v2 = vld [vmem:[#allocation7 + $0xb8] sm:$0xff]  }
 0x570   :  { %7137 = vmatprep.subr.bf16.mxu0 %v7984_v18  ;;  %7235 = vmatprep.subr.bf16.mxu1 %v7984_v18 }
 0x572   :  { %7134 = vmatmul.mubr.msk.bf16.vlgmr.msra.gmra.mrb[24].mxu0 %vm5657_vm7, %v5656_v33  ;;  %7212 = vmatmul.mubr.msk.bf16.vlgmr.msra.gmra.mrb[40].mxu1 %vm5657_vm7, %v6805_v55 }
 0x573   :  { %7138 = vmatpush3.bf16.msra.mxu0 %v10463_v62  ;;  %7139 = vmatprep.mubr.msk.bf16.mxu0 %vm7985_vm6, %v7984_v18 }
 0x574   :  { %7143 = vmatprep.subr.bf16.mxu0 %v7984_v18  ;;  %7251 = vmatprep.mubr.msk.bf16.mxu1 %vm7985_vm6, %v7984_v18 }
 0x57a   :  { %7140 = vmatmul.mubr.msk.bf16.vlgmr.msra.gmra.mrb[28].mxu0 %vm5657_vm7, %v6777_v12 }
 0x57b   :  { %7144 = vmatpush3.bf16.msra.mxu0 %v7775_v10  ;;  %7159 = vmatprep.mubr.msk.bf16.mxu0 %vm7985_vm6, %v7984_v18 }
 0x57c   :  { %7145 = vmatprep.subr.bf16.mxu0 %v7984_v18 }
 0x57f   :  { %7146 = vmatpush3.bf16.msra.mxu0 %v7776_v28  ;;  %v7807_v28 = vld [vmem:[%s10643_s14] sm:$0xff]  }
 0x580   :  { %7147 = vmatprep.subr.bf16.mxu0 %v7984_v18  ;;  %7236 = vmatpush3.bf16.msra.mxu1 %v7807_v28 }
 0x581   :  { %7237 = vmatprep.subr.bf16.mxu1 %v7984_v18 }
 0x583   :  { %7148 = vmatpush3.bf16.msra.mxu0 %v7777_v51  ;;  %v7808_v51 = vld [vmem:[%s10643_s14 + $0x8] sm:$0xff]  }
 0x584   :  { %7149 = vmatprep.subr.bf16.mxu0 %v7984_v18  ;;  %7238 = vmatpush3.bf16.msra.mxu1 %v7808_v51 }
 0x585   :  { %7239 = vmatprep.subr.bf16.mxu1 %v7984_v18 }
 0x587   :  { %7150 = vmatpush3.bf16.msra.mxu0 %v7778_v56  ;;  %v7809_v56 = vld [vmem:[%s10643_s14 + $0x10] sm:$0xff]  }
 0x588   :  { %7151 = vmatprep.subr.bf16.mxu0 %v7984_v18  ;;  %7240 = vmatpush3.bf16.msra.mxu1 %v7809_v56 }
 0x589   :  { %7241 = vmatprep.subr.bf16.mxu1 %v7984_v18 }
 0x58b   :  { %7152 = vmatpush3.bf16.msra.mxu0 %v7779_v11  ;;  %v7810_v11 = vld [vmem:[%s10643_s14 + $0x18] sm:$0xff]  }
 0x58c   :  { %7153 = vmatprep.subr.bf16.mxu0 %v7984_v18  ;;  %7242 = vmatpush3.bf16.msra.mxu1 %v7810_v11 }
 0x58d   :  { %7243 = vmatprep.subr.bf16.mxu1 %v7984_v18 }
 0x58f   :  { %7154 = vmatpush3.bf16.msra.mxu0 %v7780_v16  ;;  %v7811_v16 = vld [vmem:[%s10643_s14 + $0x20] sm:$0xff]  }
 0x590   :  { %7155 = vmatprep.subr.bf16.mxu0 %v7984_v18  ;;  %7244 = vmatpush3.bf16.msra.mxu1 %v7811_v16 }
 0x591   :  { %7245 = vmatprep.subr.bf16.mxu1 %v7984_v18 }
 0x593   :  { %7156 = vmatpush3.bf16.msra.mxu0 %v7781_v59  ;;  %v7813_v59 = vld [vmem:[%s10643_s14 + $0x30] sm:$0xff]  }
 0x594   :  { %7157 = vmatprep.subr.bf16.mxu0 %v7984_v18 }
 0x597   :  { %7158 = vmatpush3.bf16.msra.mxu0 %v7782_v26  ;;  %v6815_v26 = vld [vmem:[%s10641_s12] ss:$0 sm:$0xff] }
 0x598   :  { %7163 = vmatprep.subr.bf16.mxu0 %v7984_v18 }
 0x5a5   :  { %v2091_v60 = vpop.permute.xlu0 %2090 }
 0x5a6   :  { %v2093_v43 = vpop.permute.xlu1 %2092 }
 0x5a7   :  { %v2106_v30 = vsel %vm11041_vm10, %v2091_v60, %v2093_v43  ;;  %2111 = vst.msk [vmem:[#allocation9 + $0x8] sm:$0xff] %vm11023_vm0, %v2093_v43  ;;  %vm11054_vm10 = vmmov %vm11023_vm0  ;;  %v7812_v60 = vld [vmem:[%s10643_s14 + $0x28] sm:$0xff]  }
 0x5a8   :  { %2110 = vst [vmem:[#allocation9] sm:$0xff] %v2106_v30  ;;  %7246 = vmatpush3.bf16.msra.mxu1 %v7812_v60  ;;  %v7799_v30 = vld [vmem:[#allocation7 + $0xc0] sm:$0xff]  }
 0x5a9   :  { %v2095_v39 = vpop.permute.xlu0 %2094  ;;  %7247 = vmatprep.subr.bf16.mxu1 %v7984_v18 }
 0x5aa   :  { %v2097_v17 = vpop.permute.xlu1 %2096 }
 0x5ab   :  { %v2107_v63 = vsel %vm11042_vm3, %v2095_v39, %v2097_v17  ;;  %2113 = vst.msk [vmem:[#allocation9 + $0x18] sm:$0xff] %vm11043_vm9, %v2097_v17 }
 0x5ac   :  { %2112 = vst [vmem:[#allocation9 + $0x10] sm:$0xff] %v2107_v63  ;;  %7248 = vmatpush3.bf16.msra.mxu1 %v7813_v59 }
 0x5ad   :  { %v2099_v19 = vpop.permute.xlu0 %2098  ;;  %7249 = vmatprep.subr.bf16.mxu1 %v7984_v18 }
 0x5ae   :  { %v2101_v1 = vpop.permute.xlu1 %2100 }
 0x5af   :  { %v2108_v29 = vsel %vm11044_vm8, %v2099_v19, %v2101_v1  ;;  %2115 = vst.msk [vmem:[#allocation9 + $0x48] sm:$0xff] %vm11045_vm4, %v2101_v1  ;;  %v7800_v1 = vld [vmem:[#allocation7 + $0xc8] sm:$0xff]  }
 0x5b0   :  { %2114 = vst [vmem:[#allocation9 + $0x40] sm:$0xff] %v2108_v29  ;;  %v7801_v29 = vld [vmem:[#allocation7 + $0xd0] sm:$0xff]  }
 0x5b1   :  { %v2103_v24 = vpop.permute.xlu0 %2102 }
 0x5b2   :  { %v2105_v4 = vpop.permute.xlu1 %2104 }
 0x5b3   :  { %v2109_v27 = vsel %vm11046_vm11, %v2103_v24, %v2105_v4  ;;  %2117 = vst.msk [vmem:[#allocation9 + $0x58] sm:$0xff] %vm11047_vm5, %v2105_v4  ;;  %v7802_v24 = vld [vmem:[#allocation7 + $0xd8] sm:$0xff]   ;;  %v7803_v4 = vld [vmem:[#allocation7 + $0xe0] sm:$0xff]  }
 0x5b4   :  { %2116 = vst [vmem:[#allocation9 + $0x50] sm:$0xff] %v2109_v27  ;;  %v7804_v27 = vld [vmem:[#allocation7 + $0xe8] sm:$0xff]  }
 0x5c5   :  { %v4175_v35 = vpop.permute.xlu0 %4174 }
 0x5c6   :  { %v4177_v3 = vpop.permute.xlu1 %4176 }
 0x5c7   :  { %v4190_v15 = vsel %vm11048_vm13, %v4175_v35, %v4177_v3  ;;  %4196 = vst.msk [vmem:[#allocation9 + $0x28] sm:$0xff] %vm11049_vm2, %v4177_v3  ;;  %v7805_v35 = vld [vmem:[#allocation7 + $0xf0] sm:$0xff]   ;;  %v7806_v3 = vld [vmem:[#allocation7 + $0xf8] sm:$0xff]  }
 0x5c8   :  { %4195 = vst [vmem:[#allocation9 + $0x20] sm:$0xff] %v4190_v15 }
 0x5c9   :  { %v4179_v37 = vpop.permute.xlu0 %4178 }
 0x5ca   :  { %v4181_v13 = vpop.permute.xlu1 %4180 }
 0x5cb   :  { %v4191_v46 = vsel %vm11050_vm14, %v4179_v37, %v4181_v13  ;;  %4198 = vst.msk [vmem:[#allocation9 + $0x38] sm:$0xff] %vm11051_vm12, %v4181_v13  ;;  %v7814_v37 = vld [vmem:[%s10643_s14 + $0x38] sm:$0xff]   ;;  %s6406_s14 = sshll.u32 %s7986_s7, 4  ;;  %s6407_s14 = int_to_ptr.vmem [resolvable:$true] %s6406_s14 }
 0x5cc   :  { %4197 = vst [vmem:[#allocation9 + $0x30] sm:$0xff] %v4191_v46  ;;  %7250 = vmatpush3.bf16.msra.mxu1 %v7814_v37  ;;  %v6816_v46 = vld [vmem:[%s10642_s13] ss:$0 sm:$0xff]  ;;  %s7900_s22 = scalar_lea.vmem %s6407_s14, 2048  ;;  %p7905_p11 = scmp.lt.s32.totalorder %s6407_s14, %s6407_s14 }
 0x5cd   :  { %v4183_v54 = vpop.permute.xlu0 %4182  ;;  %p7901_p10 = scmp.ne.s32.totalorder %s6407_s14, %s7900_s22  ;;  %p7906_p12 = scmp.lt.s32.totalorder %s7900_s22, %s7900_s22 }
 0x5ce   :  { %v4185_v31 = vpop.permute.xlu1 %4184 }
 0x5cf   :  { %v4192_v42 = vsel %vm11052_vm15, %v4183_v54, %v4185_v31  ;;  %4200 = vst.msk [vmem:[#allocation9 + $0x68] sm:$0xff] %vm11053_vm1, %v4185_v31  ;;  %p7907_p13 = por %p7906_p12, %p7905_p11 }
 0x5d0   :  { %4199 = vst [vmem:[#allocation9 + $0x60] sm:$0xff] %v4192_v42 }
 0x5d1   :  { %v4187_v45 = vpop.permute.xlu0 %4186  ;;  %p7908_p0 = pnand %p7907_p13, %p7901_p10 }
 0x5d2   :  { %v4189_v48 = vpop.permute.xlu1 %4188 }
 0x5d3   :  { %v4193_v41 = vsel %vm11054_vm10, %v4187_v45, %v4189_v48  ;;  %4202 = vst.msk [vmem:[#allocation9 + $0x78] sm:$0xff] %vm11023_vm0, %v4189_v48 }
 0x5d4   :  { %4201 = vst [vmem:[#allocation9 + $0x70] sm:$0xff] %v4193_v41 }
 0x645   :  { %v5695_v57 = vpop.f32.mrb[24].mxu0 }
 0x646   :  { %v7135_v9 = vpop.f32.mrb[25].mxu0  ;;  %v5701_v40 = vpack.c.bf16 %v5695_v57, %v5695_v57 }
 0x647   :  { %v5698_v50 = vpop.f32.mrb[26].mxu0 }
 0x648   :  { %v7136_v6 = vpop.f32.mrb[27].mxu0 }
 0x64d   :  { %v5757_v61 = vpop.f32.mrb[28].mxu0 }
 0x64e   :  { %v5763_v14 = vpack.c.bf16 %v5757_v61, %v5757_v61  ;;  %v7141_v5 = vpop.f32.mrb[29].mxu0 }
 0x64f   :  { %v5760_v0 = vpop.f32.mrb[30].mxu0 }
 0x650   :  { %7160 = vmatmul.mubr.bf16.vlgmr.msra.gmra.mrb[32].mxu0 %v5763_v14  ;;  %v7142_v38 = vpop.f32.mrb[31].mxu0 }
 0x651   :  { %7164 = vmatpush3.bf16.msra.mxu0 %v7783_v20  ;;  %7179 = vmatprep.mubr.msk.bf16.mxu0 %vm7985_vm6, %v7984_v18 }
 0x652   :  { %7165 = vmatprep.subr.bf16.mxu0 %v7984_v18 }
 0x655   :  { %7166 = vmatpush3.bf16.msra.mxu0 %v7784_v25 }
 0x656   :  { %7167 = vmatprep.subr.bf16.mxu0 %v7984_v18 }
 0x659   :  { %7168 = vmatpush3.bf16.msra.mxu0 %v7785_v53 }
 0x65a   :  { %7169 = vmatprep.subr.bf16.mxu0 %v7984_v18 }
 0x65d   :  { %7170 = vmatpush3.bf16.msra.mxu0 %v7786_v47 }
 0x65e   :  { %7171 = vmatprep.subr.bf16.mxu0 %v7984_v18 }
 0x661   :  { %7172 = vmatpush3.bf16.msra.mxu0 %v7787_v22 }
 0x662   :  { %7173 = vmatprep.subr.bf16.mxu0 %v7984_v18 }
 0x665   :  { %7174 = vmatpush3.bf16.msra.mxu0 %v7788_v32 }
 0x666   :  { %7175 = vmatprep.subr.bf16.mxu0 %v7984_v18 }
 0x669   :  { %7176 = vmatpush3.bf16.msra.mxu0 %v7789_v7 }
 0x66a   :  { %7177 = vmatprep.subr.bf16.mxu0 %v7984_v18 }
 0x66d   :  { %7178 = vmatpush3.bf16.msra.mxu0 %v7790_v58 }
 0x66e   :  { %7183 = vmatprep.subr.bf16.mxu0 %v7984_v18 }
 0x670   :  { %7180 = vmatmul.mubr.bf16.vlgmr.msra.gmra.mrb[32].mxu0 %v5701_v40 }
 0x671   :  { %7184 = vmatpush3.bf16.msra.mxu0 %v10463_v62  ;;  %7185 = vmatprep.mubr.msk.bf16.mxu0 %vm7985_vm6, %v7984_v18  ;;  %v6148_v62 = vpop.f32.mrb[40].mxu1 }
 0x672   :  { %7189 = vmatprep.subr.bf16.mxu0 %v7984_v18  ;;  %v7213_v33 = vpop.f32.mrb[41].mxu1  ;;  %v6154_v15 = vpack.c.bf16 %v6148_v62, %v6148_v62 }
 0x673   :  { %v6151_v12 = vpop.f32.mrb[42].mxu1 }
 0x674   :  { %v7214_v10 = vpop.f32.mrb[43].mxu1 }
 0x678   :  { %7186 = vmatmul.mubr.msk.bf16.vlgmr.msra.gmra.mrb[36].mxu0 %vm5657_vm7, %v6795_v36 }
 0x679   :  { %7190 = vmatpush3.bf16.msra.mxu0 %v7791_v52  ;;  %7205 = vmatprep.mubr.msk.bf16.mxu0 %vm7985_vm6, %v7984_v18 }
 0x67a   :  { %7191 = vmatprep.subr.bf16.mxu0 %v7984_v18 }
 0x67d   :  { %7192 = vmatpush3.bf16.msra.mxu0 %v7792_v23 }
 0x67e   :  { %7193 = vmatprep.subr.bf16.mxu0 %v7984_v18 }
 0x681   :  { %7194 = vmatpush3.bf16.msra.mxu0 %v7793_v34 }
 0x682   :  { %7195 = vmatprep.subr.bf16.mxu0 %v7984_v18 }
 0x685   :  { %7196 = vmatpush3.bf16.msra.mxu0 %v7794_v8 }
 0x686   :  { %7197 = vmatprep.subr.bf16.mxu0 %v7984_v18 }
 0x689   :  { %7198 = vmatpush3.bf16.msra.mxu0 %v7795_v21 }
 0x68a   :  { %7199 = vmatprep.subr.bf16.mxu0 %v7984_v18 }
 0x68d   :  { %7200 = vmatpush3.bf16.msra.mxu0 %v7796_v49 }
 0x68e   :  { %7201 = vmatprep.subr.bf16.mxu0 %v7984_v18 }
 0x691   :  { %7202 = vmatpush3.bf16.msra.mxu0 %v7797_v44 }
 0x692   :  { %7203 = vmatprep.subr.bf16.mxu0 %v7984_v18 }
 0x695   :  { %7204 = vmatpush3.bf16.msra.mxu0 %v7798_v2 }
 0x696   :  { %7215 = vmatprep.subr.bf16.mxu0 %v7984_v18 }
 0x74b   :  { %v5996_v43 = vpop.f32.mrb[36].mxu0 }
 0x74c   :  { %v6002_v39 = vpack.c.bf16 %v5996_v43, %v5996_v43  ;;  %v7187_v17 = vpop.f32.mrb[37].mxu0 }
 0x74d   :  { %v5999_v63 = vpop.f32.mrb[38].mxu0 }
 0x74e   :  { %7206 = vmatmul.mubr.bf16.vlgmr.msra.gmra.mrb[32].mxu0 %v6002_v39  ;;  %v7188_v19 = vpop.f32.mrb[39].mxu0 }
 0x74f   :  { %7216 = vmatpush3.bf16.msra.mxu0 %v7799_v30  ;;  %7231 = vmatprep.mubr.msk.bf16.mxu0 %vm7985_vm6, %v7984_v18 }
 0x750   :  { %7217 = vmatprep.subr.bf16.mxu0 %v7984_v18 }
 0x753   :  { %7218 = vmatpush3.bf16.msra.mxu0 %v7800_v1 }
 0x754   :  { %7219 = vmatprep.subr.bf16.mxu0 %v7984_v18 }
 0x757   :  { %7220 = vmatpush3.bf16.msra.mxu0 %v7801_v29 }
 0x758   :  { %7221 = vmatprep.subr.bf16.mxu0 %v7984_v18 }
 0x75b   :  { %7222 = vmatpush3.bf16.msra.mxu0 %v7802_v24 }
 0x75c   :  { %7223 = vmatprep.subr.bf16.mxu0 %v7984_v18 }
 0x75f   :  { %7224 = vmatpush3.bf16.msra.mxu0 %v7803_v4 }
 0x760   :  { %7225 = vmatprep.subr.bf16.mxu0 %v7984_v18 }
 0x763   :  { %7226 = vmatpush3.bf16.msra.mxu0 %v7804_v27 }
 0x764   :  { %7227 = vmatprep.subr.bf16.mxu0 %v7984_v18 }
 0x767   :  { %7228 = vmatpush3.bf16.msra.mxu0 %v7805_v35 }
 0x768   :  { %7229 = vmatprep.subr.bf16.mxu0 %v7984_v18 }
 0x76b   :  { %7230 = vmatpush3.bf16.msra.mxu0 %v7806_v3 }
 0x76e   :  { %7232 = vmatmul.mubr.bf16.vlgmr.msra.gmra.mrb[32].mxu0 %v6154_v15 }
 0x841   :  { %v6254_v13 = vpop.f32.mrb[32].mxu0 }
 0x842   :  { %v6268_v54 = vmul.f32 %v6815_v26, %v6254_v13  ;;  %v7233_v31 = vpop.f32.mrb[33].mxu0 }
 0x843   :  { %v6257_v42 = vpop.f32.mrb[34].mxu0 }
 0x844   :  { %v6276_v45 = vadd.f32 %v6816_v46, %v6268_v54  ;;  %v7234_v48 = vpop.f32.mrb[35].mxu0 }
 0x846   :  { %v6277_v18 = vmax.f32 %v6276_v45, 0.0 }
 0x848   :  { %v6278_v41 = vpack.c.bf16 %v6277_v18, %v6277_v18 }
 0x84a   :  { %7252 = vmatmul.mubr.bf16.vlgmr.msra.gmra.mrb[44].mxu1 %v6278_v41 }
 0x84b   :  { %7911 = shalt.err (!%p7908_p0)
}
 0x84c   :  { %s7912_s28 = scalar_lea.hbm %s10646_s17, 2048 }
 0x84d   :  { %p7913_p1 = scmp.ne.s32.totalorder %s10646_s17, %s7912_s28  ;;  %p7916_p2 = scmp.lt.u32.totalorder %s7912_s28, %s10646_s17 }
 0x84f   :  { %p7918_p3 = pnand %p7916_p2, %p7913_p1 }
 0x851   :  { %7921 = shalt.err (!%p7918_p3)
}
 0x852   :  { %s7987_s25 = smov 256   ;;  %s7988_s26 = smov 16  }
 0x853   :  { %6412 = dma.vmem_to_hbm [thread:$0]  %s6407_s14, 2048, %s10646_s17, [#allocation10], %s7987_s25, %s7987_s25, %s7988_s26  }
 0x854   :  { %s7989_s0 = smov [#allocation11]  }
 0x855   :  { %s6418_s19 = sshll.u32 %s7989_s0, 4  ;;  %s6419_s19 = int_to_ptr.vmem [resolvable:$true] %s6418_s19 }
 0x856   :  { %s7922_s1 = scalar_lea.vmem %s6419_s19, 256  ;;  %p7927_p5 = scmp.lt.s32.totalorder %s6419_s19, %s6419_s19 }
 0x857   :  { %p7923_p4 = scmp.ne.s32.totalorder %s6419_s19, %s7922_s1  ;;  %p7928_p6 = scmp.lt.s32.totalorder %s7922_s1, %s7922_s1 }
 0x859   :  { %p7929_p7 = por %p7928_p6, %p7927_p5 }
 0x85b   :  { %p7930_p8 = pnand %p7929_p7, %p7923_p4 }
 0x85d   :  { %7933 = shalt.err (!%p7930_p8)
}
 0x85e   :  { %s7934_s20 = scalar_lea.hbm %s10647_s18, 256 }
 0x85f   :  { %p7935_p9 = scmp.ne.s32.totalorder %s10647_s18, %s7934_s20  ;;  %p7938_p10 = scmp.lt.u32.totalorder %s7934_s20, %s10647_s18 }
 0x861   :  { %p7940_p11 = pnand %p7938_p10, %p7935_p9 }
 0x863   :  { %7943 = shalt.err (!%p7940_p11)
}
 0x864   :  { %s11055_s4 = smov 128   ;;  %v6817_v55 = vld [vmem:[%s10644_s15] ss:$0 sm:$0xff]  ;;  %s7990_s22 = smov [#allocation8]  }
 0x865   :  { %6424 = dma.vmem_to_hbm [thread:$0]  %s6419_s19, 256, %s10647_s18, [#allocation10], %s11055_s4, %s11055_s4, %s7976_s23  }
 0x866   :  { %s6397_s12 = sshll.u32 %s7990_s22, 4  ;;  %s6398_s12 = int_to_ptr.vmem [resolvable:$true] %s6397_s12 }
 0x867   :  { %s7944_s13 = scalar_lea.vmem %s6398_s12, 32  ;;  %p7949_p13 = scmp.lt.s32.totalorder %s6398_s12, %s6398_s12 }
 0x868   :  { %p7945_p12 = scmp.ne.s32.totalorder %s6398_s12, %s7944_s13  ;;  %p7950_p0 = scmp.lt.s32.totalorder %s7944_s13, %s7944_s13 }
 0x86a   :  { %p7951_p1 = por %p7950_p0, %p7949_p13 }
 0x86c   :  { %p7952_p2 = pnand %p7951_p1, %p7945_p12 }
 0x91d   :  { %v6384_v57 = vpop.f32.mrb[44].mxu1 }
 0x91e   :  { %v6385_v9 = vadd.f32 %v6817_v55, %v6384_v57  ;;  %v7253_v50 = vpop.f32.mrb[45].mxu1 }
 0x91f   :  { %v6387_v6 = vpop.f32.mrb[46].mxu1 }
 0x920   :  { %6390 = vst [vmem:[#allocation8] sm:$0x3] %v6385_v9  ;;  %v7254_v61 = vpop.f32.mrb[47].mxu1 }
 0x921   :  { %7955 = shalt.err (!%p7952_p2)
}
 0x922   :  { %s7956_s15 = scalar_lea.hbm %s10645_s16, 32 }
 0x923   :  { %p7957_p3 = scmp.ne.s32.totalorder %s10645_s16, %s7956_s15  ;;  %p7960_p4 = scmp.lt.u32.totalorder %s7956_s15, %s10645_s16 }
 0x925   :  { %p7962_p5 = pnand %p7960_p4, %p7957_p3 }
 0x927   :  { %7965 = shalt.err (!%p7962_p5)
}
 0x928   :  { %6400 = dma.vmem_to_hbm [thread:$0]  %s6398_s12, 32, %s10645_s16, [#allocation4]  }
 0x929   :  { %7970 = dma.done.wait [#allocation4], 32  }
 0x92a   :  { %7971 = vsyncadd [#allocation4], 4294967264 }
 0x92b   :  { %7972 = dma.done.wait [#allocation10], 2304  }
 0x92c   :  { %7973 = vsyncadd [#allocation10], 4294964992 }
 0x92d   :  { %6434 = vsyncpa [#allocation3], 1 }
 0x92e   :  { %6435 = vsyncpa [#allocation6], 1 }
 0x92f   :  { %6436 = vsyncpa [#allocation4], 1 }
 0x930   :  { %6437 = vsyncpa [#allocation10], 1 }

</bundles_post_ra>
